<compile_context>
chip_gen: v6e
topology: v6e:2x2x1
jax: 0.10.0
libtpu: 0.0.40
codegen_flags: <defaults>
</compile_context>

<pallas_src>
import math

import jax
import jax.numpy as jnp
from jax import lax
from jax.experimental import pallas as pl
from jax.experimental.pallas import tpu as pltpu


# ------------------------------ fused kernel -------------------------------- #

def vgg_kernel(x_ref, w1_ref, b1_ref, w2_ref, b2_ref,
               wl1_ref, bl1_ref, wl2_ref, bl2_ref, wl3_ref, bl3_ref,
               out_ref, p1_ref, p2_ref, feat_ref):
    # x_ref   : (N, Cin, L0)            input, PyTorch NCL layout
    # w1_ref  : (K, C1, Cin)  b1_ref: (C1, 1)     first conv
    # w2_ref  : (K, C2, C1)   b2_ref: (C2, 1)     second conv
    # wl*_ref : (Din, Dout)   bl*_ref: (1, Dout)  classifier linears
    # out_ref : (N, num_classes)
    # p1_ref  : (Cin, L0+2)   VMEM scratch, padded conv1 input
    # p2_ref  : (C1,  L1+2)   VMEM scratch, padded conv2 input
    # feat_ref: (N, C2*L2)    VMEM scratch, flattened features for the classifier
    N, Cin, L0 = x_ref.shape
    K, C1, _ = w1_ref.shape
    _, C2, _ = w2_ref.shape
    L1, L2 = L0 // 2, L0 // 4

    # Zero the padding scratch once; only interior columns are rewritten per sample,
    # so the border columns stay zero for every batch element.
    p1_ref[...] = jnp.zeros_like(p1_ref)
    p2_ref[...] = jnp.zeros_like(p2_ref)

    for n in range(N):  # tiny static batch -> fully unrolled inside the one kernel
        # ---- Conv1d(Cin->C1, k=3, pad=1) + ReLU + MaxPool1d(2) ----
        p1_ref[:, 1:L0 + 1] = x_ref[n]                       # in-kernel zero padding
        acc = jnp.zeros((C1, L0), jnp.float32)
        for k in range(K):                                   # K=3, static unroll
            acc = acc + jnp.dot(w1_ref[k], p1_ref[:, k:k + L0],
                                preferred_element_type=jnp.float32)
        h = jnp.maximum(acc + b1_ref[...], 0.0)              # (C1, L0)
        h = jnp.max(h.reshape(C1, L1, 2), axis=-1)           # fused MaxPool1d(2)

        # ---- Conv1d(C1->C2, k=3, pad=1) + ReLU + MaxPool1d(2) ----
        p2_ref[:, 1:L1 + 1] = h
        acc2 = jnp.zeros((C2, L1), jnp.float32)
        for k in range(K):
            acc2 = acc2 + jnp.dot(w2_ref[k], p2_ref[:, k:k + L1],
                                  preferred_element_type=jnp.float32)
        h2 = jnp.maximum(acc2 + b2_ref[...], 0.0)            # (C2, L1)
        h2 = jnp.max(h2.reshape(C2, L2, 2), axis=-1)         # (C2, L2)

        # PyTorch x.view(N, -1) on an NCL tensor == channel-major flatten,
        # which is exactly the row-major reshape of (C2, L2).
        feat_ref[n:n + 1, :] = h2.reshape(1, C2 * L2)

    # ---- classifier (Dropout = identity in eval mode), batched over N ----
    f = feat_ref[...]                                        # (N, C2*L2)
    y = jnp.dot(f, wl1_ref[...], preferred_element_type=jnp.float32) + bl1_ref[...]
    y = jnp.maximum(y, 0.0)
    y = jnp.dot(y, wl2_ref[...], preferred_element_type=jnp.float32) + bl2_ref[...]
    y = jnp.maximum(y, 0.0)
    y = jnp.dot(y, wl3_ref[...], preferred_element_type=jnp.float32) + bl3_ref[...]
    out_ref[...] = y.astype(out_ref.dtype)


# ------------------------------ wrapper -------------------------------------- #

def vgg_forward(x_ncl, convs, linears):
    (w1, b1), (w2, b2) = convs
    (wl1, bl1), (wl2, bl2), (wl3, bl3) = linears
    N, Cin, L0 = x_ncl.shape
    C1 = w1.shape[1]
    C2 = w2.shape[1]
    L1, L2 = L0 // 2, L0 // 4
    num_classes = wl3.shape[1]

    return pl.pallas_call(
        vgg_kernel,
        out_shape=jax.ShapeDtypeStruct((N, num_classes), jnp.float32),
        scratch_shapes=[
            pltpu.VMEM((Cin, L0 + 2), jnp.float32),   # padded conv1 input
            pltpu.VMEM((C1, L1 + 2), jnp.float32),    # padded conv2 input
            pltpu.VMEM((N, C2 * L2), jnp.float32),    # flattened features
        ],
    )(x_ncl, w1, b1, w2, b2, wl1, bl1, wl2, bl2, wl3, bl3)


# ---------------------------- parameter init --------------------------------- #

def make_params(num_classes=10):
    key = jax.random.PRNGKey(42)
    keys = jax.random.split(key, 8)
    K = 3
    conv_defs = [(3, 8), (8, 16)]                 # (Cin, Cout), VGG-style cfg [8,'M',16,'M']
    convs = []
    for i, (cin, cout) in enumerate(conv_defs):
        # PyTorch init: normal(0, sqrt(2 / (kernel_size * out_channels))), bias zero.
        std = math.sqrt(2.0 / (K * cout))
        w_oik = std * jax.random.normal(keys[i], (cout, cin, K), jnp.float32)
        w_koi = jnp.transpose(w_oik, (2, 0, 1))   # kernel layout (K, Cout, Cin)
        convs.append((w_koi, jnp.zeros((cout, 1), jnp.float32)))

    seq_len = 16 * 8                              # cfg_seq: channels * length after features
    lin_defs = [(seq_len, 512), (512, 512), (512, num_classes)]
    linears = []
    for i, (din, dout) in enumerate(lin_defs):
        # PyTorch init: normal(0, 0.01), bias zero.
        w_oi = 0.01 * jax.random.normal(keys[3 + i], (dout, din), jnp.float32)
        linears.append((jnp.transpose(w_oi), jnp.zeros((1, dout), jnp.float32)))
    return convs, linears


# ---------------------------- pure-JAX reference ------------------------------ #

def reference_forward(x_ncl, convs, linears):
    h = x_ncl
    for (w_koi, b) in convs:
        w_oik = jnp.transpose(w_koi, (1, 2, 0))   # (Cout, Cin, K)
        h = lax.conv_general_dilated(
            h, w_oik, window_strides=(1,), padding=[(1, 1)],
            dimension_numbers=("NCH", "OIH", "NCH"))
        h = jnp.maximum(h + b[None, :, :], 0.0)
        N, C, L = h.shape
        h = jnp.max(h.reshape(N, C, L // 2, 2), axis=-1)
    flat = h.reshape(h.shape[0], -1)
    (w1, b1), (w2, b2), (w3, b3) = linears
    h = jnp.maximum(flat @ w1 + b1, 0.0)
    h = jnp.maximum(h @ w2 + b2, 0.0)
    return h @ w3 + b3


if __name__ == "__main__":
    x = jax.random.normal(jax.random.PRNGKey(0), (2, 3, 32), jnp.float32)  # NCL
    convs, linears = make_params(num_classes=10)

    out = jax.block_until_ready(vgg_forward(x, convs, linears))
    ref = reference_forward(x, convs, linears)

    assert out.shape == (2, 10), out.shape
    assert jnp.allclose(out, ref, rtol=1e-4, atol=1e-4), float(
        jnp.max(jnp.abs(out - ref)))
    print("KERNEL_OK")
</pallas_src>

<mosaic_0001>
module attributes {stable_mosaic.version = 11 : i64} {
  func.func @vgg_kernel(%arg0: memref<2x3x32xf32, #tpu.memory_space<vmem>>, %arg1: memref<3x8x3xf32, #tpu.memory_space<vmem>>, %arg2: memref<8x1xf32, #tpu.memory_space<vmem>>, %arg3: memref<3x16x8xf32, #tpu.memory_space<vmem>>, %arg4: memref<16x1xf32, #tpu.memory_space<vmem>>, %arg5: memref<128x512xf32, #tpu.memory_space<vmem>>, %arg6: memref<1x512xf32, #tpu.memory_space<vmem>>, %arg7: memref<512x512xf32, #tpu.memory_space<vmem>>, %arg8: memref<1x512xf32, #tpu.memory_space<vmem>>, %arg9: memref<512x10xf32, #tpu.memory_space<vmem>>, %arg10: memref<1x10xf32, #tpu.memory_space<vmem>>, %arg11: memref<2x10xf32, #tpu.memory_space<vmem>>, %arg12: memref<3x34xf32, #tpu.memory_space<vmem>>, %arg13: memref<8x18xf32, #tpu.memory_space<vmem>>, %arg14: memref<2x128xf32, #tpu.memory_space<vmem>>) attributes {dimension_semantics = [], scalar_prefetch = 0 : i64, scratch_operands = 3 : i64, tpu.core_type = #tpu.core_type<tc>} {
    %cst = arith.constant 0.000000e+00 : f32
    %0 = vector.broadcast %cst : f32 to vector<3x34xf32>
    %c0 = arith.constant 0 : index
    %c0_0 = arith.constant 0 : index
    %1 = vector.load %arg12[%c0, %c0_0] : memref<3x34xf32, #tpu.memory_space<vmem>>, vector<3x34xf32>
    tpu.vector_store %arg12[%c0, %c0_0], %0 {strides = array<i32>} : memref<3x34xf32, #tpu.memory_space<vmem>>, vector<3x34xf32>,
    %cst_1 = arith.constant 0.000000e+00 : f32
    %2 = vector.broadcast %cst_1 : f32 to vector<8x18xf32>
    %c0_2 = arith.constant 0 : index
    %c0_3 = arith.constant 0 : index
    %3 = vector.load %arg13[%c0_2, %c0_3] : memref<8x18xf32, #tpu.memory_space<vmem>>, vector<8x18xf32>
    tpu.vector_store %arg13[%c0_2, %c0_3], %2 {strides = array<i32>} : memref<8x18xf32, #tpu.memory_space<vmem>>, vector<8x18xf32>,
    %c0_4 = arith.constant 0 : index
    %c0_5 = arith.constant 0 : index
    %c0_6 = arith.constant 0 : index
    %4 = vector.load %arg0[%c0_4, %c0_5, %c0_6] : memref<2x3x32xf32, #tpu.memory_space<vmem>>, vector<1x3x32xf32>
    %5 = vector.shape_cast %4 : vector<1x3x32xf32> to vector<3x32xf32>
    %c0_7 = arith.constant 0 : index
    %c1 = arith.constant 1 : index
    %6 = vector.load %arg12[%c0_7, %c1] : memref<3x34xf32, #tpu.memory_space<vmem>>, vector<3x32xf32>
    tpu.vector_store %arg12[%c0_7, %c1], %5 {strides = array<i32>} : memref<3x34xf32, #tpu.memory_space<vmem>>, vector<3x32xf32>,
    %cst_8 = arith.constant 0.000000e+00 : f32
    %7 = vector.broadcast %cst_8 : f32 to vector<8x32xf32>
    %c0_9 = arith.constant 0 : index
    %c0_10 = arith.constant 0 : index
    %c0_11 = arith.constant 0 : index
    %8 = vector.load %arg1[%c0_9, %c0_10, %c0_11] : memref<3x8x3xf32, #tpu.memory_space<vmem>>, vector<1x8x3xf32>
    %9 = vector.shape_cast %8 : vector<1x8x3xf32> to vector<8x3xf32>
    %c0_12 = arith.constant 0 : index
    %c0_13 = arith.constant 0 : index
    %10 = vector.load %arg12[%c0_12, %c0_13] : memref<3x34xf32, #tpu.memory_space<vmem>>, vector<3x32xf32>
    %cst_14 = arith.constant dense<0.000000e+00> : vector<8x32xf32>
    %11 = tpu.matmul %9, %10, %cst_14 {dimension_numbers = #tpu.dot_dimension_numbers<[1], [0], [0], [1], [0, 0, 1, 1], [], []>} : vector<8x3xf32>, vector<3x32xf32>, vector<8x32xf32> -> vector<8x32xf32>
    %12 = arith.addf %7, %11 : vector<8x32xf32>
    %c1_15 = arith.constant 1 : index
    %c0_16 = arith.constant 0 : index
    %c0_17 = arith.constant 0 : index
    %13 = vector.load %arg1[%c1_15, %c0_16, %c0_17] : memref<3x8x3xf32, #tpu.memory_space<vmem>>, vector<1x8x3xf32>
    %14 = vector.shape_cast %13 : vector<1x8x3xf32> to vector<8x3xf32>
    %c0_18 = arith.constant 0 : index
    %c1_19 = arith.constant 1 : index
    %15 = vector.load %arg12[%c0_18, %c1_19] : memref<3x34xf32, #tpu.memory_space<vmem>>, vector<3x32xf32>
    %cst_20 = arith.constant dense<0.000000e+00> : vector<8x32xf32>
    %16 = tpu.matmul %14, %15, %cst_20 {dimension_numbers = #tpu.dot_dimension_numbers<[1], [0], [0], [1], [0, 0, 1, 1], [], []>} : vector<8x3xf32>, vector<3x32xf32>, vector<8x32xf32> -> vector<8x32xf32>
    %17 = arith.addf %12, %16 : vector<8x32xf32>
    %c2 = arith.constant 2 : index
    %c0_21 = arith.constant 0 : index
    %c0_22 = arith.constant 0 : index
    %18 = vector.load %arg1[%c2, %c0_21, %c0_22] : memref<3x8x3xf32, #tpu.memory_space<vmem>>, vector<1x8x3xf32>
    %19 = vector.shape_cast %18 : vector<1x8x3xf32> to vector<8x3xf32>
    %c0_23 = arith.constant 0 : index
    %c2_24 = arith.constant 2 : index
    %20 = vector.load %arg12[%c0_23, %c2_24] : memref<3x34xf32, #tpu.memory_space<vmem>>, vector<3x32xf32>
    %cst_25 = arith.constant dense<0.000000e+00> : vector<8x32xf32>
    %21 = tpu.matmul %19, %20, %cst_25 {dimension_numbers = #tpu.dot_dimension_numbers<[1], [0], [0], [1], [0, 0, 1, 1], [], []>} : vector<8x3xf32>, vector<3x32xf32>, vector<8x32xf32> -> vector<8x32xf32>
    %22 = arith.addf %17, %21 : vector<8x32xf32>
    %c0_26 = arith.constant 0 : index
    %c0_27 = arith.constant 0 : index
    %23 = vector.load %arg2[%c0_26, %c0_27] : memref<8x1xf32, #tpu.memory_space<vmem>>, vector<8x1xf32>
    %24 = vector.broadcast %23 : vector<8x1xf32> to vector<8x32xf32>
    %25 = arith.addf %22, %24 : vector<8x32xf32>
    %cst_28 = arith.constant 0.000000e+00 : f32
    %26 = vector.broadcast %cst_28 : f32 to vector<8x32xf32>
    %27 = arith.maximumf %25, %26 : vector<8x32xf32>
    %28 = vector.shape_cast %27 : vector<8x32xf32> to vector<8x16x2xf32>
    %cst_29 = arith.constant dense<0xFF800000> : vector<8x16xf32>
    %29 = vector.multi_reduction <maximumf>, %28, %cst_29 [2] : vector<8x16x2xf32> to vector<8x16xf32>
    %c0_30 = arith.constant 0 : index
    %c1_31 = arith.constant 1 : index
    %30 = vector.load %arg13[%c0_30, %c1_31] : memref<8x18xf32, #tpu.memory_space<vmem>>, vector<8x16xf32>
    tpu.vector_store %arg13[%c0_30, %c1_31], %29 {strides = array<i32>} : memref<8x18xf32, #tpu.memory_space<vmem>>, vector<8x16xf32>,
    %cst_32 = arith.constant 0.000000e+00 : f32
    %31 = vector.broadcast %cst_32 : f32 to vector<16x16xf32>
    %c0_33 = arith.constant 0 : index
    %c0_34 = arith.constant 0 : index
    %c0_35 = arith.constant 0 : index
    %32 = vector.load %arg3[%c0_33, %c0_34, %c0_35] : memref<3x16x8xf32, #tpu.memory_space<vmem>>, vector<1x16x8xf32>
    %33 = vector.shape_cast %32 : vector<1x16x8xf32> to vector<16x8xf32>
    %c0_36 = arith.constant 0 : index
    %c0_37 = arith.constant 0 : index
    %34 = vector.load %arg13[%c0_36, %c0_37] : memref<8x18xf32, #tpu.memory_space<vmem>>, vector<8x16xf32>
    %cst_38 = arith.constant dense<0.000000e+00> : vector<16x16xf32>
    %35 = tpu.matmul %33, %34, %cst_38 {dimension_numbers = #tpu.dot_dimension_numbers<[1], [0], [0], [1], [0, 0, 1, 1], [], []>} : vector<16x8xf32>, vector<8x16xf32>, vector<16x16xf32> -> vector<16x16xf32>
    %36 = arith.addf %31, %35 : vector<16x16xf32>
    %c1_39 = arith.constant 1 : index
    %c0_40 = arith.constant 0 : index
    %c0_41 = arith.constant 0 : index
    %37 = vector.load %arg3[%c1_39, %c0_40, %c0_41] : memref<3x16x8xf32, #tpu.memory_space<vmem>>, vector<1x16x8xf32>
    %38 = vector.shape_cast %37 : vector<1x16x8xf32> to vector<16x8xf32>
    %c0_42 = arith.constant 0 : index
    %c1_43 = arith.constant 1 : index
    %39 = vector.load %arg13[%c0_42, %c1_43] : memref<8x18xf32, #tpu.memory_space<vmem>>, vector<8x16xf32>
    %cst_44 = arith.constant dense<0.000000e+00> : vector<16x16xf32>
    %40 = tpu.matmul %38, %39, %cst_44 {dimension_numbers = #tpu.dot_dimension_numbers<[1], [0], [0], [1], [0, 0, 1, 1], [], []>} : vector<16x8xf32>, vector<8x16xf32>, vector<16x16xf32> -> vector<16x16xf32>
    %41 = arith.addf %36, %40 : vector<16x16xf32>
    %c2_45 = arith.constant 2 : index
    %c0_46 = arith.constant 0 : index
    %c0_47 = arith.constant 0 : index
    %42 = vector.load %arg3[%c2_45, %c0_46, %c0_47] : memref<3x16x8xf32, #tpu.memory_space<vmem>>, vector<1x16x8xf32>
    %43 = vector.shape_cast %42 : vector<1x16x8xf32> to vector<16x8xf32>
    %c0_48 = arith.constant 0 : index
    %c2_49 = arith.constant 2 : index
    %44 = vector.load %arg13[%c0_48, %c2_49] : memref<8x18xf32, #tpu.memory_space<vmem>>, vector<8x16xf32>
    %cst_50 = arith.constant dense<0.000000e+00> : vector<16x16xf32>
    %45 = tpu.matmul %43, %44, %cst_50 {dimension_numbers = #tpu.dot_dimension_numbers<[1], [0], [0], [1], [0, 0, 1, 1], [], []>} : vector<16x8xf32>, vector<8x16xf32>, vector<16x16xf32> -> vector<16x16xf32>
    %46 = arith.addf %41, %45 : vector<16x16xf32>
    %c0_51 = arith.constant 0 : index
    %c0_52 = arith.constant 0 : index
    %47 = vector.load %arg4[%c0_51, %c0_52] : memref<16x1xf32, #tpu.memory_space<vmem>>, vector<16x1xf32>
    %48 = vector.broadcast %47 : vector<16x1xf32> to vector<16x16xf32>
    %49 = arith.addf %46, %48 : vector<16x16xf32>
    %cst_53 = arith.constant 0.000000e+00 : f32
    %50 = vector.broadcast %cst_53 : f32 to vector<16x16xf32>
    %51 = arith.maximumf %49, %50 : vector<16x16xf32>
    %52 = vector.shape_cast %51 : vector<16x16xf32> to vector<16x8x2xf32>
    %cst_54 = arith.constant dense<0xFF800000> : vector<16x8xf32>
    %53 = vector.multi_reduction <maximumf>, %52, %cst_54 [2] : vector<16x8x2xf32> to vector<16x8xf32>
    %54 = vector.shape_cast %53 : vector<16x8xf32> to vector<1x128xf32>
    %c0_55 = arith.constant 0 : index
    %c0_56 = arith.constant 0 : index
    %55 = vector.load %arg14[%c0_55, %c0_56] : memref<2x128xf32, #tpu.memory_space<vmem>>, vector<1x128xf32>
    tpu.vector_store %arg14[%c0_55, %c0_56], %54 {strides = array<i32>} : memref<2x128xf32, #tpu.memory_space<vmem>>, vector<1x128xf32>,
    %c1_57 = arith.constant 1 : index
    %c0_58 = arith.constant 0 : index
    %c0_59 = arith.constant 0 : index
    %56 = vector.load %arg0[%c1_57, %c0_58, %c0_59] : memref<2x3x32xf32, #tpu.memory_space<vmem>>, vector<1x3x32xf32>
    %57 = vector.shape_cast %56 : vector<1x3x32xf32> to vector<3x32xf32>
    %c0_60 = arith.constant 0 : index
    %c1_61 = arith.constant 1 : index
    %58 = vector.load %arg12[%c0_60, %c1_61] : memref<3x34xf32, #tpu.memory_space<vmem>>, vector<3x32xf32>
    tpu.vector_store %arg12[%c0_60, %c1_61], %57 {strides = array<i32>} : memref<3x34xf32, #tpu.memory_space<vmem>>, vector<3x32xf32>,
    %cst_62 = arith.constant 0.000000e+00 : f32
    %59 = vector.broadcast %cst_62 : f32 to vector<8x32xf32>
    %c0_63 = arith.constant 0 : index
    %c0_64 = arith.constant 0 : index
    %c0_65 = arith.constant 0 : index
    %60 = vector.load %arg1[%c0_63, %c0_64, %c0_65] : memref<3x8x3xf32, #tpu.memory_space<vmem>>, vector<1x8x3xf32>
    %61 = vector.shape_cast %60 : vector<1x8x3xf32> to vector<8x3xf32>
    %c0_66 = arith.constant 0 : index
    %c0_67 = arith.constant 0 : index
    %62 = vector.load %arg12[%c0_66, %c0_67] : memref<3x34xf32, #tpu.memory_space<vmem>>, vector<3x32xf32>
    %cst_68 = arith.constant dense<0.000000e+00> : vector<8x32xf32>
    %63 = tpu.matmul %61, %62, %cst_68 {dimension_numbers = #tpu.dot_dimension_numbers<[1], [0], [0], [1], [0, 0, 1, 1], [], []>} : vector<8x3xf32>, vector<3x32xf32>, vector<8x32xf32> -> vector<8x32xf32>
    %64 = arith.addf %59, %63 : vector<8x32xf32>
    %c1_69 = arith.constant 1 : index
    %c0_70 = arith.constant 0 : index
    %c0_71 = arith.constant 0 : index
    %65 = vector.load %arg1[%c1_69, %c0_70, %c0_71] : memref<3x8x3xf32, #tpu.memory_space<vmem>>, vector<1x8x3xf32>
    %66 = vector.shape_cast %65 : vector<1x8x3xf32> to vector<8x3xf32>
    %c0_72 = arith.constant 0 : index
    %c1_73 = arith.constant 1 : index
    %67 = vector.load %arg12[%c0_72, %c1_73] : memref<3x34xf32, #tpu.memory_space<vmem>>, vector<3x32xf32>
    %cst_74 = arith.constant dense<0.000000e+00> : vector<8x32xf32>
    %68 = tpu.matmul %66, %67, %cst_74 {dimension_numbers = #tpu.dot_dimension_numbers<[1], [0], [0], [1], [0, 0, 1, 1], [], []>} : vector<8x3xf32>, vector<3x32xf32>, vector<8x32xf32> -> vector<8x32xf32>
    %69 = arith.addf %64, %68 : vector<8x32xf32>
    %c2_75 = arith.constant 2 : index
    %c0_76 = arith.constant 0 : index
    %c0_77 = arith.constant 0 : index
    %70 = vector.load %arg1[%c2_75, %c0_76, %c0_77] : memref<3x8x3xf32, #tpu.memory_space<vmem>>, vector<1x8x3xf32>
    %71 = vector.shape_cast %70 : vector<1x8x3xf32> to vector<8x3xf32>
    %c0_78 = arith.constant 0 : index
    %c2_79 = arith.constant 2 : index
    %72 = vector.load %arg12[%c0_78, %c2_79] : memref<3x34xf32, #tpu.memory_space<vmem>>, vector<3x32xf32>
    %cst_80 = arith.constant dense<0.000000e+00> : vector<8x32xf32>
    %73 = tpu.matmul %71, %72, %cst_80 {dimension_numbers = #tpu.dot_dimension_numbers<[1], [0], [0], [1], [0, 0, 1, 1], [], []>} : vector<8x3xf32>, vector<3x32xf32>, vector<8x32xf32> -> vector<8x32xf32>
    %74 = arith.addf %69, %73 : vector<8x32xf32>
    %c0_81 = arith.constant 0 : index
    %c0_82 = arith.constant 0 : index
    %75 = vector.load %arg2[%c0_81, %c0_82] : memref<8x1xf32, #tpu.memory_space<vmem>>, vector<8x1xf32>
    %76 = vector.broadcast %75 : vector<8x1xf32> to vector<8x32xf32>
    %77 = arith.addf %74, %76 : vector<8x32xf32>
    %cst_83 = arith.constant 0.000000e+00 : f32
    %78 = vector.broadcast %cst_83 : f32 to vector<8x32xf32>
    %79 = arith.maximumf %77, %78 : vector<8x32xf32>
    %80 = vector.shape_cast %79 : vector<8x32xf32> to vector<8x16x2xf32>
    %cst_84 = arith.constant dense<0xFF800000> : vector<8x16xf32>
    %81 = vector.multi_reduction <maximumf>, %80, %cst_84 [2] : vector<8x16x2xf32> to vector<8x16xf32>
    %c0_85 = arith.constant 0 : index
    %c1_86 = arith.constant 1 : index
    %82 = vector.load %arg13[%c0_85, %c1_86] : memref<8x18xf32, #tpu.memory_space<vmem>>, vector<8x16xf32>
    tpu.vector_store %arg13[%c0_85, %c1_86], %81 {strides = array<i32>} : memref<8x18xf32, #tpu.memory_space<vmem>>, vector<8x16xf32>,
    %cst_87 = arith.constant 0.000000e+00 : f32
    %83 = vector.broadcast %cst_87 : f32 to vector<16x16xf32>
    %c0_88 = arith.constant 0 : index
    %c0_89 = arith.constant 0 : index
    %c0_90 = arith.constant 0 : index
    %84 = vector.load %arg3[%c0_88, %c0_89, %c0_90] : memref<3x16x8xf32, #tpu.memory_space<vmem>>, vector<1x16x8xf32>
    %85 = vector.shape_cast %84 : vector<1x16x8xf32> to vector<16x8xf32>
    %c0_91 = arith.constant 0 : index
    %c0_92 = arith.constant 0 : index
    %86 = vector.load %arg13[%c0_91, %c0_92] : memref<8x18xf32, #tpu.memory_space<vmem>>, vector<8x16xf32>
    %cst_93 = arith.constant dense<0.000000e+00> : vector<16x16xf32>
    %87 = tpu.matmul %85, %86, %cst_93 {dimension_numbers = #tpu.dot_dimension_numbers<[1], [0], [0], [1], [0, 0, 1, 1], [], []>} : vector<16x8xf32>, vector<8x16xf32>, vector<16x16xf32> -> vector<16x16xf32>
    %88 = arith.addf %83, %87 : vector<16x16xf32>
    %c1_94 = arith.constant 1 : index
    %c0_95 = arith.constant 0 : index
    %c0_96 = arith.constant 0 : index
    %89 = vector.load %arg3[%c1_94, %c0_95, %c0_96] : memref<3x16x8xf32, #tpu.memory_space<vmem>>, vector<1x16x8xf32>
    %90 = vector.shape_cast %89 : vector<1x16x8xf32> to vector<16x8xf32>
    %c0_97 = arith.constant 0 : index
    %c1_98 = arith.constant 1 : index
    %91 = vector.load %arg13[%c0_97, %c1_98] : memref<8x18xf32, #tpu.memory_space<vmem>>, vector<8x16xf32>
    %cst_99 = arith.constant dense<0.000000e+00> : vector<16x16xf32>
    %92 = tpu.matmul %90, %91, %cst_99 {dimension_numbers = #tpu.dot_dimension_numbers<[1], [0], [0], [1], [0, 0, 1, 1], [], []>} : vector<16x8xf32>, vector<8x16xf32>, vector<16x16xf32> -> vector<16x16xf32>
    %93 = arith.addf %88, %92 : vector<16x16xf32>
    %c2_100 = arith.constant 2 : index
    %c0_101 = arith.constant 0 : index
    %c0_102 = arith.constant 0 : index
    %94 = vector.load %arg3[%c2_100, %c0_101, %c0_102] : memref<3x16x8xf32, #tpu.memory_space<vmem>>, vector<1x16x8xf32>
    %95 = vector.shape_cast %94 : vector<1x16x8xf32> to vector<16x8xf32>
    %c0_103 = arith.constant 0 : index
    %c2_104 = arith.constant 2 : index
    %96 = vector.load %arg13[%c0_103, %c2_104] : memref<8x18xf32, #tpu.memory_space<vmem>>, vector<8x16xf32>
    %cst_105 = arith.constant dense<0.000000e+00> : vector<16x16xf32>
    %97 = tpu.matmul %95, %96, %cst_105 {dimension_numbers = #tpu.dot_dimension_numbers<[1], [0], [0], [1], [0, 0, 1, 1], [], []>} : vector<16x8xf32>, vector<8x16xf32>, vector<16x16xf32> -> vector<16x16xf32>
    %98 = arith.addf %93, %97 : vector<16x16xf32>
    %c0_106 = arith.constant 0 : index
    %c0_107 = arith.constant 0 : index
    %99 = vector.load %arg4[%c0_106, %c0_107] : memref<16x1xf32, #tpu.memory_space<vmem>>, vector<16x1xf32>
    %100 = vector.broadcast %99 : vector<16x1xf32> to vector<16x16xf32>
    %101 = arith.addf %98, %100 : vector<16x16xf32>
    %cst_108 = arith.constant 0.000000e+00 : f32
    %102 = vector.broadcast %cst_108 : f32 to vector<16x16xf32>
    %103 = arith.maximumf %101, %102 : vector<16x16xf32>
    %104 = vector.shape_cast %103 : vector<16x16xf32> to vector<16x8x2xf32>
    %cst_109 = arith.constant dense<0xFF800000> : vector<16x8xf32>
    %105 = vector.multi_reduction <maximumf>, %104, %cst_109 [2] : vector<16x8x2xf32> to vector<16x8xf32>
    %106 = vector.shape_cast %105 : vector<16x8xf32> to vector<1x128xf32>
    %c1_110 = arith.constant 1 : index
    %c0_111 = arith.constant 0 : index
    %107 = vector.load %arg14[%c1_110, %c0_111] : memref<2x128xf32, #tpu.memory_space<vmem>>, vector<1x128xf32>
    tpu.vector_store %arg14[%c1_110, %c0_111], %106 {strides = array<i32>} : memref<2x128xf32, #tpu.memory_space<vmem>>, vector<1x128xf32>,
    %c0_112 = arith.constant 0 : index
    %c0_113 = arith.constant 0 : index
    %108 = vector.load %arg14[%c0_112, %c0_113] : memref<2x128xf32, #tpu.memory_space<vmem>>, vector<2x128xf32>
    %c0_114 = arith.constant 0 : index
    %c0_115 = arith.constant 0 : index
    %109 = vector.load %arg5[%c0_114, %c0_115] : memref<128x512xf32, #tpu.memory_space<vmem>>, vector<128x512xf32>
    %cst_116 = arith.constant dense<0.000000e+00> : vector<2x512xf32>
    %110 = tpu.matmul %108, %109, %cst_116 {dimension_numbers = #tpu.dot_dimension_numbers<[1], [0], [0], [1], [0, 0, 1, 1], [], []>} : vector<2x128xf32>, vector<128x512xf32>, vector<2x512xf32> -> vector<2x512xf32>
    %c0_117 = arith.constant 0 : index
    %c0_118 = arith.constant 0 : index
    %111 = vector.load %arg6[%c0_117, %c0_118] : memref<1x512xf32, #tpu.memory_space<vmem>>, vector<1x512xf32>
    %112 = vector.broadcast %111 : vector<1x512xf32> to vector<2x512xf32>
    %113 = arith.addf %110, %112 : vector<2x512xf32>
    %cst_119 = arith.constant 0.000000e+00 : f32
    %114 = vector.broadcast %cst_119 : f32 to vector<2x512xf32>
    %115 = arith.maximumf %113, %114 : vector<2x512xf32>
    %c0_120 = arith.constant 0 : index
    %c0_121 = arith.constant 0 : index
    %116 = vector.load %arg7[%c0_120, %c0_121] : memref<512x512xf32, #tpu.memory_space<vmem>>, vector<512x512xf32>
    %cst_122 = arith.constant dense<0.000000e+00> : vector<2x512xf32>
    %117 = tpu.matmul %115, %116, %cst_122 {dimension_numbers = #tpu.dot_dimension_numbers<[1], [0], [0], [1], [0, 0, 1, 1], [], []>} : vector<2x512xf32>, vector<512x512xf32>, vector<2x512xf32> -> vector<2x512xf32>
    %c0_123 = arith.constant 0 : index
    %c0_124 = arith.constant 0 : index
    %118 = vector.load %arg8[%c0_123, %c0_124] : memref<1x512xf32, #tpu.memory_space<vmem>>, vector<1x512xf32>
    %119 = vector.broadcast %118 : vector<1x512xf32> to vector<2x512xf32>
    %120 = arith.addf %117, %119 : vector<2x512xf32>
    %cst_125 = arith.constant 0.000000e+00 : f32
    %121 = vector.broadcast %cst_125 : f32 to vector<2x512xf32>
    %122 = arith.maximumf %120, %121 : vector<2x512xf32>
    %c0_126 = arith.constant 0 : index
    %c0_127 = arith.constant 0 : index
    %123 = vector.load %arg9[%c0_126, %c0_127] : memref<512x10xf32, #tpu.memory_space<vmem>>, vector<512x10xf32>
    %cst_128 = arith.constant dense<0.000000e+00> : vector<2x10xf32>
    %124 = tpu.matmul %122, %123, %cst_128 {dimension_numbers = #tpu.dot_dimension_numbers<[1], [0], [0], [1], [0, 0, 1, 1], [], []>} : vector<2x512xf32>, vector<512x10xf32>, vector<2x10xf32> -> vector<2x10xf32>
    %c0_129 = arith.constant 0 : index
    %c0_130 = arith.constant 0 : index
    %125 = vector.load %arg10[%c0_129, %c0_130] : memref<1x10xf32, #tpu.memory_space<vmem>>, vector<1x10xf32>
    %126 = vector.broadcast %125 : vector<1x10xf32> to vector<2x10xf32>
    %127 = arith.addf %124, %126 : vector<2x10xf32>
    %c0_131 = arith.constant 0 : index
    %c0_132 = arith.constant 0 : index
    %128 = vector.load %arg11[%c0_131, %c0_132] : memref<2x10xf32, #tpu.memory_space<vmem>>, vector<2x10xf32>
    tpu.vector_store %arg11[%c0_131, %c0_132], %127 {strides = array<i32>} : memref<2x10xf32, #tpu.memory_space<vmem>>, vector<2x10xf32>,
    return
  }
}

</mosaic_0001>

<bundles_post_ra>
// kernel: tpu_custom_call.1
= control target key start
LH: loop header
LB: loop body
LE: loop exit
PB: predicated region body
PF: predicated region fallthrough
CT: control target
= control target key end

     0   :  { %16 = vsyncpa [#allocation6], 0  ;;  %s5735_s0 = inlined_call_operand.vmem [shape: f32[2,3,32], index: 0, kind: input, shape index: {}]   ;;  %s5736_s1 = inlined_call_operand.vmem [shape: f32[3,8,3], index: 1, kind: input, shape index: {}]   ;;  %s5737_s2 = inlined_call_operand.vmem [shape: f32[8,1], index: 2, kind: input, shape index: {}]   ;;  %s5738_s3 = inlined_call_operand.vmem [shape: f32[3,16,8], index: 3, kind: input, shape index: {}]   ;;  %s5739_s4 = inlined_call_operand.vmem [shape: f32[16,1], index: 4, kind: input, shape index: {}]   ;;  %s5740_s5 = inlined_call_operand.vmem [shape: f32[128,512], index: 5, kind: input, shape index: {}]   ;;  %s5741_s6 = inlined_call_operand.vmem [shape: f32[1,512], index: 6, kind: input, shape index: {}]   ;;  %s5742_s7 = inlined_call_operand.hbm [shape: f32[512,512], index: 7, kind: input, shape index: {}]   ;;  %s5743_s8 = inlined_call_operand.vmem [shape: f32[1,512], index: 8, kind: input, shape index: {}]   ;;  %s5744_s9 = inlined_call_operand.vmem [shape: f32[512,10], index: 9, kind: input, shape index: {}]   ;;  %s5745_s10 = inlined_call_operand.vmem [shape: f32[1,10], index: 10, kind: input, shape index: {}]   ;;  %s5746_s11 = inlined_call_operand.hbm [shape: f32[2,10], index: 11, kind: output, shape index: {}]  }
   0x1   :  { %17 = vsyncpa [#allocation7], 0  ;;  %s4303_s17 = smov [#allocation5]  }
   0x2   :  { %s37_s18 = sshll.u32 %s4303_s17, 4  ;;  %s38_s18 = int_to_ptr.vmem [resolvable:$true] %s37_s18 }
   0x3   :  { %s4267_s19 = scalar_lea.vmem %s38_s18, 32768  ;;  %p4272_p1 = scmp.lt.s32.totalorder %s38_s18, %s38_s18 }
   0x4   :  { %p4268_p0 = scmp.ne.s32.totalorder %s38_s18, %s4267_s19  ;;  %p4273_p2 = scmp.lt.s32.totalorder %s4267_s19, %s4267_s19 }
   0x6   :  { %p4274_p3 = por %p4273_p2, %p4272_p1 }
   0x8   :  { %p4275_p4 = pnand %p4274_p3, %p4268_p0 }
   0xa   :  { %4278 = shalt.err (!%p4275_p4)
}
   0xb   :  { %s4304_s20 = smov 512   ;;  %s4305_s21 = smov 32  }
   0xc   :  { %43 = dma.hbm_to_vmem [thread:$0]  %s5742_s7, 32768, %s38_s18, [#allocation6], %s4304_s20, %s4304_s20, %s4305_s21  }
   0xd   :  { %4299 = dma.done.wait [#allocation6], 32768  }
   0xe   :  { %4300 = vsyncadd [#allocation6], 4294934528  ;;  %vm53_vm0 = vcmask 272384   ;;  %v4306_v0 = vmov 0.0   ;;  %v57_v1 = vld [vmem:[%s5735_s0] sm:$0x7]  ;;  %v362_v26 = vlaneseq }
   0xf   :  { %54 = vst.msk [vmem:[#allocation2] sm:$0x7] %vm53_vm0, %v4306_v0  ;;  %4176 = vmatprep.subr.mxu1 %v4306_v0  ;;  %4171 = vmatprep.subr.mxu0 %v4306_v0  ;;  %s4307_s26 = smov 1   ;;  %vm4308_vm1 = vmmov 0   ;;  %vm62_vm2 = vcmask 264200   ;;  %v4309_v3 = vmov 0  }
  0x10   :  { %59 = vrot.lane.b32.xlu0 %v57_v1, %s4307_s26  ;;  %4173 = vmatprep.mubr.msk.f32.mxu0 %vm4308_vm1, %v4306_v0  ;;  %vm75_vm3 = vcmask 1042432   ;;  %vm71_vm4 = vcmask 23552   ;;  %v4407_v5 = vld [vmem:[%s5736_s1] sm:$0xff]  ;;  %s4310_s28 = smov 126   ;;  %s4311_s29 = smov 127   ;;  %v4423_v7 = vld [vmem:[%s5736_s1 + $0x8] sm:$0xff] }
  0x11   :  { %4178 = vmatprep.mubr.msk.f32.mxu1 %vm4308_vm1, %v4306_v0  ;;  %4257 = vset.pattern.permute.xlu1 %v4309_v3  ;;  %v4415_v6 = vld [vmem:[%s5737_s2] sm:$0xff]  ;;  %v4435_v10 = vld [vmem:[%s5736_s1 + $0x10] sm:$0xff]  ;;  %s4312_s16 = smov 124   ;;  %s4313_s1 = smov 120   ;;  %v4326_v24 = vmov 1983009808  }
  0x12   :  { %4258 = vset.pattern.permute.xlu0 %v4309_v3  ;;  %s4314_s17 = smov 122   ;;  %s4315_s18 = smov 116   ;;  %v360_v25 = vunpack.c.l.s4 %v4326_v24  ;;  %v4480_v30 = vshrl.u32 %v362_v26, 7  ;;  %v4327_v32 = vmov 1934713408   ;;  %vm629_vm5 = vcmask 15360  }
  0x13   :  { %s4316_s19 = smov 118   ;;  %s4317_s20 = smov 112   ;;  %v424_v33 = vunpack.c.l.s4 %v4327_v32  ;;  %vm55_vm6 = vcmask 146432   ;;  %vm706_vm7 = vcmask 138312   ;;  %vm771_vm8 = vcmask 1041409  }
  0x14   :  { %s4318_s21 = smov 114   ;;  %s4319_s22 = smov 108   ;;  %v361_v29 = vunpack.c.0.s8 %v360_v25  ;;  %56 = vst.msk [vmem:[#allocation3] sm:$0xff] %vm55_vm6, %v4306_v0  ;;  %vm773_vm9 = vcmask 1042434   ;;  %vm775_vm10 = vcmask 1043459   ;;  %vm777_vm11 = vcmask 1044484  }
  0x15   :  { %s4320_s23 = smov 110   ;;  %s4321_s24 = smov 104   ;;  %v425_v40 = vunpack.c.0.s8 %v424_v33  ;;  %vm779_vm12 = vcmask 1045509   ;;  %vm781_vm13 = vcmask 1046534   ;;  %vm783_vm14 = vcmask 1047559  }
  0x16   :  { %s4322_s25 = smov 106   ;;  %s4323_s7 = smov 100   ;;  %v4487_v36 = vsub.s32 %v361_v29, %v4480_v30  ;;  %vm798_vm15 = vcmask 64512   ;;  %vm786_vm0 = vcmask 138248   ;;  %vm1490_vm6 = vcmask 458112  }
  0x17   :  { %s4324_s27 = smov 102   ;;  %s4325_s30 = smov 98   ;;  %v4504_v48 = vsub.s32 %v425_v40, %v4480_v30 }
  0x82   :  { %v60_v2 = vpop.permute.xlu0 %59 }
  0x83   :  { %63 = vst.msk [vmem:[#allocation2] sm:$0x7] %vm62_vm2, %v60_v2 }
  0x8a   :  { %v65_v4 = vld [vmem:[#allocation2] sm:$0x7] }
  0x8b   :  { %225 = vrot.lane.b32.xlu1 %v65_v4, %s4310_s28  ;;  %69 = vrot.lane.b32.xlu0 %v65_v4, %s4311_s29 }
  0x8c   :  { %4177 = vmatpush3.msk.msra.mxu1 %vm75_vm3, %v65_v4 }
  0x8d   :  { %4179 = vmatmul.mubr.msk.f32.vlgmr.msra.gmra.mxu1 %vm71_vm4, %v4407_v5 }
  0x8f   :  { %306 = vperm.xlu1 %4257, %v4415_v6  }
  0xfd   :  { %v70_v8 = vpop.permute.xlu0 %69  ;;  %v226_v9 = vpop.permute.xlu1 %225 }
  0xfe   :  { %4172 = vmatpush3.msk.msra.mxu0 %vm75_vm3, %v70_v8 }
  0xff   :  { %4174 = vmatmul.mubr.msk.f32.vlgmr.msra.gmra.mxu0 %vm71_vm4, %v4423_v7  ;;  %4181 = vmatprep.subr.mxu0 %v4306_v0 }
 0x100   :  { %4182 = vmatpush3.msk.msra.mxu0 %vm75_vm3, %v226_v9  ;;  %4183 = vmatprep.mubr.msk.f32.mxu0 %vm4308_vm1, %v4306_v0 }
 0x103   :  { %4184 = vmatmul.mubr.msk.f32.vlgmr.msra.gmra.mxu0 %vm71_vm4, %v4435_v10 }
 0x10a   :  { %v307_v17 = vpop.permute.xlu1 %306 }
 0x14d   :  { %v219_v11 = vpop.f32.mrf.mxu1 }
 0x14f   :  { %v4180_v12 = vpop.f32.mrf.mxu1 }
 0x1bf   :  { %v144_v13 = vpop.f32.mrf.mxu0 }
 0x1c0   :  { %v220_v15 = vadd.f32 %v219_v11, %v144_v13 }
 0x1c1   :  { %v4175_v14 = vpop.f32.mrf.mxu0 }
 0x1c3   :  { %v298_v16 = vpop.f32.mrf.mxu0 }
 0x1c4   :  { %v302_v18 = vadd.f32 %v298_v16, %v220_v15 }
 0x1c5   :  { %v4185_v19 = vpop.f32.mrf.mxu0 }
 0x1c6   :  { %v309_v20 = vadd.f32 %v307_v17, %v302_v18 }
 0x1c8   :  { %v4439_v21 = vmax.f32 %v309_v20, 0.0 }
 0x1ca   :  { %315 = vrot.lane.b32.xlu1 %v4439_v21, %s4312_s16  ;;  %312 = vrot.lane.b32.xlu0 %v4439_v21, %s4310_s28 }
 0x1ce   :  { %321 = vrot.lane.b32.xlu1 %v4439_v21, %s4313_s1  ;;  %318 = vrot.lane.b32.xlu0 %v4439_v21, %s4314_s17 }
 0x1d2   :  { %327 = vrot.lane.b32.xlu1 %v4439_v21, %s4315_s18  ;;  %324 = vrot.lane.b32.xlu0 %v4439_v21, %s4316_s19 }
 0x1d6   :  { %333 = vrot.lane.b32.xlu1 %v4439_v21, %s4317_s20  ;;  %330 = vrot.lane.b32.xlu0 %v4439_v21, %s4318_s21 }
 0x1da   :  { %339 = vrot.lane.b32.xlu1 %v4439_v21, %s4319_s22  ;;  %336 = vrot.lane.b32.xlu0 %v4439_v21, %s4320_s23 }
 0x1de   :  { %345 = vrot.lane.b32.xlu1 %v4439_v21, %s4321_s24  ;;  %342 = vrot.lane.b32.xlu0 %v4439_v21, %s4322_s25 }
 0x1e2   :  { %351 = vrot.lane.b32.xlu1 %v4439_v21, %s4323_s7  ;;  %348 = vrot.lane.b32.xlu0 %v4439_v21, %s4324_s27 }
 0x1e6   :  { %354 = vrot.lane.b32.xlu0 %v4439_v21, %s4325_s30 }
 0x23c   :  { %v4471_v22 = vpop.permute.xlu1 %315  ;;  %v4473_v23 = vpop.permute.xlu0 %312 }
 0x23d   :  { %v357_v37 = vcombine.low %v4439_v21, %v4471_v22  ;;  %v358_v17 = vcombine.high %v4439_v21, %v4471_v22 }
 0x23f   :  { %v4497_v43 = vrot.slane %v357_v37, %v4487_v36 }
 0x240   :  { %v4475_v27 = vpop.permute.xlu1 %321  ;;  %v4477_v28 = vpop.permute.xlu0 %318 }
 0x241   :  { %v373_v31 = vcombine.low %v4473_v23, %v4477_v28  ;;  %v374_v32 = vcombine.high %v4473_v23, %v4477_v28 }
 0x243   :  { %v4492_v38 = vrot.slane %v373_v31, %v4487_v36 }
 0x244   :  { %v4484_v34 = vpop.permute.xlu1 %327  ;;  %v325_v35 = vpop.permute.xlu0 %324 }
 0x245   :  { %v389_v39 = vcombine.low %v4475_v27, %v4484_v34  ;;  %v421_v47 = vcombine.low %v4497_v43, %v4492_v38  ;;  %v390_v33 = vcombine.high %v4475_v27, %v4484_v34  ;;  %v422_v21 = vcombine.high %v4497_v43, %v4492_v38 }
 0x246   :  { %v388_v38 = vrot.slane %v374_v32, %v4487_v36 }
 0x247   :  { %v397_v45 = vrot.slane %v389_v39, %v4487_v36  ;;  %v429_v52 = vrot.slane %v421_v47, %v4504_v48  ;;  %v404_v43 = vrot.slane %v390_v33, %v4487_v36 }
 0x248   :  { %v334_v41 = vpop.permute.xlu1 %333  ;;  %v331_v42 = vpop.permute.xlu0 %330 }
 0x249   :  { %v405_v44 = vcombine.low %v325_v35, %v331_v42  ;;  %v406_v18 = vcombine.high %v325_v35, %v331_v42 }
 0x24b   :  { %v413_v46 = vrot.slane %v405_v44, %v4487_v36 }
 0x24c   :  { %v340_v49 = vpop.permute.xlu1 %339  ;;  %v337_v50 = vpop.permute.xlu0 %336 }
 0x24d   :  { %v453_v51 = vcombine.low %v397_v45, %v413_v46  ;;  %v493_v61 = vcombine.low %v334_v41, %v340_v49  ;;  %v494_v19 = vcombine.high %v334_v41, %v340_v49  ;;  %v454_v20 = vcombine.high %v397_v45, %v413_v46 }
 0x24e   :  { %v420_v41 = vrot.slane %v406_v18, %v4487_v36  ;;  %v436_v46 = vrot.slane %v422_v21, %v4504_v48  ;;  %v372_v49 = vrot.slane %v358_v17, %v4487_v36 }
 0x24f   :  { %v461_v53 = vrot.slane %v453_v51, %v4504_v48  ;;  %v501_v2 = vrot.slane %v493_v61, %v4487_v36  ;;  %v508_v42 = vrot.slane %v494_v19, %v4487_v36  ;;  %v468_v23 = vrot.slane %v454_v20, %v4504_v48 }
 0x250   :  { %v346_v54 = vpop.permute.xlu1 %345  ;;  %v343_v55 = vpop.permute.xlu0 %342  ;;  %v469_v51 = vcombine.low %v404_v43, %v420_v41 }
 0x251   :  { %v485_v56 = vcombine.low %v429_v52, %v461_v53  ;;  %v509_v57 = vcombine.low %v337_v50, %v343_v55  ;;  %v510_v12 = vcombine.high %v337_v50, %v343_v55  ;;  %v486_v44 = vcombine.high %v429_v52, %v461_v53 }
 0x252   :  { %v487_v50 = vcombine.low %v436_v46, %v468_v23 }
 0x253   :  { %v630_v58 = vsel %vm629_vm5, %v485_v56, -inf  ;;  %v517_v62 = vrot.slane %v509_v57, %v4487_v36  ;;  %v524_v37 = vrot.slane %v510_v12, %v4487_v36  ;;  %v636_v53 = vsel %vm629_vm5, %v486_v44, -inf }
 0x254   :  { %v352_v59 = vpop.permute.xlu1 %351  ;;  %631 = vmax.xlane.f32.xlu1 %v630_v58  ;;  %v349_v60 = vpop.permute.xlu0 %348  ;;  %v437_v56 = vcombine.low %v372_v49, %v388_v38  ;;  %v488_v58 = vcombine.high %v436_v46, %v468_v23  ;;  %v642_v61 = vsel %vm629_vm5, %v487_v50, -inf }
 0x255   :  { %v525_v63 = vcombine.low %v346_v54, %v352_v59  ;;  %v557_v11 = vcombine.low %v501_v2, %v517_v62  ;;  %v526_v13 = vcombine.high %v346_v54, %v352_v59  ;;  %v558_v15 = vcombine.high %v501_v2, %v517_v62 }
 0x256   :  { %v573_v47 = vcombine.low %v508_v42, %v524_v37  ;;  %v477_v59 = vrot.slane %v469_v51, %v4504_v48  ;;  %v574_v2 = vcombine.high %v508_v42, %v524_v37 }
 0x257   :  { %v533_v4 = vrot.slane %v525_v63, %v4487_v36  ;;  %v565_v25 = vrot.slane %v557_v11, %v4504_v48  ;;  %v540_v22 = vrot.slane %v526_v13, %v4487_v36  ;;  %v572_v40 = vrot.slane %v558_v15, %v4504_v48 }
 0x258   :  { %v355_v1 = vpop.permute.xlu0 %354  ;;  %v581_v57 = vrot.slane %v573_v47, %v4504_v48  ;;  %v588_v13 = vrot.slane %v574_v2, %v4504_v48 }
 0x259   :  { %v541_v3 = vcombine.low %v349_v60, %v355_v1  ;;  %v542_v8 = vcombine.high %v349_v60, %v355_v1  ;;  %v445_v1 = vrot.slane %v437_v56, %v4504_v48 }
 0x25b   :  { %v549_v9 = vrot.slane %v541_v3, %v4487_v36  ;;  %v556_v24 = vrot.slane %v542_v8, %v4487_v36  ;;  %v489_v3 = vcombine.low %v445_v1, %v477_v59  ;;  %v490_v19 = vcombine.high %v445_v1, %v477_v59 }
 0x25d   :  { %v589_v14 = vcombine.low %v533_v4, %v549_v9  ;;  %v590_v16 = vcombine.high %v533_v4, %v549_v9  ;;  %v605_v45 = vcombine.low %v540_v22, %v556_v24  ;;  %v606_v63 = vcombine.high %v540_v22, %v556_v24  ;;  %v4051_v22 = vld [vmem:[%s5735_s0 + $0x4] sm:$0x7] }
 0x25e   :  { %v470_v4 = vcombine.high %v404_v43, %v420_v41  ;;  %v648_v9 = vsel %vm629_vm5, %v488_v58, -inf  ;;  %v654_v17 = vsel %vm629_vm5, %v489_v3, -inf }
 0x25f   :  { %v597_v29 = vrot.slane %v589_v14, %v4504_v48  ;;  %v604_v31 = vrot.slane %v590_v16, %v4504_v48  ;;  %v613_v55 = vrot.slane %v605_v45, %v4504_v48  ;;  %v620_v12 = vrot.slane %v606_v63, %v4504_v48 }
 0x260   :  { %v438_v14 = vcombine.high %v372_v49, %v388_v38  ;;  %v484_v15 = vrot.slane %v470_v4, %v4504_v48 }
 0x261   :  { %v622_v35 = vcombine.high %v565_v25, %v597_v29  ;;  %v621_v39 = vcombine.low %v565_v25, %v597_v29  ;;  %v623_v34 = vcombine.low %v572_v40, %v604_v31  ;;  %v624_v54 = vcombine.high %v572_v40, %v604_v31 }
 0x262   :  { %v625_v62 = vcombine.low %v581_v57, %v613_v55  ;;  %v626_v11 = vcombine.high %v581_v57, %v613_v55  ;;  %v627_v18 = vcombine.low %v588_v13, %v620_v12  ;;  %v452_v20 = vrot.slane %v438_v14, %v4504_v48 }
 0x263   :  { %v639_v27 = vsel %vm629_vm5, %v622_v35, -inf  ;;  %v633_v28 = vsel %vm629_vm5, %v621_v39, -inf  ;;  %v645_v52 = vsel %vm629_vm5, %v623_v34, -inf  ;;  %v651_v60 = vsel %vm629_vm5, %v624_v54, -inf }
 0x264   :  { %640 = vmax.xlane.f32.xlu1 %v639_v27  ;;  %634 = vmax.xlane.f32.xlu0 %v633_v28  ;;  %v657_v8 = vsel %vm629_vm5, %v625_v62, -inf  ;;  %v663_v16 = vsel %vm629_vm5, %v626_v11, -inf  ;;  %v669_v24 = vsel %vm629_vm5, %v627_v18, -inf  ;;  %v660_v25 = vsel %vm629_vm5, %v490_v19, -inf }
 0x265   :  { %v628_v29 = vcombine.high %v588_v13, %v620_v12  ;;  %v491_v31 = vcombine.low %v452_v20, %v484_v15  ;;  %v492_v37 = vcombine.high %v452_v20, %v484_v15  ;;  %v4564_v27 = vand.u32 127, %v362_v26 }
 0x267   :  { %v675_v32 = vsel %vm629_vm5, %v628_v29, -inf  ;;  %v666_v33 = vsel %vm629_vm5, %v491_v31, -inf  ;;  %v672_v21 = vsel %vm629_vm5, %v492_v37, -inf  ;;  %v696_v45 = vadd.s32 4294967295, %v4564_v27  ;;  %v788_v29 = vld [vmem:[%s5738_s3] sm:$0xff] }
 0x268   :  { %646 = vmax.xlane.f32.xlu1 %v645_v52  ;;  %637 = vmax.xlane.f32.xlu0 %v636_v53  ;;  %v701_v38 = vadd.s32 4294967287, %v4564_v27 }
 0x269   :  { %v4569_v47 = vsub.s32 %v696_v45, %v4480_v30  ;;  %4193 = vmatprep.mubr.msk.f32.mxu0 %vm798_vm15, %v788_v29 }
 0x26a   :  { %v4572_v49 = vsub.s32 %v701_v38, %v4480_v30 }
 0x26c   :  { %652 = vmax.xlane.f32.xlu1 %v651_v60  ;;  %643 = vmax.xlane.f32.xlu0 %v642_v61 }
 0x270   :  { %658 = vmax.xlane.f32.xlu1 %v657_v8  ;;  %649 = vmax.xlane.f32.xlu0 %v648_v9 }
 0x274   :  { %664 = vmax.xlane.f32.xlu1 %v663_v16  ;;  %655 = vmax.xlane.f32.xlu0 %v654_v17 }
 0x278   :  { %670 = vmax.xlane.f32.xlu1 %v669_v24  ;;  %661 = vmax.xlane.f32.xlu0 %v660_v25  ;;  %v4041_v25 = vld [vmem:[%s5738_s3 + $0x10] sm:$0xff] }
 0x279   :  { %4188 = vmatprep.mubr.msk.f32.mxu1 %vm798_vm15, %v4041_v25 }
 0x27c   :  { %676 = vmax.xlane.f32.xlu1 %v675_v32  ;;  %667 = vmax.xlane.f32.xlu0 %v666_v33 }
 0x280   :  { %673 = vmax.xlane.f32.xlu0 %v672_v21 }
 0x296   :  { %1560 = vrot.lane.b32.xlu0 %v4051_v22, %s4307_s26 }
 0x2dd   :  { %v632_v35 = vpop.xlane.xlu1 %631 }
 0x2de   :  { %v700_v58 = vrot.slane %v632_v35, %v4569_v47 }
 0x2ed   :  { %v641_v39 = vpop.xlane.xlu1 %640  ;;  %v635_v40 = vpop.xlane.xlu0 %634 }
 0x2ee   :  { %v715_v53 = vrot.slane %v641_v39, %v4572_v49  ;;  %v705_v54 = vrot.slane %v635_v40, %v4572_v49  ;;  %v4618_v39 = vld [vmem:[%s5738_s3 + $0x8] sm:$0xff] }
 0x2f0   :  { %v707_v2 = vsel %vm706_vm7, %v705_v54, %v700_v58 }
 0x2f1   :  { %v647_v41 = vpop.xlane.xlu1 %646  ;;  %v638_v42 = vpop.xlane.xlu0 %637 }
 0x2f2   :  { %v711_v50 = vrot.slane %v638_v42, %v4569_v47  ;;  %v724_v56 = vrot.slane %v647_v41, %v4572_v49  ;;  %v4633_v41 = vld [vmem:[%s5738_s3 + $0x18] sm:$0xff] }
 0x2f4   :  { %v716_v59 = vsel %vm706_vm7, %v715_v53, %v711_v50 }
 0x2f5   :  { %v653_v44 = vpop.xlane.xlu1 %652  ;;  %v644_v23 = vpop.xlane.xlu0 %643  ;;  %v772_v9 = vsel %vm771_vm8, %v716_v59, %v707_v2 }
 0x2f6   :  { %v720_v51 = vrot.slane %v644_v23, %v4569_v47  ;;  %v733_v60 = vrot.slane %v653_v44, %v4572_v49  ;;  %v4638_v44 = vld [vmem:[%s5738_s3 + $0x20] sm:$0xff]  ;;  %v4650_v23 = vld [vmem:[%s5738_s3 + $0x28] sm:$0xff] }
 0x2f8   :  { %v725_v62 = vsel %vm706_vm7, %v724_v56, %v720_v51 }
 0x2f9   :  { %v659_v28 = vpop.xlane.xlu1 %658  ;;  %v650_v34 = vpop.xlane.xlu0 %649  ;;  %v774_v14 = vsel %vm773_vm9, %v725_v62, %v772_v9 }
 0x2fa   :  { %v729_v55 = vrot.slane %v650_v34, %v4569_v47  ;;  %v742_v63 = vrot.slane %v659_v28, %v4572_v49 }
 0x2fc   :  { %v734_v3 = vsel %vm706_vm7, %v733_v60, %v729_v55 }
 0x2fd   :  { %v665_v43 = vpop.xlane.xlu1 %664  ;;  %v656_v46 = vpop.xlane.xlu0 %655  ;;  %v776_v16 = vsel %vm775_vm10, %v734_v3, %v774_v14 }
 0x2fe   :  { %v738_v57 = vrot.slane %v656_v46, %v4569_v47  ;;  %v751_v4 = vrot.slane %v665_v43, %v4572_v49 }
 0x300   :  { %v743_v11 = vsel %vm706_vm7, %v742_v63, %v738_v57 }
 0x301   :  { %v671_v26 = vpop.xlane.xlu1 %670  ;;  %v662_v52 = vpop.xlane.xlu0 %661  ;;  %v778_v19 = vsel %vm777_vm11, %v743_v11, %v776_v16 }
 0x302   :  { %v747_v61 = vrot.slane %v662_v52, %v4569_v47  ;;  %v760_v12 = vrot.slane %v671_v26, %v4572_v49 }
 0x304   :  { %v752_v15 = vsel %vm706_vm7, %v751_v4, %v747_v61 }
 0x305   :  { %v668_v1 = vpop.xlane.xlu0 %667  ;;  %v677_v13 = vpop.xlane.xlu1 %676  ;;  %v780_v31 = vsel %vm779_vm12, %v752_v15, %v778_v19 }
 0x306   :  { %v756_v8 = vrot.slane %v668_v1, %v4569_v47  ;;  %v769_v20 = vrot.slane %v677_v13, %v4572_v49 }
 0x308   :  { %v761_v17 = vsel %vm706_vm7, %v760_v12, %v756_v8 }
 0x309   :  { %v674_v18 = vpop.xlane.xlu0 %673  ;;  %v782_v32 = vsel %vm781_vm13, %v761_v17, %v780_v31 }
 0x30a   :  { %v765_v24 = vrot.slane %v674_v18, %v4569_v47 }
 0x30c   :  { %v770_v33 = vsel %vm706_vm7, %v769_v20, %v765_v24 }
 0x30d   :  { %v784_v37 = vsel %vm783_vm14, %v770_v33, %v782_v32  ;;  %v1561_v21 = vpop.permute.xlu0 %1560 }
 0x30e   :  { %787 = vst.msk [vmem:[#allocation3] sm:$0xff] %vm786_vm0, %v784_v37 }
 0x30f   :  { %1563 = vst.msk [vmem:[#allocation2] sm:$0x7] %vm62_vm2, %v1561_v21  ;;  %vm1462_vm2 = vcmask 195712  }
 0x315   :  { %v790_v22 = vld [vmem:[#allocation3] sm:$0xff] }
 0x316   :  { %v1565_v35 = vld [vmem:[#allocation2] sm:$0x7]  ;;  %795 = vrot.lane.b32.xlu1 %v790_v22, %s4311_s29  ;;  %4191 = vmatprep.subr.mxu0 %v790_v22 }
 0x317   :  { %4192 = vmatpush3.msra.mxu0 %v790_v22  ;;  %1568 = vrot.lane.b32.xlu0 %v1565_v35, %s4311_s29 }
 0x318   :  { %4194 = vmatmul.mubr.msk.f32.vlgmr.msra.gmra.mxu0 %vm798_vm15, %v4618_v39  ;;  %4201 = vmatprep.subr.mxu0 %v4306_v0 }
 0x319   :  { %4203 = vmatprep.mubr.msk.f32.mxu0 %vm4308_vm1, %v4306_v0 }
 0x31a   :  { %964 = vrot.lane.b32.xlu1 %v790_v22, %s4310_s28 }
 0x31b   :  { %1802 = vperm.xlu0 %4258, %v4415_v6  }
 0x31e   :  { %1721 = vrot.lane.b32.xlu1 %v1565_v35, %s4310_s28 }
 0x388   :  { %v796_v40 = vpop.permute.xlu1 %795 }
 0x389   :  { %4186 = vmatprep.subr.mxu1 %v796_v40  ;;  %v1569_v42 = vpop.permute.xlu0 %1568 }
 0x38a   :  { %4187 = vmatpush3.msra.mxu1 %v796_v40  ;;  %4202 = vmatpush3.msk.msra.mxu0 %vm75_vm3, %v1569_v42 }
 0x38b   :  { %4189 = vmatmul.mubr.msk.f32.vlgmr.msra.gmra.mxu1 %vm798_vm15, %v4633_v41  ;;  %4204 = vmatmul.mubr.msk.f32.vlgmr.msra.gmra.mxu0 %vm71_vm4, %v4423_v7 }
 0x38c   :  { %v965_v6 = vpop.permute.xlu1 %964  ;;  %4198 = vmatprep.mubr.msk.f32.mxu1 %vm798_vm15, %v4638_v44  ;;  %4211 = vmatprep.subr.mxu0 %v4306_v0 }
 0x38d   :  { %4196 = vmatprep.subr.mxu1 %v965_v6  ;;  %4213 = vmatprep.mubr.msk.f32.mxu0 %vm4308_vm1, %v4306_v0 }
 0x38e   :  { %4197 = vmatpush3.msra.mxu1 %v965_v6 }
 0x38f   :  { %4199 = vmatmul.mubr.msk.f32.vlgmr.msra.gmra.mxu1 %vm798_vm15, %v4650_v23  ;;  %4206 = vmatprep.subr.mxu1 %v4306_v0 }
 0x390   :  { %v1722_v7 = vpop.permute.xlu1 %1721  ;;  %4207 = vmatpush3.msk.msra.mxu1 %vm75_vm3, %v1565_v35  ;;  %4208 = vmatprep.mubr.msk.f32.mxu1 %vm4308_vm1, %v4306_v0  ;;  %vm1455_vm1 = vcmask 130112  }
 0x391   :  { %4212 = vmatpush3.msk.msra.mxu0 %vm75_vm3, %v1722_v7  ;;  %vm1469_vm3 = vcmask 261312  }
 0x392   :  { %4214 = vmatmul.mubr.msk.f32.vlgmr.msra.gmra.mxu0 %vm71_vm4, %v4435_v10 }
 0x393   :  { %4209 = vmatmul.mubr.msk.f32.vlgmr.msra.gmra.mxu1 %vm71_vm4, %v4407_v5  ;;  %4223 = vmatprep.mubr.msk.f32.mxu0 %vm798_vm15, %v788_v29  ;;  %vm1476_vm4 = vcmask 326912  }
 0x394   :  { %4218 = vmatprep.mubr.msk.f32.mxu1 %vm798_vm15, %v4041_v25 }
 0x396   :  { %v1803_v58 = vpop.permute.xlu0 %1802 }
 0x3d8   :  { %v4195_v28 = vpop.f32.mrf.mxu0 }
 0x3da   :  { %v952_v34 = vpop.f32.mrf.mxu0 }
 0x44b   :  { %v4190_v45 = vpop.f32.mrf.mxu1  ;;  %v1641_v38 = vpop.f32.mrf.mxu0 }
 0x44c   :  { %v958_v50 = vadd.f32 %v4195_v28, %v4190_v45 }
 0x44d   :  { %v871_v43 = vpop.f32.mrf.mxu1  ;;  %v4205_v46 = vpop.f32.mrf.mxu0 }
 0x44e   :  { %v953_v51 = vadd.f32 %v952_v34, %v871_v43 }
 0x44f   :  { %v4200_v26 = vpop.f32.mrf.mxu1 }
 0x450   :  { %v4668_v52 = vadd.f32 %v4200_v26, %v958_v50 }
 0x451   :  { %v1039_v53 = vpop.f32.mrf.mxu1 }
 0x452   :  { %v4670_v10 = vadd.f32 %v1039_v53, %v953_v51  ;;  %v1794_v54 = vpop.f32.mrf.mxu0 }
 0x453   :  { %v1716_v5 = vpop.f32.mrf.mxu1 }
 0x454   :  { %v1717_v55 = vadd.f32 %v1716_v5, %v1641_v38  ;;  %v4215_v56 = vpop.f32.mrf.mxu0 }
 0x455   :  { %v4210_v57 = vpop.f32.mrf.mxu1 }
 0x456   :  { %v1798_v59 = vadd.f32 %v1794_v54, %v1717_v55 }
 0x458   :  { %v1805_v60 = vadd.f32 %v1803_v58, %v1798_v59 }
 0x45a   :  { %v4672_v61 = vmax.f32 %v1805_v60, 0.0 }
 0x45c   :  { %1814 = vrot.lane.b32.xlu0 %v4672_v61, %s4314_s17  ;;  %1808 = vrot.lane.b32.xlu1 %v4672_v61, %s4310_s28 }
 0x460   :  { %1820 = vrot.lane.b32.xlu0 %v4672_v61, %s4316_s19  ;;  %1811 = vrot.lane.b32.xlu1 %v4672_v61, %s4312_s16 }
 0x464   :  { %1826 = vrot.lane.b32.xlu0 %v4672_v61, %s4318_s21  ;;  %1817 = vrot.lane.b32.xlu1 %v4672_v61, %s4313_s1 }
 0x468   :  { %1832 = vrot.lane.b32.xlu0 %v4672_v61, %s4320_s23  ;;  %1823 = vrot.lane.b32.xlu1 %v4672_v61, %s4315_s18 }
 0x46c   :  { %1838 = vrot.lane.b32.xlu0 %v4672_v61, %s4322_s25  ;;  %1829 = vrot.lane.b32.xlu1 %v4672_v61, %s4317_s20 }
 0x470   :  { %1844 = vrot.lane.b32.xlu0 %v4672_v61, %s4324_s27  ;;  %1835 = vrot.lane.b32.xlu1 %v4672_v61, %s4319_s22 }
 0x474   :  { %1850 = vrot.lane.b32.xlu0 %v4672_v61, %s4325_s30  ;;  %1841 = vrot.lane.b32.xlu1 %v4672_v61, %s4321_s24 }
 0x478   :  { %1847 = vrot.lane.b32.xlu1 %v4672_v61, %s4323_s7 }
 0x4ce   :  { %v4704_v62 = vpop.permute.xlu0 %1814  ;;  %v4706_v63 = vpop.permute.xlu1 %1808 }
 0x4cf   :  { %v1869_v9 = vcombine.low %v4706_v63, %v4704_v62  ;;  %v1870_v55 = vcombine.high %v4706_v63, %v4704_v62 }
 0x4d1   :  { %v1877_v15 = vrot.slane %v1869_v9, %v4487_v36 }
 0x4d2   :  { %v4708_v1 = vpop.permute.xlu0 %1820  ;;  %v4710_v2 = vpop.permute.xlu1 %1811 }
 0x4d3   :  { %v1853_v3 = vcombine.low %v4672_v61, %v4710_v2 }
 0x4d5   :  { %v4719_v11 = vrot.slane %v1853_v3, %v4487_v36 }
 0x4d6   :  { %v4714_v4 = vpop.permute.xlu0 %1826  ;;  %v1818_v8 = vpop.permute.xlu1 %1817 }
 0x4d7   :  { %v1901_v12 = vcombine.low %v4708_v1, %v4714_v4  ;;  %v1917_v17 = vcombine.low %v4719_v11, %v1877_v15 }
 0x4d9   :  { %v1909_v18 = vrot.slane %v1901_v12, %v4487_v36  ;;  %v1925_v29 = vrot.slane %v1917_v17, %v4504_v48  ;;  %v1854_v12 = vcombine.high %v4672_v61, %v4710_v2  ;;  %v1902_v17 = vcombine.high %v4708_v1, %v4714_v4 }
 0x4da   :  { %v1833_v13 = vpop.permute.xlu0 %1832  ;;  %v1824_v14 = vpop.permute.xlu1 %1823 }
 0x4db   :  { %v1885_v16 = vcombine.low %v1818_v8, %v1824_v14  ;;  %v1886_v56 = vcombine.high %v1818_v8, %v1824_v14 }
 0x4dd   :  { %v1893_v19 = vrot.slane %v1885_v16, %v4487_v36  ;;  %v1918_v16 = vcombine.high %v4719_v11, %v1877_v15  ;;  %v1868_v15 = vrot.slane %v1854_v12, %v4487_v36 }
 0x4de   :  { %v1839_v20 = vpop.permute.xlu0 %1838  ;;  %v1830_v24 = vpop.permute.xlu1 %1829 }
 0x4df   :  { %v1949_v25 = vcombine.low %v1893_v19, %v1909_v18  ;;  %v2005_v42 = vcombine.low %v1833_v13, %v1839_v20  ;;  %v1950_v57 = vcombine.high %v1893_v19, %v1909_v18  ;;  %v2006_v58 = vcombine.high %v1833_v13, %v1839_v20 }
 0x4e0   :  { %v1900_v18 = vrot.slane %v1886_v56, %v4487_v36 }
 0x4e1   :  { %v1957_v31 = vrot.slane %v1949_v25, %v4504_v48  ;;  %v2013_v34 = vrot.slane %v2005_v42, %v4487_v36  ;;  %v2020_v19 = vrot.slane %v2006_v58, %v4487_v36  ;;  %v1964_v61 = vrot.slane %v1950_v57, %v4504_v48 }
 0x4e2   :  { %v1845_v32 = vpop.permute.xlu0 %1844  ;;  %v1836_v33 = vpop.permute.xlu1 %1835  ;;  %v1932_v25 = vrot.slane %v1918_v16, %v4504_v48 }
 0x4e3   :  { %v1981_v37 = vcombine.low %v1925_v29, %v1957_v31  ;;  %v1989_v21 = vcombine.low %v1830_v24, %v1836_v33  ;;  %v1990_v51 = vcombine.high %v1830_v24, %v1836_v33  ;;  %v1982_v20 = vcombine.high %v1925_v29, %v1957_v31 }
 0x4e4   :  { %v1916_v24 = vrot.slane %v1902_v17, %v4487_v36  ;;  %v1884_v33 = vrot.slane %v1870_v55, %v4487_v36  ;;  %v1983_v31 = vcombine.low %v1932_v25, %v1964_v61 }
 0x4e5   :  { %v2125_v22 = vsel %vm629_vm5, %v1981_v37, -inf  ;;  %v1997_v6 = vrot.slane %v1989_v21, %v4487_v36  ;;  %v2004_v62 = vrot.slane %v1990_v51, %v4487_v36  ;;  %v2131_v21 = vsel %vm629_vm5, %v1982_v20, -inf }
 0x4e6   :  { %v1851_v35 = vpop.permute.xlu0 %1850  ;;  %2126 = vmax.xlane.f32.xlu1 %v2125_v22  ;;  %v1842_v40 = vpop.permute.xlu1 %1841  ;;  %v1965_v29 = vcombine.low %v1900_v18, %v1916_v24  ;;  %v1934_v55 = vcombine.high %v1868_v15, %v1884_v33 }
 0x4e7   :  { %v2037_v7 = vcombine.low %v1845_v32, %v1851_v35  ;;  %v2053_v38 = vcombine.low %v1997_v6, %v2013_v34  ;;  %v2054_v26 = vcombine.high %v1997_v6, %v2013_v34  ;;  %v2038_v53 = vcombine.high %v1845_v32, %v1851_v35 }
 0x4e8   :  { %v2069_v32 = vcombine.low %v2004_v62, %v2020_v19  ;;  %v1984_v6 = vcombine.high %v1932_v25, %v1964_v61 }
 0x4e9   :  { %v2045_v43 = vrot.slane %v2037_v7, %v4487_v36  ;;  %v2061_v60 = vrot.slane %v2053_v38, %v4504_v48  ;;  %v2052_v63 = vrot.slane %v2038_v53, %v4487_v36  ;;  %v2068_v14 = vrot.slane %v2054_v26, %v4504_v48 }
 0x4ea   :  { %v1848_v28 = vpop.permute.xlu1 %1847  ;;  %v2077_v42 = vrot.slane %v2069_v32, %v4504_v48  ;;  %v1973_v7 = vrot.slane %v1965_v29, %v4504_v48  ;;  %v2143_v53 = vsel %vm629_vm5, %v1984_v6, -inf }
 0x4eb   :  { %v2021_v45 = vcombine.low %v1842_v40, %v1848_v28  ;;  %v2022_v46 = vcombine.high %v1842_v40, %v1848_v28  ;;  %v1933_v40 = vcombine.low %v1868_v15, %v1884_v33 }
 0x4ed   :  { %v2029_v50 = vrot.slane %v2021_v45, %v4487_v36  ;;  %v2036_v59 = vrot.slane %v2022_v46, %v4487_v36  ;;  %v2137_v45 = vsel %vm629_vm5, %v1983_v31, -inf  ;;  %v2070_v46 = vcombine.high %v2004_v62, %v2020_v19 }
 0x4ef   :  { %v2085_v54 = vcombine.low %v2029_v50, %v2045_v43  ;;  %v2086_v5 = vcombine.high %v2029_v50, %v2045_v43  ;;  %v2101_v2 = vcombine.low %v2036_v59, %v2052_v63  ;;  %v2102_v28 = vcombine.high %v2036_v59, %v2052_v63 }
 0x4f0   :  { %v1941_v43 = vrot.slane %v1933_v40, %v4504_v48  ;;  %v1966_v50 = vcombine.high %v1900_v18, %v1916_v24  ;;  %v2084_v56 = vrot.slane %v2070_v46, %v4504_v48 }
 0x4f1   :  { %v2093_v3 = vrot.slane %v2085_v54, %v4504_v48  ;;  %v2100_v9 = vrot.slane %v2086_v5, %v4504_v48  ;;  %v2109_v35 = vrot.slane %v2101_v2, %v4504_v48  ;;  %v2116_v5 = vrot.slane %v2102_v28, %v4504_v48 }
 0x4f2   :  { %v1985_v51 = vcombine.low %v1941_v43, %v1973_v7  ;;  %v1980_v57 = vrot.slane %v1966_v50, %v4504_v48 }
 0x4f3   :  { %v2118_v8 = vcombine.high %v2061_v60, %v2093_v3  ;;  %v2117_v13 = vcombine.low %v2061_v60, %v2093_v3  ;;  %v2119_v4 = vcombine.low %v2068_v14, %v2100_v9  ;;  %v2120_v22 = vcombine.high %v2068_v14, %v2100_v9 }
 0x4f4   :  { %v2121_v38 = vcombine.low %v2077_v42, %v2109_v35  ;;  %v2122_v54 = vcombine.high %v2077_v42, %v2109_v35  ;;  %v2149_v59 = vsel %vm629_vm5, %v1985_v51, -inf  ;;  %v2123_v60 = vcombine.low %v2084_v56, %v2116_v5 }
 0x4f5   :  { %v2134_v11 = vsel %vm629_vm5, %v2118_v8, -inf  ;;  %v2128_v1 = vsel %vm629_vm5, %v2117_v13, -inf  ;;  %v2140_v37 = vsel %vm629_vm5, %v2119_v4, -inf  ;;  %v2146_v34 = vsel %vm629_vm5, %v2120_v22, -inf }
 0x4f6   :  { %2135 = vmax.xlane.f32.xlu1 %v2134_v11  ;;  %2129 = vmax.xlane.f32.xlu0 %v2128_v1  ;;  %v2152_v26 = vsel %vm629_vm5, %v2121_v38, -inf  ;;  %v2158_v58 = vsel %vm629_vm5, %v2122_v54, -inf  ;;  %v1986_v3 = vcombine.high %v1941_v43, %v1973_v7  ;;  %v1948_v9 = vrot.slane %v1934_v55, %v4504_v48 }
 0x4f7   :  { %v2164_v12 = vsel %vm629_vm5, %v2123_v60, -inf  ;;  %v2124_v17 = vcombine.high %v2084_v56, %v2116_v5 }
 0x4f8   :  { %v2155_v16 = vsel %vm629_vm5, %v1986_v3, -inf  ;;  %v1987_v62 = vcombine.low %v1948_v9, %v1980_v57  ;;  %v1988_v13 = vcombine.high %v1948_v9, %v1980_v57 }
 0x4f9   :  { %v2170_v63 = vsel %vm629_vm5, %v2124_v17, -inf }
 0x4fa   :  { %2141 = vmax.xlane.f32.xlu1 %v2140_v37  ;;  %2132 = vmax.xlane.f32.xlu0 %v2131_v21  ;;  %v2161_v8 = vsel %vm629_vm5, %v1987_v62, -inf  ;;  %v2167_v14 = vsel %vm629_vm5, %v1988_v13, -inf }
 0x4fe   :  { %2147 = vmax.xlane.f32.xlu1 %v2146_v34  ;;  %2138 = vmax.xlane.f32.xlu0 %v2137_v45 }
 0x502   :  { %2153 = vmax.xlane.f32.xlu1 %v2152_v26  ;;  %2144 = vmax.xlane.f32.xlu0 %v2143_v53 }
 0x506   :  { %2159 = vmax.xlane.f32.xlu1 %v2158_v58  ;;  %2150 = vmax.xlane.f32.xlu0 %v2149_v59 }
 0x50a   :  { %2165 = vmax.xlane.f32.xlu1 %v2164_v12  ;;  %2156 = vmax.xlane.f32.xlu0 %v2155_v16 }
 0x50e   :  { %2171 = vmax.xlane.f32.xlu1 %v2170_v63  ;;  %2162 = vmax.xlane.f32.xlu0 %v2161_v8 }
 0x512   :  { %2168 = vmax.xlane.f32.xlu0 %v2167_v14 }
 0x56f   :  { %v2127_v18 = vpop.xlane.xlu1 %2126 }
 0x570   :  { %v2192_v42 = vrot.slane %v2127_v18, %v4569_v47 }
 0x57f   :  { %v2130_v19 = vpop.xlane.xlu0 %2129  ;;  %v2136_v20 = vpop.xlane.xlu1 %2135 }
 0x580   :  { %v2196_v37 = vrot.slane %v2130_v19, %v4572_v49  ;;  %v2205_v21 = vrot.slane %v2136_v20, %v4572_v49 }
 0x582   :  { %v2197_v43 = vsel %vm706_vm7, %v2196_v37, %v2192_v42 }
 0x583   :  { %v2133_v61 = vpop.xlane.xlu0 %2132  ;;  %v2142_v2 = vpop.xlane.xlu1 %2141 }
 0x584   :  { %v2201_v32 = vrot.slane %v2133_v61, %v4569_v47  ;;  %v2214_v35 = vrot.slane %v2142_v2, %v4572_v49 }
 0x586   :  { %v2206_v6 = vsel %vm706_vm7, %v2205_v21, %v2201_v32 }
 0x587   :  { %v2139_v11 = vpop.xlane.xlu0 %2138  ;;  %v2148_v1 = vpop.xlane.xlu1 %2147  ;;  %v2261_v26 = vsel %vm771_vm8, %v2206_v6, %v2197_v43  ;;  %vm1504_vm8 = vcmask 589312  }
 0x588   :  { %v2210_v33 = vrot.slane %v2139_v11, %v4569_v47  ;;  %v2223_v7 = vrot.slane %v2148_v1, %v4572_v49 }
 0x58a   :  { %v2215_v34 = vsel %vm706_vm7, %v2214_v35, %v2210_v33 }
 0x58b   :  { %v2145_v4 = vpop.xlane.xlu0 %2144  ;;  %v2154_v15 = vpop.xlane.xlu1 %2153  ;;  %v2262_v55 = vsel %vm773_vm9, %v2215_v34, %v2261_v26  ;;  %vm1511_vm9 = vcmask 654912  }
 0x58c   :  { %v2219_v22 = vrot.slane %v2145_v4, %v4569_v47  ;;  %v2232_v45 = vrot.slane %v2154_v15, %v4572_v49 }
 0x58e   :  { %v2224_v46 = vsel %vm706_vm7, %v2223_v7, %v2219_v22 }
 0x58f   :  { %v2151_v24 = vpop.xlane.xlu0 %2150  ;;  %v2160_v25 = vpop.xlane.xlu1 %2159  ;;  %v2263_v57 = vsel %vm775_vm10, %v2224_v46, %v2262_v55  ;;  %vm1518_vm10 = vcmask 720512  }
 0x590   :  { %v2228_v40 = vrot.slane %v2151_v24, %v4569_v47  ;;  %v2241_v50 = vrot.slane %v2160_v25, %v4572_v49 }
 0x592   :  { %v2233_v53 = vsel %vm706_vm7, %v2232_v45, %v2228_v40 }
 0x593   :  { %v2157_v29 = vpop.xlane.xlu0 %2156  ;;  %v2166_v31 = vpop.xlane.xlu1 %2165  ;;  %v2264_v60 = vsel %vm777_vm11, %v2233_v53, %v2263_v57  ;;  %vm1525_vm11 = vcmask 786112  }
 0x594   :  { %v2237_v28 = vrot.slane %v2157_v29, %v4569_v47  ;;  %v2250_v54 = vrot.slane %v2166_v31, %v4572_v49 }
 0x596   :  { %v2242_v56 = vsel %vm706_vm7, %v2241_v50, %v2237_v28 }
 0x597   :  { %v2163_v38 = vpop.xlane.xlu0 %2162  ;;  %v2172_v5 = vpop.xlane.xlu1 %2171  ;;  %v2265_v12 = vsel %vm779_vm12, %v2242_v56, %v2264_v60  ;;  %vm1532_vm12 = vcmask 851712  }
 0x598   :  { %v2246_v51 = vrot.slane %v2163_v38, %v4569_v47  ;;  %v2259_v3 = vrot.slane %v2172_v5, %v4572_v49  ;;  %v1051_v49 = vld [vmem:[%s5739_s4 + $0x8] sm:$0xff] }
 0x59a   :  { %v2251_v58 = vsel %vm706_vm7, %v2250_v54, %v2246_v51 }
 0x59b   :  { %v2169_v59 = vpop.xlane.xlu0 %2168  ;;  %v2266_v16 = vsel %vm781_vm13, %v2251_v58, %v2265_v12  ;;  %vm1539_vm13 = vcmask 917312  }
 0x59c   :  { %v2255_v9 = vrot.slane %v2169_v59, %v4569_v47  ;;  %v1050_v47 = vld [vmem:[%s5739_s4] sm:$0xff]  ;;  %s4328_s4 = smov [#allocation8]  }
 0x59e   :  { %v2260_v17 = vsel %vm706_vm7, %v2259_v3, %v2255_v9  ;;  %vm1497_vm7 = vcmask 523712  }
 0x59f   :  { %v2267_v62 = vsel %vm783_vm14, %v2260_v17, %v2266_v16  ;;  %vm1546_vm14 = vcmask 982912  }
 0x5a0   :  { %2269 = vst.msk [vmem:[#allocation3] sm:$0xff] %vm786_vm0, %v2267_v62  ;;  %vm4016_vm0 = vcmask 74752  }
 0x5a7   :  { %v2272_v63 = vld [vmem:[#allocation3] sm:$0xff] }
 0x5a8   :  { %2443 = vrot.lane.b32.xlu1 %v2272_v63, %s4310_s28  ;;  %2276 = vrot.lane.b32.xlu0 %v2272_v63, %s4311_s29 }
 0x5a9   :  { %4221 = vmatprep.subr.mxu0 %v2272_v63 }
 0x5aa   :  { %4222 = vmatpush3.msra.mxu0 %v2272_v63 }
 0x5ab   :  { %4224 = vmatmul.mubr.msk.f32.vlgmr.msra.gmra.mxu0 %vm798_vm15, %v4618_v39 }
 0x5ac   :  { %1054 = vperm.xlu1 %4257, %v1050_v47   ;;  %2533 = vperm.xlu0 %4258, %v1050_v47  }
 0x5ad   :  { %3157 = vmatprep.mubr.f32.mxu0 %v4306_v0 }
 0x5b0   :  { %1059 = vperm.xlu1 %4257, %v1051_v49   ;;  %2538 = vperm.xlu0 %4258, %v1051_v49  }
 0x61a   :  { %v2277_v8 = vpop.permute.xlu0 %2276  ;;  %v2444_v13 = vpop.permute.xlu1 %2443 }
 0x61b   :  { %4216 = vmatprep.subr.mxu1 %v2277_v8 }
 0x61c   :  { %4217 = vmatpush3.msra.mxu1 %v2277_v8 }
 0x61d   :  { %4219 = vmatmul.mubr.msk.f32.vlgmr.msra.gmra.mxu1 %vm798_vm15, %v4633_v41  ;;  %4226 = vmatprep.subr.mxu1 %v2444_v13 }
 0x61e   :  { %4227 = vmatpush3.msra.mxu1 %v2444_v13  ;;  %4228 = vmatprep.mubr.msk.f32.mxu1 %vm798_vm15, %v4638_v44 }
 0x621   :  { %4229 = vmatmul.mubr.msk.f32.vlgmr.msra.gmra.mxu1 %vm798_vm15, %v4650_v23  ;;  %vm1553_vm15 = vcmask 1048512  }
 0x622   :  { %3228 = vmatprep.mubr.f32.mxu1 %v4306_v0 }
 0x627   :  { %v1055_v39 = vpop.permute.xlu1 %1054  ;;  %v2534_v23 = vpop.permute.xlu0 %2533 }
 0x628   :  { %v1062_v14 = vadd.f32 %v1055_v39, %v4670_v10 }
 0x62a   :  { %v4829_v18 = vmax.f32 %v1062_v14, 0.0 }
 0x62b   :  { %v1060_v41 = vpop.permute.xlu1 %1059 }
 0x62c   :  { %1074 = vrot.lane.b32.xlu0 %v4829_v18, %s4312_s16  ;;  %1068 = vrot.lane.b32.xlu1 %v4829_v18, %s4310_s28  ;;  %v1063_v0 = vadd.f32 %v1060_v41, %v4668_v52  ;;  %v2539_v52 = vpop.permute.xlu0 %2538 }
 0x62e   :  { %v4844_v44 = vmax.f32 %v1063_v0, 0.0 }
 0x630   :  { %1086 = vrot.lane.b32.xlu0 %v4829_v18, %s4313_s1  ;;  %1080 = vrot.lane.b32.xlu1 %v4829_v18, %s4314_s17 }
 0x634   :  { %1098 = vrot.lane.b32.xlu0 %v4829_v18, %s4315_s18  ;;  %1092 = vrot.lane.b32.xlu1 %v4829_v18, %s4316_s19 }
 0x638   :  { %1076 = vrot.lane.b32.xlu0 %v4844_v44, %s4312_s16  ;;  %1104 = vrot.lane.b32.xlu1 %v4829_v18, %s4318_s21 }
 0x63c   :  { %1088 = vrot.lane.b32.xlu0 %v4844_v44, %s4313_s1  ;;  %1070 = vrot.lane.b32.xlu1 %v4844_v44, %s4310_s28 }
 0x640   :  { %1100 = vrot.lane.b32.xlu0 %v4844_v44, %s4315_s18  ;;  %1082 = vrot.lane.b32.xlu1 %v4844_v44, %s4314_s17 }
 0x644   :  { %1094 = vrot.lane.b32.xlu1 %v4844_v44, %s4316_s19 }
 0x648   :  { %1106 = vrot.lane.b32.xlu1 %v4844_v44, %s4318_s21 }
 0x66b   :  { %v4225_v5 = vpop.f32.mrf.mxu0 }
 0x66d   :  { %v2432_v57 = vpop.f32.mrf.mxu0 }
 0x69e   :  { %v4862_v10 = vpop.permute.xlu0 %1074  ;;  %v4864_v19 = vpop.permute.xlu1 %1068 }
 0x69f   :  { %v1110_v13 = vcombine.low %v4829_v18, %v4862_v10 }
 0x6a1   :  { %v1118_v0 = vrot.slane %v1110_v13, %v4487_v36 }
 0x6a2   :  { %v4866_v20 = vpop.permute.xlu0 %1086  ;;  %v4868_v61 = vpop.permute.xlu1 %1080 }
 0x6a3   :  { %v1126_v49 = vcombine.low %v4864_v19, %v4868_v61 }
 0x6a5   :  { %v1134_v14 = vrot.slane %v1126_v49, %v4487_v36 }
 0x6a6   :  { %v4870_v2 = vpop.permute.xlu0 %1098  ;;  %v4872_v11 = vpop.permute.xlu1 %1092 }
 0x6a7   :  { %v1142_v8 = vcombine.low %v4866_v20, %v4870_v2 }
 0x6a9   :  { %v1150_v41 = vrot.slane %v1142_v8, %v4487_v36 }
 0x6aa   :  { %v4874_v1 = vpop.permute.xlu0 %1076  ;;  %v4876_v4 = vpop.permute.xlu1 %1104 }
 0x6ab   :  { %v1247_v25 = vcombine.high %v4844_v44, %v4874_v1  ;;  %v1158_v47 = vcombine.low %v4872_v11, %v4876_v4 }
 0x6ad   :  { %v1261_v29 = vrot.slane %v1247_v25, %v4487_v36  ;;  %v1166_v39 = vrot.slane %v1158_v47, %v4487_v36  ;;  %v1246_v47 = vcombine.low %v4844_v44, %v4874_v1 }
 0x6ae   :  { %v4878_v15 = vpop.permute.xlu1 %1070  ;;  %v4880_v24 = vpop.permute.xlu0 %1088 }
 0x6b2   :  { %v4884_v32 = vpop.permute.xlu1 %1082  ;;  %v4890_v37 = vpop.permute.xlu0 %1100 }
 0x6b3   :  { %v1263_v33 = vcombine.high %v4878_v15, %v4884_v32  ;;  %v1279_v40 = vcombine.high %v4880_v24, %v4890_v37 }
 0x6b5   :  { %v1277_v31 = vrot.slane %v1263_v33, %v4487_v36  ;;  %v1293_v7 = vrot.slane %v1279_v40, %v4487_v36  ;;  %v1175_v40 = vcombine.high %v1118_v0, %v1134_v14 }
 0x6b6   :  { %v4892_v21 = vpop.permute.xlu1 %1094 }
 0x6b7   :  { %v1326_v22 = vcombine.low %v1261_v29, %v1277_v31  ;;  %v1327_v35 = vcombine.high %v1261_v29, %v1277_v31  ;;  %v1159_v29 = vcombine.high %v4872_v11, %v4876_v4  ;;  %v1207_v31 = vcombine.high %v1150_v41, %v1166_v39 }
 0x6b9   :  { %v4909_v46 = vrot.slane %v1326_v22, %v4504_v48  ;;  %v4912_v50 = vrot.slane %v1327_v35, %v4504_v48  ;;  %v1127_v35 = vcombine.high %v4864_v19, %v4868_v61  ;;  %v1189_v19 = vrot.slane %v1175_v40, %v4504_v48 }
 0x6ba   :  { %v4896_v42 = vpop.permute.xlu1 %1106 }
 0x6bb   :  { %v1295_v6 = vcombine.high %v4892_v21, %v4896_v42  ;;  %v1141_v11 = vrot.slane %v1127_v35, %v4487_v36 }
 0x6bd   :  { %v1309_v28 = vrot.slane %v1295_v6, %v4487_v36  ;;  %v1143_v6 = vcombine.high %v4866_v20, %v4870_v2 }
 0x6bf   :  { %v1358_v34 = vcombine.low %v1293_v7, %v1309_v28  ;;  %v1359_v45 = vcombine.high %v1293_v7, %v1309_v28  ;;  %v1111_v7 = vcombine.high %v4829_v18, %v4862_v10  ;;  %v1173_v28 = vrot.slane %v1159_v29, %v4487_v36 }
 0x6c0   :  { %v1157_v4 = vrot.slane %v1143_v6, %v4487_v36 }
 0x6c1   :  { %v4903_v38 = vrot.slane %v1358_v34, %v4504_v48  ;;  %v4906_v43 = vrot.slane %v1359_v45, %v4504_v48  ;;  %v1221_v45 = vrot.slane %v1207_v31, %v4504_v48  ;;  %v1125_v61 = vrot.slane %v1111_v7, %v4487_v36 }
 0x6c2   :  { %v1222_v20 = vcombine.low %v1157_v4, %v1173_v28 }
 0x6c3   :  { %v1378_v51 = vcombine.low %v4909_v46, %v4903_v38  ;;  %v1379_v26 = vcombine.high %v4909_v46, %v4903_v38  ;;  %v1380_v53 = vcombine.low %v4912_v50, %v4906_v43  ;;  %v1381_v54 = vcombine.high %v4912_v50, %v4906_v43 }
 0x6c4   :  { %v1240_v18 = vcombine.low %v1189_v19, %v1221_v45  ;;  %v1190_v10 = vcombine.low %v1125_v61, %v1141_v11 }
 0x6c5   :  { %v1424_v38 = vsel %vm629_vm5, %v1380_v53, -inf }
 0x6dd   :  { %v4220_v55 = vpop.f32.mrf.mxu1 }
 0x6de   :  { %v2438_v58 = vadd.f32 %v4225_v5, %v4220_v55  ;;  %v1388_v55 = vsel %vm629_vm5, %v1240_v18, -inf }
 0x6df   :  { %v2351_v56 = vpop.f32.mrf.mxu1 }
 0x6e0   :  { %v2433_v60 = vadd.f32 %v2432_v57, %v2351_v56  ;;  %v1241_v56 = vcombine.high %v1189_v19, %v1221_v45  ;;  %v1230_v57 = vrot.slane %v1222_v20, %v4504_v48 }
 0x6e1   :  { %v4230_v59 = vpop.f32.mrf.mxu1 }
 0x6e2   :  { %v2528_v3 = vadd.f32 %v4230_v59, %v2438_v58  ;;  %v1198_v58 = vrot.slane %v1190_v10, %v4504_v48  ;;  %v1223_v59 = vcombine.high %v1157_v4, %v1173_v28 }
 0x6e3   :  { %v2518_v9 = vpop.f32.mrf.mxu1 }
 0x6e4   :  { %v2542_v12 = vadd.f32 %v2539_v52, %v2528_v3  ;;  %v2527_v16 = vadd.f32 %v2518_v9, %v2433_v60  ;;  %v1174_v52 = vcombine.low %v1118_v0, %v1134_v14  ;;  %v1294_v60 = vcombine.low %v4892_v21, %v4896_v42 }
 0x6e5   :  { %v1391_v3 = vsel %vm629_vm5, %v1241_v56, -inf  ;;  %v1242_v9 = vcombine.low %v1198_v58, %v1230_v57  ;;  %v1243_v13 = vcombine.high %v1198_v58, %v1230_v57  ;;  %v1237_v21 = vrot.slane %v1223_v59, %v4504_v48 }
 0x6e6   :  { %v4922_v17 = vmax.f32 %v2542_v12, 0.0  ;;  %v2541_v62 = vadd.f32 %v2534_v23, %v2527_v16  ;;  %v1206_v23 = vcombine.low %v1150_v41, %v1166_v39  ;;  %v1182_v33 = vrot.slane %v1174_v52, %v4504_v48 }
 0x6e7   :  { %v1191_v12 = vcombine.high %v1125_v61, %v1141_v11  ;;  %v1278_v16 = vcombine.low %v4880_v24, %v4890_v37  ;;  %v1302_v49 = vrot.slane %v1294_v60, %v4487_v36  ;;  %v1394_v8 = vsel %vm629_vm5, %v1242_v9, -inf }
 0x6e8   :  { %2549 = vrot.lane.b32.xlu0 %v4922_v17, %s4310_s28  ;;  %2555 = vrot.lane.b32.xlu1 %v4922_v17, %s4312_s16  ;;  %v4928_v63 = vmax.f32 %v2541_v62, 0.0  ;;  %v1214_v25 = vrot.slane %v1206_v23, %v4504_v48  ;;  %v1262_v62 = vcombine.low %v4878_v15, %v4884_v32  ;;  %v1254_v37 = vrot.slane %v1246_v47, %v4487_v36 }
 0x6e9   :  { %v1286_v42 = vrot.slane %v1278_v16, %v4487_v36  ;;  %v1205_v24 = vrot.slane %v1191_v12, %v4504_v48  ;;  %v1397_v32 = vsel %vm629_vm5, %v1243_v13, -inf }
 0x6ea   :  { %v1238_v22 = vcombine.low %v1182_v33, %v1214_v25  ;;  %v1239_v34 = vcombine.high %v1182_v33, %v1214_v25  ;;  %v1270_v39 = vrot.slane %v1262_v62, %v4487_v36 }
 0x6eb   :  { %v1342_v15 = vcombine.low %v1286_v42, %v1302_v49  ;;  %v1244_v44 = vcombine.low %v1205_v24, %v1237_v21  ;;  %v1245_v41 = vcombine.high %v1205_v24, %v1237_v21  ;;  %v1343_v52 = vcombine.high %v1286_v42, %v1302_v49 }
 0x6ec   :  { %2561 = vrot.lane.b32.xlu0 %v4922_v17, %s4314_s17  ;;  %2553 = vrot.lane.b32.xlu1 %v4928_v63, %s4312_s16  ;;  %v1382_v5 = vsel %vm629_vm5, %v1238_v22, -inf  ;;  %v1385_v2 = vsel %vm629_vm5, %v1239_v34, -inf  ;;  %v1310_v1 = vcombine.low %v1254_v37, %v1270_v39  ;;  %v1311_v29 = vcombine.high %v1254_v37, %v1270_v39 }
 0x6ed   :  { %v1400_v14 = vsel %vm629_vm5, %v1244_v44, -inf  ;;  %v1350_v0 = vrot.slane %v1342_v15, %v4504_v48  ;;  %v1403_v25 = vsel %vm629_vm5, %v1245_v41, -inf  ;;  %v1357_v35 = vrot.slane %v1343_v52, %v4504_v48 }
 0x6ee   :  { %v1318_v23 = vrot.slane %v1310_v1, %v4504_v48  ;;  %v1325_v40 = vrot.slane %v1311_v29, %v4504_v48 }
 0x6f0   :  { %2547 = vrot.lane.b32.xlu0 %v4928_v63, %s4310_s28  ;;  %2565 = vrot.lane.b32.xlu1 %v4928_v63, %s4313_s1  ;;  %v1374_v33 = vcombine.low %v1318_v23, %v1350_v0  ;;  %v1375_v22 = vcombine.high %v1318_v23, %v1350_v0  ;;  %v1376_v7 = vcombine.low %v1325_v40, %v1357_v35  ;;  %s4024_s28 = sshll.u32 %s4328_s4, 4  ;;  %s4025_s28 = int_to_ptr.vmem [resolvable:$true] %s4024_s28 }
 0x6f1   :  { %v1377_v34 = vcombine.high %v1325_v40, %v1357_v35  ;;  %s4279_s29 = scalar_lea.vmem %s4025_s28, 32  ;;  %p4284_p6 = scmp.lt.s32.totalorder %s4025_s28, %s4025_s28 }
 0x6f2   :  { %v1406_v31 = vsel %vm629_vm5, %v1374_v33, -inf  ;;  %v1409_v6 = vsel %vm629_vm5, %v1375_v22, -inf  ;;  %v1412_v28 = vsel %vm629_vm5, %v1376_v7, -inf  ;;  %p4280_p5 = scmp.ne.s32.totalorder %s4025_s28, %s4279_s29  ;;  %p4285_p7 = scmp.lt.s32.totalorder %s4279_s29, %s4279_s29 }
 0x6f3   :  { %v1415_v45 = vsel %vm629_vm5, %v1377_v34, -inf }
 0x6f4   :  { %2559 = vrot.lane.b32.xlu0 %v4928_v63, %s4314_s17  ;;  %2577 = vrot.lane.b32.xlu1 %v4928_v63, %s4315_s18  ;;  %p4286_p8 = por %p4285_p7, %p4284_p6 }
 0x6f6   :  { %p4287_p9 = pnand %p4286_p8, %p4280_p5 }
 0x6f8   :  { %2571 = vrot.lane.b32.xlu0 %v4928_v63, %s4316_s19  ;;  %2567 = vrot.lane.b32.xlu1 %v4922_v17, %s4313_s1 }
 0x6fc   :  { %2573 = vrot.lane.b32.xlu0 %v4922_v17, %s4316_s19  ;;  %2579 = vrot.lane.b32.xlu1 %v4922_v17, %s4315_s18 }
 0x700   :  { %2583 = vrot.lane.b32.xlu0 %v4928_v63, %s4318_s21 }
 0x704   :  { %2585 = vrot.lane.b32.xlu0 %v4922_v17, %s4318_s21 }
 0x720   :  { %1383 = vmax.xlane.f32.xlu1 %v1382_v5 }
 0x723   :  { %1386 = vmax.xlane.f32.xlu0 %v1385_v2 }
 0x727   :  { %1389 = vmax.xlane.f32.xlu0 %v1388_v55 }
 0x72b   :  { %1392 = vmax.xlane.f32.xlu0 %v1391_v3 }
 0x72f   :  { %1395 = vmax.xlane.f32.xlu0 %v1394_v8 }
 0x733   :  { %1398 = vmax.xlane.f32.xlu0 %v1397_v32 }
 0x737   :  { %1401 = vmax.xlane.f32.xlu0 %v1400_v14 }
 0x73b   :  { %1404 = vmax.xlane.f32.xlu0 %v1403_v25 }
 0x73f   :  { %1407 = vmax.xlane.f32.xlu0 %v1406_v31 }
 0x743   :  { %1410 = vmax.xlane.f32.xlu0 %v1409_v6 }
 0x747   :  { %1413 = vmax.xlane.f32.xlu0 %v1412_v28  ;;  %v1418_v28 = vsel %vm629_vm5, %v1378_v51, -inf  ;;  %v1421_v51 = vsel %vm629_vm5, %v1379_v26, -inf }
 0x74b   :  { %1416 = vmax.xlane.f32.xlu0 %v1415_v45 }
 0x75a   :  { %v2550_v5 = vpop.permute.xlu0 %2549  ;;  %v2556_v11 = vpop.permute.xlu1 %2555 }
 0x75b   :  { %v2725_v47 = vcombine.low %v4922_v17, %v2556_v11  ;;  %v2726_v7 = vcombine.high %v4922_v17, %v2556_v11 }
 0x75d   :  { %v2733_v37 = vrot.slane %v2725_v47, %v4487_v36  ;;  %v1427_v47 = vsel %vm629_vm5, %v1381_v54, -inf }
 0x75e   :  { %v2562_v4 = vpop.permute.xlu0 %2561  ;;  %v5014_v19 = vpop.permute.xlu1 %2553 }
 0x75f   :  { %v2589_v58 = vcombine.low %v4928_v63, %v5014_v19  ;;  %v2741_v3 = vcombine.low %v2550_v5, %v2562_v4  ;;  %v2742_v22 = vcombine.high %v2550_v5, %v2562_v4  ;;  %v5090_v4 = vrot.slane %v2726_v7, %v4487_v36 }
 0x761   :  { %v5038_v12 = vrot.slane %v2589_v58, %v4487_v36  ;;  %v2749_v21 = vrot.slane %v2741_v3, %v4487_v36  ;;  %v5079_v5 = vrot.slane %v2742_v22, %v4487_v36 }
 0x762   :  { %v5016_v61 = vpop.permute.xlu0 %2547  ;;  %v5018_v20 = vpop.permute.xlu1 %2565 }
 0x763   :  { %v2789_v1 = vcombine.low %v2733_v37, %v2749_v21  ;;  %v2790_v35 = vcombine.high %v2733_v37, %v2749_v21  ;;  %v2805_v3 = vcombine.low %v5090_v4, %v5079_v5  ;;  %v2590_v37 = vcombine.high %v4928_v63, %v5014_v19 }
 0x765   :  { %v2797_v29 = vrot.slane %v2789_v1, %v4504_v48  ;;  %v2804_v11 = vrot.slane %v2790_v35, %v4504_v48  ;;  %v2806_v35 = vcombine.high %v5090_v4, %v5079_v5  ;;  %v3067_v5 = vld [vmem:[%s5740_s5 + $0x1e0] sm:$0xff]  ;;  %v3065_v4 = vld [vmem:[%s5740_s5 + $0x1d0] sm:$0xff] }
 0x766   :  { %v5020_v2 = vpop.permute.xlu0 %2559  ;;  %v5022_v18 = vpop.permute.xlu1 %2577 }
 0x767   :  { %v2605_v55 = vcombine.low %v5016_v61, %v5020_v2  ;;  %v2621_v60 = vcombine.low %v5018_v20, %v5022_v18  ;;  %v2606_v43 = vcombine.high %v5016_v61, %v5020_v2  ;;  %v2622_v54 = vcombine.high %v5018_v20, %v5022_v18 }
 0x768   :  { %v2604_v20 = vrot.slane %v2590_v37, %v4487_v36  ;;  %v3044_v37 = vld [vmem:[%s5740_s5 + $0x128] sm:$0xff] }
 0x769   :  { %v5031_v59 = vrot.slane %v2605_v55, %v4487_v36  ;;  %v5046_v8 = vrot.slane %v2621_v60, %v4487_v36  ;;  %v2620_v61 = vrot.slane %v2606_v43, %v4487_v36  ;;  %v2636_v2 = vrot.slane %v2622_v54, %v4487_v36  ;;  %v3050_v43 = vld [vmem:[%s5740_s5 + $0x158] sm:$0xff]  ;;  %v3049_v54 = vld [vmem:[%s5740_s5 + $0x150] sm:$0xff] }
 0x76a   :  { %v5024_v10 = vpop.permute.xlu0 %2571  ;;  %v2568_v56 = vpop.permute.xlu1 %2567 }
 0x76b   :  { %v2653_v49 = vcombine.low %v5038_v12, %v5031_v59  ;;  %v2654_v50 = vcombine.high %v5038_v12, %v5031_v59  ;;  %v2669_v12 = vcombine.low %v2604_v20, %v2620_v61 }
 0x76d   :  { %v5056_v32 = vrot.slane %v2653_v49, %v4504_v48  ;;  %v2668_v59 = vrot.slane %v2654_v50, %v4504_v48  ;;  %v2677_v1 = vrot.slane %v2669_v12, %v4504_v48  ;;  %v3047_v50 = vld [vmem:[%s5740_s5 + $0x140] sm:$0xff]  ;;  %v3032_v12 = vld [vmem:[%s5740_s5 + $0xc8] sm:$0xff] }
 0x76e   :  { %v2574_v57 = vpop.permute.xlu0 %2573  ;;  %v2580_v16 = vpop.permute.xlu1 %2579 }
 0x76f   :  { %v2757_v42 = vcombine.low %v2568_v56, %v2580_v16  ;;  %v2758_v40 = vcombine.high %v2568_v56, %v2580_v16 }
 0x771   :  { %v2765_v14 = vrot.slane %v2757_v42, %v4487_v36  ;;  %v5082_v17 = vrot.slane %v2758_v40, %v4487_v36 }
 0x772   :  { %v5035_v9 = vpop.permute.xlu0 %2583 }
 0x773   :  { %v2637_v62 = vcombine.low %v5024_v10, %v5035_v9  ;;  %v2638_v53 = vcombine.high %v5024_v10, %v5035_v9 }
 0x775   :  { %v5049_v13 = vrot.slane %v2637_v62, %v4487_v36  ;;  %v2813_v62 = vrot.slane %v2805_v3, %v4504_v48  ;;  %v2652_v10 = vrot.slane %v2638_v53, %v4487_v36 }
 0x776   :  { %v2586_v39 = vpop.permute.xlu0 %2585 }
 0x777   :  { %v2685_v24 = vcombine.low %v5046_v8, %v5049_v13  ;;  %v2773_v15 = vcombine.low %v2574_v57, %v2586_v39  ;;  %v2774_v25 = vcombine.high %v2574_v57, %v2586_v39  ;;  %v2686_v42 = vcombine.high %v5046_v8, %v5049_v13 }
 0x778   :  { %v2701_v18 = vcombine.low %v2636_v2, %v2652_v10 }
 0x779   :  { %v5059_v44 = vrot.slane %v2685_v24, %v4504_v48  ;;  %v2781_v41 = vrot.slane %v2773_v15, %v4487_v36  ;;  %v5074_v34 = vrot.slane %v2774_v25, %v4487_v36  ;;  %v2700_v13 = vrot.slane %v2686_v42, %v4504_v48  ;;  %v3051_v42 = vld [vmem:[%s5740_s5 + $0x160] sm:$0xff] }
 0x77a   :  { %v2670_v36 = vcombine.high %v2604_v20, %v2620_v61  ;;  %v3042_v61 = vld [vmem:[%s5740_s5 + $0x118] sm:$0xff]  ;;  %v3036_v20 = vld [vmem:[%s5740_s5 + $0xe8] sm:$0xff] }
 0x77b   :  { %v2717_v0 = vcombine.low %v5056_v32, %v5059_v44  ;;  %v2821_v23 = vcombine.low %v2765_v14, %v2781_v41  ;;  %v2822_v33 = vcombine.high %v2765_v14, %v2781_v41  ;;  %v2837_v56 = vcombine.low %v5082_v17, %v5074_v34 }
 0x77c   :  { %v2718_v8 = vcombine.high %v5056_v32, %v5059_v44  ;;  %v2719_v19 = vcombine.low %v2668_v59, %v2700_v13  ;;  %v2720_v32 = vcombine.high %v2668_v59, %v2700_v13  ;;  %v2709_v44 = vrot.slane %v2701_v18, %v4504_v48  ;;  %v3040_v13 = vld [vmem:[%s5740_s5 + $0x108] sm:$0xff]  ;;  %v3041_v59 = vld [vmem:[%s5740_s5 + $0x110] sm:$0xff]  ;;  %v3038_v18 = vld [vmem:[%s5740_s5 + $0xf8] sm:$0xff] }
 0x77d   :  { %v2861_v52 = vsel %vm629_vm5, %v2717_v0, -inf  ;;  %v2829_v31 = vrot.slane %v2821_v23, %v4504_v48  ;;  %v2836_v57 = vrot.slane %v2822_v33, %v4504_v48  ;;  %v2845_v16 = vrot.slane %v2837_v56, %v4504_v48  ;;  %v3060_v56 = vld [vmem:[%s5740_s5 + $0x1a8] sm:$0xff] }
 0x77e   :  { %2862 = vmax.xlane.f32.xlu0 %v2861_v52  ;;  %v2864_v63 = vsel %vm629_vm5, %v2718_v8, -inf  ;;  %v2867_v15 = vsel %vm629_vm5, %v2719_v19, -inf  ;;  %v2702_v14 = vcombine.high %v2636_v2, %v2652_v10  ;;  %v2870_v41 = vsel %vm629_vm5, %v2720_v32, -inf  ;;  %v3046_v10 = vld [vmem:[%s5740_s5 + $0x138] sm:$0xff]  ;;  %v3045_v8 = vld [vmem:[%s5740_s5 + $0x130] sm:$0xff]  ;;  %v3039_v2 = vld [vmem:[%s5740_s5 + $0x100] sm:$0xff] }
 0x77f   :  { %v2853_v6 = vcombine.low %v2797_v29, %v2829_v31  ;;  %v2854_v55 = vcombine.high %v2797_v29, %v2829_v31  ;;  %v2855_v60 = vcombine.low %v2804_v11, %v2836_v57  ;;  %v2856_v26 = vcombine.high %v2804_v11, %v2836_v57  ;;  %v3064_v11 = vld [vmem:[%s5740_s5 + $0x1c8] sm:$0xff]  ;;  %v3037_v19 = vld [vmem:[%s5740_s5 + $0xf0] sm:$0xff]  ;;  %v3031_v32 = vld [vmem:[%s5740_s5 + $0xc0] sm:$0xff] }
 0x780   :  { %v2857_v21 = vcombine.low %v2813_v62, %v2845_v16  ;;  %v2858_v24 = vcombine.high %v2813_v62, %v2845_v16  ;;  %v2721_v0 = vcombine.low %v2677_v1, %v2709_v44  ;;  %v2722_v52 = vcombine.high %v2677_v1, %v2709_v44  ;;  %v3058_v16 = vld [vmem:[%s5740_s5 + $0x198] sm:$0xff]  ;;  %v3055_v62 = vld [vmem:[%s5740_s5 + $0x180] sm:$0xff]  ;;  %v3033_v1 = vld [vmem:[%s5740_s5 + $0xd0] sm:$0xff] }
 0x781   :  { %v2885_v45 = vsel %vm629_vm5, %v2853_v6, -inf  ;;  %v2888_v58 = vsel %vm629_vm5, %v2854_v55, -inf  ;;  %v2891_v46 = vsel %vm629_vm5, %v2855_v60, -inf  ;;  %v2894_v49 = vsel %vm629_vm5, %v2856_v26, -inf  ;;  %v3056_v26 = vld [vmem:[%s5740_s5 + $0x188] sm:$0xff] }
 0x782   :  { %1419 = vmax.xlane.f32.xlu0 %v1418_v28  ;;  %2886 = vmax.xlane.f32.xlu1 %v2885_v45  ;;  %v2897_v39 = vsel %vm629_vm5, %v2857_v21, -inf  ;;  %v2900_v9 = vsel %vm629_vm5, %v2858_v24, -inf  ;;  %v2873_v23 = vsel %vm629_vm5, %v2721_v0, -inf  ;;  %v2716_v25 = vrot.slane %v2702_v14, %v4504_v48  ;;  %v3068_v28 = vld [vmem:[%s5740_s5 + $0x1e8] sm:$0xff]  ;;  %v3054_v21 = vld [vmem:[%s5740_s5 + $0x178] sm:$0xff]  ;;  %v3027_v0 = vld [vmem:[%s5740_s5 + $0xa0] sm:$0xff] }
 0x783   :  { %v2684_v33 = vrot.slane %v2670_v36, %v4504_v48  ;;  %v2838_v29 = vcombine.high %v5082_v17, %v5074_v34  ;;  %v2876_v31 = vsel %vm629_vm5, %v2722_v52, -inf  ;;  %v3070_v34 = vld [vmem:[%s5740_s5 + $0x1f8] sm:$0xff]  ;;  %v2820_v45 = vrot.slane %v2806_v35, %v4504_v48  ;;  %3093 = vmatprep.subr.mxu0 %v3068_v28  ;;  %v3069_v17 = vld [vmem:[%s5740_s5 + $0x1f0] sm:$0xff]  ;;  %v3048_v24 = vld [vmem:[%s5740_s5 + $0x148] sm:$0xff] }
 0x784   :  { %3164 = vmatprep.subr.mxu1 %v3070_v34  ;;  %3094 = vmatpush1.msra.mxu0 %v3067_v5  ;;  %v3028_v14 = vld [vmem:[%s5740_s5 + $0xa8] sm:$0xff]  ;;  %v3029_v36 = vld [vmem:[%s5740_s5 + $0xb0] sm:$0xff]  ;;  %v3026_v52 = vld [vmem:[%s5740_s5 + $0x98] sm:$0xff] }
 0x785   :  { %v2723_v22 = vcombine.low %v2684_v33, %v2716_v25  ;;  %v2724_v6 = vcombine.high %v2684_v33, %v2716_v25  ;;  %v2852_v7 = vrot.slane %v2838_v29, %v4504_v48  ;;  %3165 = vmatpush1.msra.mxu1 %v3069_v17  ;;  %v3066_v48 = vld [vmem:[%s5740_s5 + $0x1d8] sm:$0xff]  ;;  %3095 = vmatprep.subr.mxu0 %v3064_v11  ;;  %v3023_v25 = vld [vmem:[%s5740_s5 + $0x80] sm:$0xff]  ;;  %v3025_v33 = vld [vmem:[%s5740_s5 + $0x90] sm:$0xff] }
 0x786   :  { %1422 = vmax.xlane.f32.xlu0 %v1421_v51  ;;  %2889 = vmax.xlane.f32.xlu1 %v2888_v58  ;;  %v3063_v51 = vld [vmem:[%s5740_s5 + $0x1c0] sm:$0xff]  ;;  %v3062_v58 = vld [vmem:[%s5740_s5 + $0x1b8] sm:$0xff]  ;;  %v3020_v29 = vld [vmem:[%s5740_s5 + $0x68] sm:$0xff] }
 0x787   :  { %v2879_v40 = vsel %vm629_vm5, %v2723_v22, -inf  ;;  %v2882_v55 = vsel %vm629_vm5, %v2724_v6, -inf  ;;  %v2859_v57 = vcombine.low %v2820_v45, %v2852_v7  ;;  %3166 = vmatprep.subr.mxu1 %v3066_v48  ;;  %v2860_v3 = vcombine.high %v2820_v45, %v2852_v7  ;;  %3096 = vmatpush1.msra.mxu0 %v3063_v51  ;;  %v3019_v22 = vld [vmem:[%s5740_s5 + $0x60] sm:$0xff]  ;;  %v3021_v35 = vld [vmem:[%s5740_s5 + $0x70] sm:$0xff]  ;;  %v3018_v6 = vld [vmem:[%s5740_s5 + $0x58] sm:$0xff] }
 0x788   :  { %3167 = vmatpush1.msra.mxu1 %v3065_v4  ;;  %3097 = vmatprep.subr.mxu0 %v3060_v56  ;;  %v3015_v28 = vld [vmem:[%s5740_s5 + $0x40] sm:$0xff]  ;;  %v3017_v34 = vld [vmem:[%s5740_s5 + $0x50] sm:$0xff]  ;;  %v3012_v45 = vld [vmem:[%s5740_s5 + $0x28] sm:$0xff] }
 0x789   :  { %v2903_v60 = vsel %vm629_vm5, %v2859_v57, -inf  ;;  %3168 = vmatprep.subr.mxu1 %v3062_v58  ;;  %v2906_v53 = vsel %vm629_vm5, %v2860_v3, -inf  ;;  %v3011_v57 = vld [vmem:[%s5740_s5 + $0x20] sm:$0xff]  ;;  %v3013_v5 = vld [vmem:[%s5740_s5 + $0x30] sm:$0xff]  ;;  %v3008_v17 = vld [vmem:[%s5740_s5 + $0x8] sm:$0xff]  ;;  %vm1483_vm5 = vcmask 392512  }
 0x78a   :  { %1425 = vmax.xlane.f32.xlu0 %v1424_v38  ;;  %2892 = vmax.xlane.f32.xlu1 %v2891_v46  ;;  %v3059_v38 = vld [vmem:[%s5740_s5 + $0x1a0] sm:$0xff]  ;;  %v3061_v46 = vld [vmem:[%s5740_s5 + $0x1b0] sm:$0xff]  ;;  %v3010_v11 = vld [vmem:[%s5740_s5 + $0x18] sm:$0xff] }
 0x78b   :  { %3098 = vmatpush1.msra.mxu0 %v3059_v38  ;;  %3169 = vmatpush1.msra.mxu1 %v3061_v46  ;;  %v3007_v48 = vld [vmem:[%s5740_s5] sm:$0xff]  ;;  %v3009_v51 = vld [vmem:[%s5740_s5 + $0x10] sm:$0xff] }
 0x78c   :  { %3099 = vmatprep.subr.mxu0 %v3056_v26  ;;  %3170 = vmatprep.subr.mxu1 %v3058_v16  ;;  %v3300_v4 = vld [vmem:[#allocation5 + $0x1e8] sm:$0xff] }
 0x78d   :  { %3100 = vmatpush1.msra.mxu0 %v3055_v62  ;;  %v3428_v56 = vld [vmem:[#allocation5 + $0x5e8] sm:$0xff] }
 0x78e   :  { %1428 = vmax.xlane.f32.xlu0 %v1427_v47  ;;  %2895 = vmax.xlane.f32.xlu1 %v2894_v49  ;;  %v3057_v47 = vld [vmem:[%s5740_s5 + $0x190] sm:$0xff]  ;;  %v3052_v49 = vld [vmem:[%s5740_s5 + $0x168] sm:$0xff] }
 0x78f   :  { %3171 = vmatpush1.msra.mxu1 %v3057_v47  ;;  %3101 = vmatprep.subr.mxu0 %v3052_v49  ;;  %v1450_v47 = vadd.s32 4294967288, %v4564_v27  ;;  %v1457_v49 = vadd.s32 4294967280, %v4564_v27 }
 0x790   :  { %3172 = vmatprep.subr.mxu1 %v3054_v21  ;;  %3102 = vmatpush1.msra.mxu0 %v3051_v42  ;;  %v1464_v21 = vadd.s32 4294967272, %v4564_v27 }
 0x791   :  { %3103 = vmatprep.subr.mxu0 %v3048_v24  ;;  %v1478_v24 = vadd.s32 4294967256, %v4564_v27 }
 0x792   :  { %2898 = vmax.xlane.f32.xlu1 %v2897_v39  ;;  %v3053_v39 = vld [vmem:[%s5740_s5 + $0x170] sm:$0xff]  ;;  %3104 = vmatpush1.msra.mxu0 %v3047_v50  ;;  %v1485_v50 = vadd.s32 4294967248, %v4564_v27 }
 0x793   :  { %3173 = vmatpush1.msra.mxu1 %v3053_v39  ;;  %3105 = vmatprep.subr.mxu0 %v3044_v37  ;;  %v5363_v39 = vsub.s32 %v1450_v47, %v4480_v30  ;;  %v5375_v37 = vsub.s32 %v1464_v21, %v4480_v30 }
 0x794   :  { %3174 = vmatprep.subr.mxu1 %v3050_v43  ;;  %v5367_v43 = vsub.s32 %v1457_v49, %v4480_v30 }
 0x795   :  { %3175 = vmatpush1.msra.mxu1 %v3049_v54  ;;  %v5372_v54 = vsub.s32 %v4564_v27, %v4480_v30 }
 0x796   :  { %2901 = vmax.xlane.f32.xlu1 %v2900_v9  ;;  %3176 = vmatprep.subr.mxu1 %v3046_v10  ;;  %v3043_v9 = vld [vmem:[%s5740_s5 + $0x120] sm:$0xff]  ;;  %v1492_v10 = vadd.s32 4294967240, %v4564_v27 }
 0x797   :  { %3106 = vmatpush1.msra.mxu0 %v3043_v9  ;;  %3177 = vmatpush1.msra.mxu1 %v3045_v8 }
 0x798   :  { %3107 = vmatprep.subr.mxu0 %v3040_v13  ;;  %3178 = vmatprep.subr.mxu1 %v3042_v61  ;;  %v1499_v13 = vadd.s32 4294967232, %v4564_v27 }
 0x799   :  { %3108 = vmatpush1.msra.mxu0 %v3039_v2  ;;  %3179 = vmatpush1.msra.mxu1 %v3041_v59  ;;  %v5387_v59 = vsub.s32 %v1478_v24, %v4480_v30 }
 0x79a   :  { %2865 = vmax.xlane.f32.xlu1 %v2864_v63  ;;  %3109 = vmatprep.subr.mxu0 %v3036_v20  ;;  %v3035_v63 = vld [vmem:[%s5740_s5 + $0xe0] sm:$0xff]  ;;  %v1506_v20 = vadd.s32 4294967224, %v4564_v27 }
 0x79b   :  { %3180 = vmatprep.subr.mxu1 %v3038_v18  ;;  %3110 = vmatpush1.msra.mxu0 %v3035_v63  ;;  %v5393_v63 = vsub.s32 %v1485_v50, %v4480_v30 }
 0x79c   :  { %3181 = vmatpush1.msra.mxu1 %v3037_v19  ;;  %3111 = vmatprep.subr.mxu0 %v3032_v12  ;;  %v1513_v19 = vadd.s32 4294967216, %v4564_v27 }
 0x79d   :  { %3112 = vmatpush1.msra.mxu0 %v3031_v32  ;;  %v5399_v32 = vsub.s32 %v1492_v10, %v4480_v30 }
 0x79e   :  { %2868 = vmax.xlane.f32.xlu1 %v2867_v15  ;;  %v3034_v15 = vld [vmem:[%s5740_s5 + $0xd8] sm:$0xff]  ;;  %3113 = vmatprep.subr.mxu0 %v3028_v14  ;;  %v5404_v14 = vsub.s32 %v1499_v13, %v4480_v30 }
 0x79f   :  { %3182 = vmatprep.subr.mxu1 %v3034_v15  ;;  %3114 = vmatpush1.msra.mxu0 %v3027_v0 }
 0x7a0   :  { %3183 = vmatpush1.msra.mxu1 %v3033_v1 }
 0x7a2   :  { %2871 = vmax.xlane.f32.xlu1 %v2870_v41  ;;  %v3030_v41 = vld [vmem:[%s5740_s5 + $0xb8] sm:$0xff] }
 0x7a3   :  { %3184 = vmatprep.subr.mxu1 %v3030_v41  ;;  %v1527_v41 = vadd.s32 4294967200, %v4564_v27 }
 0x7a4   :  { %3185 = vmatpush1.msra.mxu1 %v3029_v36 }
 0x7a5   :  { %3186 = vmatprep.subr.mxu1 %v3026_v52  ;;  %v5410_v52 = vsub.s32 %v1506_v20, %v4480_v30 }
 0x7a6   :  { %2874 = vmax.xlane.f32.xlu1 %v2873_v23  ;;  %v3024_v23 = vld [vmem:[%s5740_s5 + $0x88] sm:$0xff]  ;;  %3187 = vmatpush1.msra.mxu1 %v3025_v33  ;;  %v1534_v33 = vadd.s32 4294967192, %v4564_v27 }
 0x7a7   :  { %3115 = vmatprep.subr.mxu0 %v3024_v23 }
 0x7a8   :  { %3116 = vmatpush1.msra.mxu0 %v3023_v25 }
 0x7a9   :  { %3117 = vmatprep.subr.mxu0 %v3020_v29  ;;  %v1384_v9 = vpop.xlane.xlu1 %1383 }
 0x7aa   :  { %2877 = vmax.xlane.f32.xlu1 %v2876_v31  ;;  %v3022_v31 = vld [vmem:[%s5740_s5 + $0x78] sm:$0xff]  ;;  %3118 = vmatpush1.msra.mxu0 %v3019_v22  ;;  %v1449_v12 = vrot.slane %v1384_v9, %v5372_v54  ;;  %v5419_v22 = vsub.s32 %v1513_v19, %v4480_v30 }
 0x7ab   :  { %3188 = vmatprep.subr.mxu1 %v3022_v31 }
 0x7ac   :  { %v5267_v44 = vpop.xlane.xlu0 %1386  ;;  %3189 = vmatpush1.msra.mxu1 %v3021_v35  ;;  %v1541_v35 = vadd.s32 4294967184, %v4564_v27 }
 0x7ad   :  { %3190 = vmatprep.subr.mxu1 %v3018_v6  ;;  %v1454_v2 = vrot.slane %v5267_v44, %v5363_v39  ;;  %v1520_v44 = vadd.s32 4294967208, %v4564_v27 }
 0x7ae   :  { %2880 = vmax.xlane.f32.xlu1 %v2879_v40  ;;  %v3016_v40 = vld [vmem:[%s5740_s5 + $0x48] sm:$0xff]  ;;  %3191 = vmatpush1.msra.mxu1 %v3017_v34 }
 0x7af   :  { %3119 = vmatprep.subr.mxu0 %v3016_v40  ;;  %v1456_v36 = vsel %vm1455_vm1, %v1454_v2, %v1449_v12 }
 0x7b0   :  { %v5314_v7 = vpop.xlane.xlu0 %1389  ;;  %3120 = vmatpush1.msra.mxu0 %v3015_v28 }
 0x7b1   :  { %3121 = vmatprep.subr.mxu0 %v3012_v45  ;;  %v1461_v18 = vrot.slane %v5314_v7, %v5367_v43  ;;  %v5426_v7 = vsub.s32 %v1520_v44, %v4480_v30  ;;  %v5432_v45 = vsub.s32 %v1527_v41, %v4480_v30 }
 0x7b2   :  { %2883 = vmax.xlane.f32.xlu1 %v2882_v55  ;;  %v3014_v55 = vld [vmem:[%s5740_s5 + $0x38] sm:$0xff]  ;;  %3122 = vmatpush1.msra.mxu0 %v3011_v57 }
 0x7b3   :  { %3192 = vmatprep.subr.mxu1 %v3014_v55  ;;  %3123 = vmatprep.subr.mxu0 %v3008_v17  ;;  %v1463_v29 = vsel %vm1462_vm2, %v1461_v18, %v1456_v36  ;;  %v5438_v17 = vsub.s32 %v1534_v33, %v4480_v30 }
 0x7b4   :  { %3193 = vmatpush1.msra.mxu1 %v3013_v5  ;;  %v1393_v58 = vpop.xlane.xlu0 %1392  ;;  %3124 = vmatpush1.msra.mxu0 %v3007_v48  ;;  %v1548_v48 = vadd.s32 4294967176, %v4564_v27 }
 0x7b5   :  { %3194 = vmatprep.subr.mxu1 %v3010_v11  ;;  %3517 = vmatprep.subr.mxu0 %v3300_v4  ;;  %v1468_v15 = vrot.slane %v1393_v58, %v5375_v37 }
 0x7b6   :  { %2904 = vmax.xlane.f32.xlu1 %v2903_v60  ;;  %3195 = vmatpush1.msra.mxu1 %v3009_v51 }
 0x7b7   :  { %3588 = vmatprep.subr.mxu1 %v3428_v56  ;;  %v1470_v40 = vsel %vm1469_vm3, %v1468_v15, %v1463_v29  ;;  %v5447_v56 = vsub.s32 %v1541_v35, %v4480_v30 }
 0x7b8   :  { %v1396_v60 = vpop.xlane.xlu0 %1395 }
 0x7ba   :  { %2907 = vmax.xlane.f32.xlu1 %v2906_v53  ;;  %v1471_v53 = vadd.s32 4294967264, %v4564_v27 }
 0x7bc   :  { %v1399_v3 = vpop.xlane.xlu0 %1398  ;;  %v5379_v8 = vsub.s32 %v1471_v53, %v4480_v30 }
 0x7bd   :  { %v1482_v23 = vrot.slane %v1399_v3, %v5387_v59 }
 0x7be   :  { %v1475_v1 = vrot.slane %v1396_v60, %v5379_v8 }
 0x7c0   :  { %v5346_v38 = vpop.xlane.xlu0 %1401  ;;  %v1477_v28 = vsel %vm1476_vm4, %v1475_v1, %v1470_v40 }
 0x7c1   :  { %v1489_v31 = vrot.slane %v5346_v38, %v5393_v63  ;;  %v1484_v57 = vsel %vm1483_vm5, %v1482_v23, %v1477_v28 }
 0x7c3   :  { %v1491_v51 = vsel %vm1490_vm6, %v1489_v31, %v1484_v57 }
 0x7c4   :  { %v5348_v46 = vpop.xlane.xlu0 %1404 }
 0x7c5   :  { %v1496_v6 = vrot.slane %v5348_v46, %v5399_v32 }
 0x7c7   :  { %v1498_v58 = vsel %vm1497_vm7, %v1496_v6, %v1491_v51 }
 0x7c8   :  { %v5350_v26 = vpop.xlane.xlu0 %1407 }
 0x7c9   :  { %v1503_v34 = vrot.slane %v5350_v26, %v5404_v14 }
 0x7cb   :  { %v1505_v3 = vsel %vm1504_vm8, %v1503_v34, %v1498_v58 }
 0x7cc   :  { %v5352_v16 = vpop.xlane.xlu0 %1410 }
 0x7cd   :  { %v1510_v5 = vrot.slane %v5352_v16, %v5410_v52 }
 0x7cf   :  { %v1512_v46 = vsel %vm1511_vm9, %v1510_v5, %v1505_v3 }
 0x7d0   :  { %v5354_v62 = vpop.xlane.xlu0 %1413 }
 0x7d1   :  { %v1517_v4 = vrot.slane %v5354_v62, %v5419_v22  ;;  %v1551_v62 = vsub.s32 %v1548_v48, %v4480_v30 }
 0x7d3   :  { %v1519_v47 = vsel %vm1518_vm10, %v1517_v4, %v1512_v46  ;;  %v3423_v46 = vld [vmem:[#allocation5 + $0x5c0] sm:$0xff] }
 0x7d4   :  { %v5360_v42 = vpop.xlane.xlu0 %1416 }
 0x7d5   :  { %v1524_v60 = vrot.slane %v5360_v42, %v5426_v7 }
 0x7d7   :  { %v1526_v21 = vsel %vm1525_vm11, %v1524_v60, %v1519_v47  ;;  %v3427_v60 = vld [vmem:[#allocation5 + $0x5e0] sm:$0xff]  ;;  %v3288_v47 = vld [vmem:[#allocation5 + $0x188] sm:$0xff] }
 0x807   :  { %v5382_v61 = vpop.xlane.xlu0 %2862 }
 0x80b   :  { %v1420_v0 = vpop.xlane.xlu0 %1419  ;;  %v5412_v25 = vpop.xlane.xlu1 %2886 }
 0x80c   :  { %v1531_v27 = vrot.slane %v1420_v0, %v5432_v45  ;;  %v2928_v0 = vrot.slane %v5382_v61, %v5372_v54 }
 0x80e   :  { %v1533_v53 = vsel %vm1532_vm12, %v1531_v27, %v1526_v21  ;;  %v3296_v27 = vld [vmem:[#allocation5 + $0x1c8] sm:$0xff]  ;;  %v3287_v21 = vld [vmem:[#allocation5 + $0x180] sm:$0xff] }
 0x80f   :  { %v1423_v55 = vpop.xlane.xlu0 %1422  ;;  %v5440_v11 = vpop.xlane.xlu1 %2889 }
 0x810   :  { %v1538_v26 = vrot.slane %v1423_v55, %v5438_v17 }
 0x812   :  { %v1540_v24 = vsel %vm1539_vm13, %v1538_v26, %v1533_v53  ;;  %v3420_v26 = vld [vmem:[#allocation5 + $0x5a8] sm:$0xff]  ;;  %v3415_v53 = vld [vmem:[#allocation5 + $0x580] sm:$0xff] }
 0x813   :  { %v1426_v38 = vpop.xlane.xlu0 %1425  ;;  %v2893_v16 = vpop.xlane.xlu1 %2892 }
 0x814   :  { %v1545_v49 = vrot.slane %v1426_v38, %v5447_v56  ;;  %v3295_v38 = vld [vmem:[#allocation5 + $0x1c0] sm:$0xff] }
 0x816   :  { %v1547_v9 = vsel %vm1546_vm14, %v1545_v49, %v1540_v24  ;;  %v3416_v49 = vld [vmem:[#allocation5 + $0x588] sm:$0xff] }
 0x817   :  { %v1429_v42 = vpop.xlane.xlu0 %1428  ;;  %v2896_v10 = vpop.xlane.xlu1 %2895  ;;  %v3412_v24 = vld [vmem:[#allocation5 + $0x568] sm:$0xff] }
 0x818   :  { %v1552_v50 = vrot.slane %v1429_v42, %v1551_v62  ;;  %v2982_v57 = vrot.slane %v2896_v10, %v5426_v7  ;;  %v3284_v42 = vld [vmem:[#allocation5 + $0x168] sm:$0xff]  ;;  %v3411_v10 = vld [vmem:[#allocation5 + $0x560] sm:$0xff] }
 0x81a   :  { %v1554_v13 = vsel %vm1553_vm15, %v1552_v50, %v1547_v9  ;;  %v3283_v50 = vld [vmem:[#allocation5 + $0x160] sm:$0xff]  ;;  %v3280_v9 = vld [vmem:[#allocation5 + $0x148] sm:$0xff] }
 0x81b   :  { %1556 = vst [vmem:[#allocation4] sm:$0x1] %v1554_v13  ;;  %v2899_v2 = vpop.xlane.xlu1 %2898  ;;  %v3408_v13 = vld [vmem:[#allocation5 + $0x548] sm:$0xff] }
 0x81f   :  { %v2902_v20 = vpop.xlane.xlu1 %2901 }
 0x823   :  { %v2866_v18 = vpop.xlane.xlu1 %2865 }
 0x824   :  { %v2932_v1 = vrot.slane %v2866_v18, %v5363_v39  ;;  %v3276_v18 = vld [vmem:[#allocation5 + $0x128] sm:$0xff] }
 0x826   :  { %v2933_v29 = vsel %vm1455_vm1, %v2932_v1, %v2928_v0  ;;  %v3400_v1 = vld [vmem:[#allocation5 + $0x508] sm:$0xff]  ;;  %v3399_v0 = vld [vmem:[#allocation5 + $0x500] sm:$0xff] }
 0x827   :  { %v2869_v19 = vpop.xlane.xlu1 %2868 }
 0x828   :  { %v2937_v41 = vrot.slane %v2869_v19, %v5367_v43  ;;  %v3404_v19 = vld [vmem:[#allocation5 + $0x528] sm:$0xff] }
 0x82a   :  { %v2938_v35 = vsel %vm1462_vm2, %v2937_v41, %v2933_v29  ;;  %v3271_v41 = vld [vmem:[#allocation5 + $0x100] sm:$0xff] }
 0x82b   :  { %v2872_v12 = vpop.xlane.xlu1 %2871  ;;  %v3395_v29 = vld [vmem:[#allocation5 + $0x4e0] sm:$0xff] }
 0x82c   :  { %v2942_v36 = vrot.slane %v2872_v12, %v5375_v37  ;;  %v3275_v12 = vld [vmem:[#allocation5 + $0x120] sm:$0xff] }
 0x82e   :  { %v2943_v39 = vsel %vm1469_vm3, %v2942_v36, %v2938_v35  ;;  %v3268_v36 = vld [vmem:[#allocation5 + $0xe8] sm:$0xff] }
 0x82f   :  { %v2875_v15 = vpop.xlane.xlu1 %2874  ;;  %v3392_v35 = vld [vmem:[#allocation5 + $0x4c8] sm:$0xff] }
 0x830   :  { %v2947_v23 = vrot.slane %v2875_v15, %v5379_v8  ;;  %v2967_v8 = vrot.slane %v5412_v25, %v5404_v14  ;;  %v2992_v25 = vrot.slane %v2902_v20, %v5438_v17  ;;  %v3424_v17 = vld [vmem:[#allocation5 + $0x5c8] sm:$0xff]  ;;  %v3407_v20 = vld [vmem:[#allocation5 + $0x540] sm:$0xff] }
 0x831   :  { %v3403_v15 = vld [vmem:[#allocation5 + $0x520] sm:$0xff] }
 0x832   :  { %v2948_v43 = vsel %vm1476_vm4, %v2947_v23, %v2943_v39  ;;  %v3396_v23 = vld [vmem:[#allocation5 + $0x4e8] sm:$0xff]  ;;  %v3391_v39 = vld [vmem:[#allocation5 + $0x4c0] sm:$0xff] }
 0x833   :  { %v2878_v44 = vpop.xlane.xlu1 %2877 }
 0x834   :  { %v2952_v31 = vrot.slane %v2878_v44, %v5387_v59  ;;  %v2972_v59 = vrot.slane %v5440_v11, %v5410_v52  ;;  %v3272_v44 = vld [vmem:[#allocation5 + $0x108] sm:$0xff] }
 0x836   :  { %v2953_v54 = vsel %vm1483_vm5, %v2952_v31, %v2948_v43  ;;  %v3264_v31 = vld [vmem:[#allocation5 + $0xc8] sm:$0xff] }
 0x837   :  { %v2881_v33 = vpop.xlane.xlu1 %2880  ;;  %v3260_v43 = vld [vmem:[#allocation5 + $0xa8] sm:$0xff] }
 0x838   :  { %v2957_v40 = vrot.slane %v2881_v33, %v5393_v63  ;;  %v2977_v63 = vrot.slane %v2893_v16, %v5419_v22  ;;  %v3291_v16 = vld [vmem:[#allocation5 + $0x1a0] sm:$0xff] }
 0x839   :  { %v3267_v33 = vld [vmem:[#allocation5 + $0xe0] sm:$0xff] }
 0x83a   :  { %v2958_v61 = vsel %vm1490_vm6, %v2957_v40, %v2953_v54  ;;  %v3263_v40 = vld [vmem:[#allocation5 + $0xc0] sm:$0xff] }
 0x83b   :  { %v2884_v6 = vpop.xlane.xlu1 %2883  ;;  %v3259_v54 = vld [vmem:[#allocation5 + $0xa0] sm:$0xff] }
 0x83c   :  { %v2962_v37 = vrot.slane %v2884_v6, %v5399_v32  ;;  %v2987_v32 = vrot.slane %v2899_v2, %v5432_v45  ;;  %v3299_v45 = vld [vmem:[#allocation5 + $0x1e0] sm:$0xff]  ;;  %v3388_v6 = vld [vmem:[#allocation5 + $0x4a8] sm:$0xff] }
 0x83d   :  { %v3279_v2 = vld [vmem:[#allocation5 + $0x140] sm:$0xff] }
 0x83e   :  { %v2963_v28 = vsel %vm1497_vm7, %v2962_v37, %v2958_v61  ;;  %v3387_v37 = vld [vmem:[#allocation5 + $0x4a0] sm:$0xff]  ;;  %v3384_v61 = vld [vmem:[#allocation5 + $0x488] sm:$0xff] }
 0x83f   :  { %v2968_v34 = vsel %vm1504_vm8, %v2967_v8, %v2963_v28  ;;  %v2905_v55 = vpop.xlane.xlu1 %2904  ;;  %v3256_v8 = vld [vmem:[#allocation5 + $0x88] sm:$0xff]  ;;  %v3383_v28 = vld [vmem:[#allocation5 + $0x480] sm:$0xff] }
 0x840   :  { %v2973_v5 = vsel %vm1511_vm9, %v2972_v59, %v2968_v34  ;;  %v2997_v11 = vrot.slane %v2905_v55, %v5447_v56  ;;  %v3292_v56 = vld [vmem:[#allocation5 + $0x1a8] sm:$0xff]  ;;  %v3255_v59 = vld [vmem:[#allocation5 + $0x80] sm:$0xff] }
 0x841   :  { %v2978_v14 = vsel %vm1518_vm10, %v2977_v63, %v2973_v5  ;;  %v3252_v63 = vld [vmem:[#allocation5 + $0x68] sm:$0xff]  ;;  %v3251_v55 = vld [vmem:[#allocation5 + $0x60] sm:$0xff] }
 0x842   :  { %v2983_v48 = vsel %vm1525_vm11, %v2982_v57, %v2978_v14  ;;  %v3380_v34 = vld [vmem:[#allocation5 + $0x468] sm:$0xff]  ;;  %v3379_v57 = vld [vmem:[#allocation5 + $0x460] sm:$0xff] }
 0x843   :  { %v2988_v52 = vsel %vm1532_vm12, %v2987_v32, %v2983_v48  ;;  %v2908_v22 = vpop.xlane.xlu1 %2907  ;;  %v3248_v5 = vld [vmem:[#allocation5 + $0x48] sm:$0xff]  ;;  %v3247_v14 = vld [vmem:[#allocation5 + $0x40] sm:$0xff] }
 0x844   :  { %v2993_v51 = vsel %vm1539_vm13, %v2992_v25, %v2988_v52  ;;  %v3002_v4 = vrot.slane %v2908_v22, %v1551_v62  ;;  %v3419_v62 = vld [vmem:[#allocation5 + $0x5a0] sm:$0xff]  ;;  %v3376_v32 = vld [vmem:[#allocation5 + $0x448] sm:$0xff] }
 0x845   :  { %v2998_v7 = vsel %vm1546_vm14, %v2997_v11, %v2993_v51  ;;  %v3375_v25 = vld [vmem:[#allocation5 + $0x440] sm:$0xff]  ;;  %v3244_v48 = vld [vmem:[#allocation5 + $0x28] sm:$0xff] }
 0x846   :  { %v3003_v58 = vsel %vm1553_vm15, %v3002_v4, %v2998_v7  ;;  %v3372_v52 = vld [vmem:[#allocation5 + $0x428] sm:$0xff]  ;;  %v3243_v11 = vld [vmem:[#allocation5 + $0x20] sm:$0xff] }
 0x847   :  { %3005 = vst [vmem:[#allocation4 + $0x1] sm:$0x1] %v3003_v58  ;;  %v3371_v22 = vld [vmem:[#allocation5 + $0x420] sm:$0xff]  ;;  %v3240_v51 = vld [vmem:[#allocation5 + $0x8] sm:$0xff] }
 0x848   :  { %v3368_v4 = vld [vmem:[#allocation5 + $0x408] sm:$0xff]  ;;  %v3239_v7 = vld [vmem:[#allocation5] sm:$0xff] }
 0x849   :  { %v3367_v58 = vld [vmem:[#allocation5 + $0x400] sm:$0xff] }
 0x84e   :  { %v3006_v3 = vld [vmem:[#allocation4] sm:$0x3] }
 0x84f   :  { %3158 = vmatmul.mubr.f32.vlgmr.msra.gmra.mxu0 %v3006_v3  ;;  %3229 = vmatmul.mubr.f32.vlgmr.msra.gmra.mxu1 %v3006_v3  ;;  %v3363_v3 = vld [vmem:[#allocation5 + $0x3e0] sm:$0xff] }
 0x850   :  { %3518 = vmatpush1.msra.mxu0 %v3299_v45  ;;  %3589 = vmatpush1.msra.mxu1 %v3427_v60  ;;  %v3364_v45 = vld [vmem:[#allocation5 + $0x3e8] sm:$0xff] }
 0x851   :  { %3519 = vmatprep.subr.mxu0 %v3296_v27  ;;  %3590 = vmatprep.subr.mxu1 %v3424_v17  ;;  %v3492_v60 = vld [vmem:[#allocation5 + $0x7e8] sm:$0xff]  ;;  %v3491_v27 = vld [vmem:[#allocation5 + $0x7e0] sm:$0xff] }
 0x852   :  { %3520 = vmatpush1.msra.mxu0 %v3295_v38  ;;  %3591 = vmatpush1.msra.mxu1 %v3423_v46  ;;  %v3360_v17 = vld [vmem:[#allocation5 + $0x3c8] sm:$0xff]  ;;  %v3359_v46 = vld [vmem:[#allocation5 + $0x3c0] sm:$0xff] }
 0x853   :  { %3521 = vmatprep.subr.mxu0 %v3292_v56  ;;  %3592 = vmatprep.subr.mxu1 %v3420_v26  ;;  %v3488_v38 = vld [vmem:[#allocation5 + $0x7c8] sm:$0xff]  ;;  %v3487_v56 = vld [vmem:[#allocation5 + $0x7c0] sm:$0xff] }
 0x854   :  { %3522 = vmatpush1.msra.mxu0 %v3291_v16  ;;  %3593 = vmatpush1.msra.mxu1 %v3419_v62  ;;  %v3356_v26 = vld [vmem:[#allocation5 + $0x3a8] sm:$0xff]  ;;  %v3355_v62 = vld [vmem:[#allocation5 + $0x3a0] sm:$0xff] }
 0x855   :  { %3523 = vmatprep.subr.mxu0 %v3288_v47  ;;  %3594 = vmatprep.subr.mxu1 %v3416_v49  ;;  %v3484_v16 = vld [vmem:[#allocation5 + $0x7a8] sm:$0xff]  ;;  %v3483_v47 = vld [vmem:[#allocation5 + $0x7a0] sm:$0xff] }
 0x856   :  { %3524 = vmatpush1.msra.mxu0 %v3287_v21  ;;  %3595 = vmatpush1.msra.mxu1 %v3415_v53  ;;  %v3352_v49 = vld [vmem:[#allocation5 + $0x388] sm:$0xff]  ;;  %v3351_v53 = vld [vmem:[#allocation5 + $0x380] sm:$0xff] }
 0x857   :  { %3525 = vmatprep.subr.mxu0 %v3284_v42  ;;  %3596 = vmatprep.subr.mxu1 %v3412_v24  ;;  %v3480_v21 = vld [vmem:[#allocation5 + $0x788] sm:$0xff]  ;;  %v3479_v42 = vld [vmem:[#allocation5 + $0x780] sm:$0xff] }
 0x858   :  { %3526 = vmatpush1.msra.mxu0 %v3283_v50  ;;  %3597 = vmatpush1.msra.mxu1 %v3411_v10  ;;  %v3348_v24 = vld [vmem:[#allocation5 + $0x368] sm:$0xff]  ;;  %v3347_v10 = vld [vmem:[#allocation5 + $0x360] sm:$0xff] }
 0x859   :  { %3527 = vmatprep.subr.mxu0 %v3280_v9  ;;  %3598 = vmatprep.subr.mxu1 %v3408_v13  ;;  %v3476_v50 = vld [vmem:[#allocation5 + $0x768] sm:$0xff]  ;;  %v3475_v9 = vld [vmem:[#allocation5 + $0x760] sm:$0xff] }
 0x85a   :  { %3528 = vmatpush1.msra.mxu0 %v3279_v2  ;;  %3599 = vmatpush1.msra.mxu1 %v3407_v20  ;;  %v3344_v13 = vld [vmem:[#allocation5 + $0x348] sm:$0xff]  ;;  %v3343_v20 = vld [vmem:[#allocation5 + $0x340] sm:$0xff] }
 0x85b   :  { %3529 = vmatprep.subr.mxu0 %v3276_v18  ;;  %3600 = vmatprep.subr.mxu1 %v3404_v19  ;;  %v3472_v2 = vld [vmem:[#allocation5 + $0x748] sm:$0xff]  ;;  %v3471_v18 = vld [vmem:[#allocation5 + $0x740] sm:$0xff] }
 0x85c   :  { %3530 = vmatpush1.msra.mxu0 %v3275_v12  ;;  %3601 = vmatpush1.msra.mxu1 %v3403_v15  ;;  %v3340_v19 = vld [vmem:[#allocation5 + $0x328] sm:$0xff]  ;;  %v3339_v15 = vld [vmem:[#allocation5 + $0x320] sm:$0xff] }
 0x85d   :  { %3531 = vmatprep.subr.mxu0 %v3272_v44  ;;  %3602 = vmatprep.subr.mxu1 %v3400_v1  ;;  %v3468_v12 = vld [vmem:[#allocation5 + $0x728] sm:$0xff]  ;;  %v3467_v44 = vld [vmem:[#allocation5 + $0x720] sm:$0xff] }
 0x85e   :  { %3532 = vmatpush1.msra.mxu0 %v3271_v41  ;;  %3603 = vmatpush1.msra.mxu1 %v3399_v0  ;;  %v3336_v1 = vld [vmem:[#allocation5 + $0x308] sm:$0xff]  ;;  %v3335_v0 = vld [vmem:[#allocation5 + $0x300] sm:$0xff] }
 0x85f   :  { %3533 = vmatprep.subr.mxu0 %v3268_v36  ;;  %3604 = vmatprep.subr.mxu1 %v3396_v23  ;;  %v3464_v41 = vld [vmem:[#allocation5 + $0x708] sm:$0xff]  ;;  %v3463_v36 = vld [vmem:[#allocation5 + $0x700] sm:$0xff] }
 0x860   :  { %3534 = vmatpush1.msra.mxu0 %v3267_v33  ;;  %3605 = vmatpush1.msra.mxu1 %v3395_v29  ;;  %v3332_v23 = vld [vmem:[#allocation5 + $0x2e8] sm:$0xff]  ;;  %v3331_v29 = vld [vmem:[#allocation5 + $0x2e0] sm:$0xff] }
 0x861   :  { %3535 = vmatprep.subr.mxu0 %v3264_v31  ;;  %3606 = vmatprep.subr.mxu1 %v3392_v35  ;;  %v3460_v33 = vld [vmem:[#allocation5 + $0x6e8] sm:$0xff]  ;;  %v3459_v31 = vld [vmem:[#allocation5 + $0x6e0] sm:$0xff] }
 0x862   :  { %3536 = vmatpush1.msra.mxu0 %v3263_v40  ;;  %3607 = vmatpush1.msra.mxu1 %v3391_v39  ;;  %v3328_v35 = vld [vmem:[#allocation5 + $0x2c8] sm:$0xff]  ;;  %v3327_v39 = vld [vmem:[#allocation5 + $0x2c0] sm:$0xff] }
 0x863   :  { %3537 = vmatprep.subr.mxu0 %v3260_v43  ;;  %3608 = vmatprep.subr.mxu1 %v3388_v6  ;;  %v3456_v40 = vld [vmem:[#allocation5 + $0x6c8] sm:$0xff]  ;;  %v3455_v43 = vld [vmem:[#allocation5 + $0x6c0] sm:$0xff] }
 0x864   :  { %3538 = vmatpush1.msra.mxu0 %v3259_v54  ;;  %3609 = vmatpush1.msra.mxu1 %v3387_v37  ;;  %v3324_v6 = vld [vmem:[#allocation5 + $0x2a8] sm:$0xff]  ;;  %v3323_v37 = vld [vmem:[#allocation5 + $0x2a0] sm:$0xff] }
 0x865   :  { %3539 = vmatprep.subr.mxu0 %v3256_v8  ;;  %3610 = vmatprep.subr.mxu1 %v3384_v61  ;;  %v3452_v54 = vld [vmem:[#allocation5 + $0x6a8] sm:$0xff]  ;;  %v3451_v8 = vld [vmem:[#allocation5 + $0x6a0] sm:$0xff] }
 0x866   :  { %3540 = vmatpush1.msra.mxu0 %v3255_v59  ;;  %3611 = vmatpush1.msra.mxu1 %v3383_v28  ;;  %v3320_v61 = vld [vmem:[#allocation5 + $0x288] sm:$0xff]  ;;  %v3319_v28 = vld [vmem:[#allocation5 + $0x280] sm:$0xff] }
 0x867   :  { %3541 = vmatprep.subr.mxu0 %v3252_v63  ;;  %3612 = vmatprep.subr.mxu1 %v3380_v34  ;;  %v3448_v59 = vld [vmem:[#allocation5 + $0x688] sm:$0xff]  ;;  %v3447_v63 = vld [vmem:[#allocation5 + $0x680] sm:$0xff] }
 0x868   :  { %3542 = vmatpush1.msra.mxu0 %v3251_v55  ;;  %3613 = vmatpush1.msra.mxu1 %v3379_v57  ;;  %v3316_v34 = vld [vmem:[#allocation5 + $0x268] sm:$0xff]  ;;  %v3315_v57 = vld [vmem:[#allocation5 + $0x260] sm:$0xff] }
 0x869   :  { %3543 = vmatprep.subr.mxu0 %v3248_v5  ;;  %3614 = vmatprep.subr.mxu1 %v3376_v32  ;;  %v3444_v55 = vld [vmem:[#allocation5 + $0x668] sm:$0xff]  ;;  %v3443_v5 = vld [vmem:[#allocation5 + $0x660] sm:$0xff] }
 0x86a   :  { %3544 = vmatpush1.msra.mxu0 %v3247_v14  ;;  %3615 = vmatpush1.msra.mxu1 %v3375_v25  ;;  %v3312_v32 = vld [vmem:[#allocation5 + $0x248] sm:$0xff]  ;;  %v3311_v25 = vld [vmem:[#allocation5 + $0x240] sm:$0xff] }
 0x86b   :  { %3545 = vmatprep.subr.mxu0 %v3244_v48  ;;  %3616 = vmatprep.subr.mxu1 %v3372_v52  ;;  %v3440_v14 = vld [vmem:[#allocation5 + $0x648] sm:$0xff]  ;;  %v3439_v48 = vld [vmem:[#allocation5 + $0x640] sm:$0xff] }
 0x86c   :  { %3546 = vmatpush1.msra.mxu0 %v3243_v11  ;;  %3617 = vmatpush1.msra.mxu1 %v3371_v22  ;;  %v3308_v52 = vld [vmem:[#allocation5 + $0x228] sm:$0xff]  ;;  %v3307_v22 = vld [vmem:[#allocation5 + $0x220] sm:$0xff] }
 0x86d   :  { %3547 = vmatprep.subr.mxu0 %v3240_v51  ;;  %3618 = vmatprep.subr.mxu1 %v3368_v4  ;;  %v3436_v11 = vld [vmem:[#allocation5 + $0x628] sm:$0xff]  ;;  %v3435_v51 = vld [vmem:[#allocation5 + $0x620] sm:$0xff] }
 0x86e   :  { %3548 = vmatpush1.msra.mxu0 %v3239_v7  ;;  %3619 = vmatpush1.msra.mxu1 %v3367_v58  ;;  %v3304_v4 = vld [vmem:[#allocation5 + $0x208] sm:$0xff]  ;;  %v3303_v58 = vld [vmem:[#allocation5 + $0x200] sm:$0xff] }
 0x86f   :  { %3549 = vmatprep.subr.mxu0 %v3364_v45  ;;  %3620 = vmatprep.subr.mxu1 %v3492_v60  ;;  %v3432_v7 = vld [vmem:[#allocation5 + $0x608] sm:$0xff]  ;;  %v3431_v45 = vld [vmem:[#allocation5 + $0x600] sm:$0xff]  ;;  %v3302_v60 = vld [vmem:[#allocation5 + $0x1f8] sm:$0xff] }
 0x870   :  { %3550 = vmatpush2.msra.mxu0 %v3363_v3  ;;  %3621 = vmatpush2.msra.mxu1 %v3491_v27  ;;  %v3430_v3 = vld [vmem:[#allocation5 + $0x5f8] sm:$0xff]  ;;  %v3075_v27 = vsub.s32 0, %v4480_v30 }
 0x871   :  { %3551 = vmatprep.subr.mxu0 %v3360_v17  ;;  %3622 = vmatprep.subr.mxu1 %v3488_v38  ;;  %v3083_v17 = vsub.s32 2, %v4480_v30  ;;  %v3071_v38 = vld [vmem:[%s5741_s6] sm:$0xf] }
 0x872   :  { %3552 = vmatpush2.msra.mxu0 %v3359_v46  ;;  %3623 = vmatpush2.msra.mxu1 %v3487_v56  ;;  %v3079_v46 = vsub.s32 1, %v4480_v30  ;;  %v3087_v56 = vsub.s32 3, %v4480_v30  ;;  %v4070_v30 = vld [vmem:[%s5745_s10] ss:$0 sm:$0xff] }
 0x873   :  { %3553 = vmatprep.subr.mxu0 %v3356_v26  ;;  %3624 = vmatprep.subr.mxu1 %v3484_v16  ;;  %v3076_v26 = vrot.slane %v3071_v38, %v3075_v27  ;;  %v3084_v16 = vrot.slane %v3071_v38, %v3083_v17 }
 0x874   :  { %3554 = vmatpush2.msra.mxu0 %v3355_v62  ;;  %3625 = vmatpush2.msra.mxu1 %v3483_v47  ;;  %v3080_v62 = vrot.slane %v3071_v38, %v3079_v46  ;;  %v3088_v47 = vrot.slane %v3071_v38, %v3087_v56  ;;  %v3258_v38 = vld [vmem:[#allocation5 + $0x98] sm:$0xff] }
 0x875   :  { %3555 = vmatprep.subr.mxu0 %v3352_v49  ;;  %3626 = vmatprep.subr.mxu1 %v3480_v21 }
 0x876   :  { %3556 = vmatpush2.msra.mxu0 %v3351_v53  ;;  %3627 = vmatpush2.msra.mxu1 %v3479_v42 }
 0x877   :  { %3557 = vmatprep.subr.mxu0 %v3348_v24  ;;  %3628 = vmatprep.subr.mxu1 %v3476_v50 }
 0x878   :  { %3558 = vmatpush2.msra.mxu0 %v3347_v10  ;;  %3629 = vmatpush2.msra.mxu1 %v3475_v9 }
 0x879   :  { %3559 = vmatprep.subr.mxu0 %v3344_v13  ;;  %3630 = vmatprep.subr.mxu1 %v3472_v2 }
 0x87a   :  { %3560 = vmatpush2.msra.mxu0 %v3343_v20  ;;  %3631 = vmatpush2.msra.mxu1 %v3471_v18 }
 0x87b   :  { %3561 = vmatprep.subr.mxu0 %v3340_v19  ;;  %3632 = vmatprep.subr.mxu1 %v3468_v12  ;;  %v3301_v19 = vld [vmem:[#allocation5 + $0x1f0] sm:$0xff] }
 0x87c   :  { %3562 = vmatpush2.msra.mxu0 %v3339_v15  ;;  %3633 = vmatpush2.msra.mxu1 %v3467_v44  ;;  %v3429_v12 = vld [vmem:[#allocation5 + $0x5f0] sm:$0xff]  ;;  %v3298_v15 = vld [vmem:[#allocation5 + $0x1d8] sm:$0xff] }
 0x87d   :  { %3563 = vmatprep.subr.mxu0 %v3336_v1  ;;  %3634 = vmatprep.subr.mxu1 %v3464_v41  ;;  %v3426_v44 = vld [vmem:[#allocation5 + $0x5d8] sm:$0xff]  ;;  %v3297_v1 = vld [vmem:[#allocation5 + $0x1d0] sm:$0xff] }
 0x87e   :  { %3564 = vmatpush2.msra.mxu0 %v3335_v0  ;;  %3635 = vmatpush2.msra.mxu1 %v3463_v36  ;;  %v3425_v41 = vld [vmem:[#allocation5 + $0x5d0] sm:$0xff]  ;;  %v3294_v0 = vld [vmem:[#allocation5 + $0x1b8] sm:$0xff] }
 0x87f   :  { %3565 = vmatprep.subr.mxu0 %v3332_v23  ;;  %3636 = vmatprep.subr.mxu1 %v3460_v33  ;;  %v3422_v36 = vld [vmem:[#allocation5 + $0x5b8] sm:$0xff]  ;;  %v3293_v23 = vld [vmem:[#allocation5 + $0x1b0] sm:$0xff] }
 0x880   :  { %3566 = vmatpush2.msra.mxu0 %v3331_v29  ;;  %3637 = vmatpush2.msra.mxu1 %v3459_v31  ;;  %v3421_v33 = vld [vmem:[#allocation5 + $0x5b0] sm:$0xff]  ;;  %v3290_v29 = vld [vmem:[#allocation5 + $0x198] sm:$0xff] }
 0x881   :  { %3567 = vmatprep.subr.mxu0 %v3328_v35  ;;  %3638 = vmatprep.subr.mxu1 %v3456_v40  ;;  %v3418_v31 = vld [vmem:[#allocation5 + $0x598] sm:$0xff]  ;;  %v3289_v35 = vld [vmem:[#allocation5 + $0x190] sm:$0xff] }
 0x882   :  { %3568 = vmatpush2.msra.mxu0 %v3327_v39  ;;  %3639 = vmatpush2.msra.mxu1 %v3455_v43  ;;  %v3417_v40 = vld [vmem:[#allocation5 + $0x590] sm:$0xff]  ;;  %v3286_v39 = vld [vmem:[#allocation5 + $0x178] sm:$0xff] }
 0x883   :  { %3569 = vmatprep.subr.mxu0 %v3324_v6  ;;  %3640 = vmatprep.subr.mxu1 %v3452_v54  ;;  %v3414_v43 = vld [vmem:[#allocation5 + $0x578] sm:$0xff]  ;;  %v3285_v6 = vld [vmem:[#allocation5 + $0x170] sm:$0xff] }
 0x884   :  { %3570 = vmatpush2.msra.mxu0 %v3323_v37  ;;  %3641 = vmatpush2.msra.mxu1 %v3451_v8  ;;  %v3413_v54 = vld [vmem:[#allocation5 + $0x570] sm:$0xff]  ;;  %v3282_v37 = vld [vmem:[#allocation5 + $0x158] sm:$0xff] }
 0x885   :  { %3571 = vmatprep.subr.mxu0 %v3320_v61  ;;  %3642 = vmatprep.subr.mxu1 %v3448_v59  ;;  %v3410_v8 = vld [vmem:[#allocation5 + $0x558] sm:$0xff]  ;;  %v3281_v61 = vld [vmem:[#allocation5 + $0x150] sm:$0xff] }
 0x886   :  { %3572 = vmatpush2.msra.mxu0 %v3319_v28  ;;  %3643 = vmatpush2.msra.mxu1 %v3447_v63  ;;  %v3409_v59 = vld [vmem:[#allocation5 + $0x550] sm:$0xff]  ;;  %v3278_v28 = vld [vmem:[#allocation5 + $0x138] sm:$0xff] }
 0x887   :  { %3573 = vmatprep.subr.mxu0 %v3316_v34  ;;  %3644 = vmatprep.subr.mxu1 %v3444_v55  ;;  %v3406_v63 = vld [vmem:[#allocation5 + $0x538] sm:$0xff]  ;;  %v3277_v34 = vld [vmem:[#allocation5 + $0x130] sm:$0xff] }
 0x888   :  { %3574 = vmatpush2.msra.mxu0 %v3315_v57  ;;  %3645 = vmatpush2.msra.mxu1 %v3443_v5  ;;  %v3405_v55 = vld [vmem:[#allocation5 + $0x530] sm:$0xff]  ;;  %v3274_v57 = vld [vmem:[#allocation5 + $0x118] sm:$0xff] }
 0x889   :  { %3575 = vmatprep.subr.mxu0 %v3312_v32  ;;  %3646 = vmatprep.subr.mxu1 %v3440_v14  ;;  %v3402_v5 = vld [vmem:[#allocation5 + $0x518] sm:$0xff]  ;;  %v3273_v32 = vld [vmem:[#allocation5 + $0x110] sm:$0xff] }
 0x88a   :  { %3576 = vmatpush2.msra.mxu0 %v3311_v25  ;;  %3647 = vmatpush2.msra.mxu1 %v3439_v48  ;;  %v3401_v14 = vld [vmem:[#allocation5 + $0x510] sm:$0xff]  ;;  %v3270_v25 = vld [vmem:[#allocation5 + $0xf8] sm:$0xff] }
 0x88b   :  { %3577 = vmatprep.subr.mxu0 %v3308_v52  ;;  %3648 = vmatprep.subr.mxu1 %v3436_v11  ;;  %v3398_v48 = vld [vmem:[#allocation5 + $0x4f8] sm:$0xff]  ;;  %v3269_v52 = vld [vmem:[#allocation5 + $0xf0] sm:$0xff] }
 0x88c   :  { %3578 = vmatpush2.msra.mxu0 %v3307_v22  ;;  %3649 = vmatpush2.msra.mxu1 %v3435_v51  ;;  %v3397_v11 = vld [vmem:[#allocation5 + $0x4f0] sm:$0xff]  ;;  %v3266_v22 = vld [vmem:[#allocation5 + $0xd8] sm:$0xff] }
 0x88d   :  { %3579 = vmatprep.subr.mxu0 %v3304_v4  ;;  %3650 = vmatprep.subr.mxu1 %v3432_v7  ;;  %v3394_v51 = vld [vmem:[#allocation5 + $0x4d8] sm:$0xff]  ;;  %v3265_v4 = vld [vmem:[#allocation5 + $0xd0] sm:$0xff] }
 0x88e   :  { %3580 = vmatpush2.msra.mxu0 %v3303_v58  ;;  %3651 = vmatpush2.msra.mxu1 %v3431_v45  ;;  %v3393_v7 = vld [vmem:[#allocation5 + $0x4d0] sm:$0xff]  ;;  %v3262_v58 = vld [vmem:[#allocation5 + $0xb8] sm:$0xff] }
 0x88f   :  { %3659 = vmatprep.subr.mxu0 %v3302_v60  ;;  %3730 = vmatprep.subr.mxu1 %v3430_v3  ;;  %v3390_v45 = vld [vmem:[#allocation5 + $0x4b8] sm:$0xff]  ;;  %v3261_v60 = vld [vmem:[#allocation5 + $0xb0] sm:$0xff] }
 0x890   :  { %v3389_v3 = vld [vmem:[#allocation5 + $0x4b0] sm:$0xff] }
 0x90f   :  { %v3159_v49 = vpop.f32.mrf.mxu0  ;;  %v3230_v21 = vpop.f32.mrf.mxu1 }
 0x910   :  { %v5512_v53 = vadd.f32 %v3159_v49, %v3076_v26  ;;  %v5514_v42 = vadd.f32 %v3230_v21, %v3084_v16  ;;  %v3386_v26 = vld [vmem:[#allocation5 + $0x498] sm:$0xff]  ;;  %v3257_v16 = vld [vmem:[#allocation5 + $0x90] sm:$0xff] }
 0x911   :  { %v3161_v24 = vpop.f32.mrf.mxu0  ;;  %v3232_v50 = vpop.f32.mrf.mxu1  ;;  %v3382_v49 = vld [vmem:[#allocation5 + $0x478] sm:$0xff]  ;;  %v3253_v21 = vld [vmem:[#allocation5 + $0x70] sm:$0xff] }
 0x912   :  { %v3162_v10 = vadd.f32 %v3161_v24, %v3080_v62  ;;  %v3233_v9 = vadd.f32 %v3232_v50, %v3088_v47  ;;  %v3235_v20 = vmax.f32 %v5512_v53, 0.0  ;;  %v3237_v18 = vmax.f32 %v5514_v42, 0.0  ;;  %v3385_v62 = vld [vmem:[#allocation5 + $0x490] sm:$0xff]  ;;  %v3254_v47 = vld [vmem:[#allocation5 + $0x78] sm:$0xff] }
 0x913   :  { %v3381_v24 = vld [vmem:[#allocation5 + $0x470] sm:$0xff]  ;;  %v3250_v50 = vld [vmem:[#allocation5 + $0x58] sm:$0xff] }
 0x914   :  { %v3236_v13 = vmax.f32 %v3162_v10, 0.0  ;;  %v3238_v2 = vmax.f32 %v3233_v9, 0.0  ;;  %v3378_v10 = vld [vmem:[#allocation5 + $0x458] sm:$0xff]  ;;  %v3249_v9 = vld [vmem:[#allocation5 + $0x50] sm:$0xff] }
 0x915   :  { %v3818_v53 = vld [vmem:[%s5744_s9 + $0x68] sm:$0xff]  ;;  %v3833_v42 = vld [vmem:[%s5744_s9 + $0xe0] sm:$0xff] }
 0x916   :  { %3581 = vmatprep.mubr.f32.mxu0 %v3236_v13  ;;  %3652 = vmatprep.mubr.f32.mxu1 %v3238_v2 }
 0x917   :  { %3582 = vmatmul.mubr.f32.vlgmr.msra.gmra.mxu0 %v3235_v20  ;;  %3653 = vmatmul.mubr.f32.vlgmr.msra.gmra.mxu1 %v3237_v18 }
 0x918   :  { %3660 = vmatpush1.msra.mxu0 %v3301_v19  ;;  %3731 = vmatpush1.msra.mxu1 %v3429_v12  ;;  %v3374_v19 = vld [vmem:[#allocation5 + $0x438] sm:$0xff]  ;;  %v3245_v12 = vld [vmem:[#allocation5 + $0x30] sm:$0xff] }
 0x919   :  { %3661 = vmatprep.subr.mxu0 %v3298_v15  ;;  %3723 = vmatprep.mubr.f32.mxu0 %v3236_v13  ;;  %v3377_v13 = vld [vmem:[#allocation5 + $0x450] sm:$0xff] }
 0x91a   :  { %3732 = vmatprep.subr.mxu1 %v3426_v44  ;;  %3794 = vmatprep.mubr.f32.mxu1 %v3238_v2  ;;  %v3246_v2 = vld [vmem:[#allocation5 + $0x38] sm:$0xff]  ;;  %v3373_v15 = vld [vmem:[#allocation5 + $0x430] sm:$0xff] }
 0x91b   :  { %3662 = vmatpush1.msra.mxu0 %v3297_v1  ;;  %3733 = vmatpush1.msra.mxu1 %v3425_v41  ;;  %v3242_v44 = vld [vmem:[#allocation5 + $0x18] sm:$0xff]  ;;  %v3241_v41 = vld [vmem:[#allocation5 + $0x10] sm:$0xff] }
 0x91c   :  { %3663 = vmatprep.subr.mxu0 %v3294_v0  ;;  %3734 = vmatprep.subr.mxu1 %v3422_v36  ;;  %v3370_v1 = vld [vmem:[#allocation5 + $0x418] sm:$0xff]  ;;  %v3369_v0 = vld [vmem:[#allocation5 + $0x410] sm:$0xff] }
 0x91d   :  { %3664 = vmatpush1.msra.mxu0 %v3293_v23  ;;  %3735 = vmatpush1.msra.mxu1 %v3421_v33  ;;  %v3366_v36 = vld [vmem:[#allocation5 + $0x3f8] sm:$0xff]  ;;  %v3365_v33 = vld [vmem:[#allocation5 + $0x3f0] sm:$0xff] }
 0x91e   :  { %3665 = vmatprep.subr.mxu0 %v3290_v29  ;;  %3736 = vmatprep.subr.mxu1 %v3418_v31  ;;  %v3494_v23 = vld [vmem:[#allocation5 + $0x7f8] sm:$0xff]  ;;  %v3493_v29 = vld [vmem:[#allocation5 + $0x7f0] sm:$0xff] }
 0x91f   :  { %3666 = vmatpush1.msra.mxu0 %v3289_v35  ;;  %3737 = vmatpush1.msra.mxu1 %v3417_v40  ;;  %v3362_v31 = vld [vmem:[#allocation5 + $0x3d8] sm:$0xff]  ;;  %v3361_v40 = vld [vmem:[#allocation5 + $0x3d0] sm:$0xff] }
 0x920   :  { %3667 = vmatprep.subr.mxu0 %v3286_v39  ;;  %3738 = vmatprep.subr.mxu1 %v3414_v43  ;;  %v3490_v35 = vld [vmem:[#allocation5 + $0x7d8] sm:$0xff]  ;;  %v3489_v39 = vld [vmem:[#allocation5 + $0x7d0] sm:$0xff] }
 0x921   :  { %3668 = vmatpush1.msra.mxu0 %v3285_v6  ;;  %3739 = vmatpush1.msra.mxu1 %v3413_v54  ;;  %v3358_v43 = vld [vmem:[#allocation5 + $0x3b8] sm:$0xff]  ;;  %v3357_v54 = vld [vmem:[#allocation5 + $0x3b0] sm:$0xff] }
 0x922   :  { %3669 = vmatprep.subr.mxu0 %v3282_v37  ;;  %3740 = vmatprep.subr.mxu1 %v3410_v8  ;;  %v3486_v6 = vld [vmem:[#allocation5 + $0x7b8] sm:$0xff]  ;;  %v3485_v37 = vld [vmem:[#allocation5 + $0x7b0] sm:$0xff] }
 0x923   :  { %3670 = vmatpush1.msra.mxu0 %v3281_v61  ;;  %3741 = vmatpush1.msra.mxu1 %v3409_v59  ;;  %v3354_v8 = vld [vmem:[#allocation5 + $0x398] sm:$0xff]  ;;  %v3353_v59 = vld [vmem:[#allocation5 + $0x390] sm:$0xff] }
 0x924   :  { %3671 = vmatprep.subr.mxu0 %v3278_v28  ;;  %3742 = vmatprep.subr.mxu1 %v3406_v63  ;;  %v3482_v61 = vld [vmem:[#allocation5 + $0x798] sm:$0xff]  ;;  %v3481_v28 = vld [vmem:[#allocation5 + $0x790] sm:$0xff] }
 0x925   :  { %3672 = vmatpush1.msra.mxu0 %v3277_v34  ;;  %3743 = vmatpush1.msra.mxu1 %v3405_v55  ;;  %v3350_v63 = vld [vmem:[#allocation5 + $0x378] sm:$0xff]  ;;  %v3349_v55 = vld [vmem:[#allocation5 + $0x370] sm:$0xff] }
 0x926   :  { %3673 = vmatprep.subr.mxu0 %v3274_v57  ;;  %3744 = vmatprep.subr.mxu1 %v3402_v5  ;;  %v3478_v34 = vld [vmem:[#allocation5 + $0x778] sm:$0xff]  ;;  %v3477_v57 = vld [vmem:[#allocation5 + $0x770] sm:$0xff] }
 0x927   :  { %3674 = vmatpush1.msra.mxu0 %v3273_v32  ;;  %3745 = vmatpush1.msra.mxu1 %v3401_v14  ;;  %v3346_v5 = vld [vmem:[#allocation5 + $0x358] sm:$0xff]  ;;  %v3345_v14 = vld [vmem:[#allocation5 + $0x350] sm:$0xff] }
 0x928   :  { %3675 = vmatprep.subr.mxu0 %v3270_v25  ;;  %3746 = vmatprep.subr.mxu1 %v3398_v48  ;;  %v3474_v32 = vld [vmem:[#allocation5 + $0x758] sm:$0xff]  ;;  %v3473_v25 = vld [vmem:[#allocation5 + $0x750] sm:$0xff] }
 0x929   :  { %3676 = vmatpush1.msra.mxu0 %v3269_v52  ;;  %3747 = vmatpush1.msra.mxu1 %v3397_v11  ;;  %v3342_v48 = vld [vmem:[#allocation5 + $0x338] sm:$0xff]  ;;  %v3341_v11 = vld [vmem:[#allocation5 + $0x330] sm:$0xff] }
 0x92a   :  { %3677 = vmatprep.subr.mxu0 %v3266_v22  ;;  %3748 = vmatprep.subr.mxu1 %v3394_v51  ;;  %v3470_v52 = vld [vmem:[#allocation5 + $0x738] sm:$0xff]  ;;  %v3469_v22 = vld [vmem:[#allocation5 + $0x730] sm:$0xff] }
 0x92b   :  { %3678 = vmatpush1.msra.mxu0 %v3265_v4  ;;  %3749 = vmatpush1.msra.mxu1 %v3393_v7  ;;  %v3338_v51 = vld [vmem:[#allocation5 + $0x318] sm:$0xff]  ;;  %v3337_v7 = vld [vmem:[#allocation5 + $0x310] sm:$0xff] }
 0x92c   :  { %3679 = vmatprep.subr.mxu0 %v3262_v58  ;;  %3750 = vmatprep.subr.mxu1 %v3390_v45  ;;  %v3466_v4 = vld [vmem:[#allocation5 + $0x718] sm:$0xff]  ;;  %v3465_v58 = vld [vmem:[#allocation5 + $0x710] sm:$0xff] }
 0x92d   :  { %3680 = vmatpush1.msra.mxu0 %v3261_v60  ;;  %3751 = vmatpush1.msra.mxu1 %v3389_v3  ;;  %v3334_v45 = vld [vmem:[#allocation5 + $0x2f8] sm:$0xff]  ;;  %v3333_v3 = vld [vmem:[#allocation5 + $0x2f0] sm:$0xff] }
 0x92e   :  { %3681 = vmatprep.subr.mxu0 %v3258_v38  ;;  %3752 = vmatprep.subr.mxu1 %v3386_v26  ;;  %v3462_v60 = vld [vmem:[#allocation5 + $0x6f8] sm:$0xff]  ;;  %v3461_v38 = vld [vmem:[#allocation5 + $0x6f0] sm:$0xff] }
 0x92f   :  { %3682 = vmatpush1.msra.mxu0 %v3257_v16  ;;  %3753 = vmatpush1.msra.mxu1 %v3385_v62  ;;  %v3330_v26 = vld [vmem:[#allocation5 + $0x2d8] sm:$0xff]  ;;  %v3329_v62 = vld [vmem:[#allocation5 + $0x2d0] sm:$0xff] }
 0x930   :  { %3683 = vmatprep.subr.mxu0 %v3254_v47  ;;  %3754 = vmatprep.subr.mxu1 %v3382_v49  ;;  %v3458_v16 = vld [vmem:[#allocation5 + $0x6d8] sm:$0xff]  ;;  %v3457_v47 = vld [vmem:[#allocation5 + $0x6d0] sm:$0xff] }
 0x931   :  { %3684 = vmatpush1.msra.mxu0 %v3253_v21  ;;  %3755 = vmatpush1.msra.mxu1 %v3381_v24  ;;  %v3326_v49 = vld [vmem:[#allocation5 + $0x2b8] sm:$0xff]  ;;  %v3325_v24 = vld [vmem:[#allocation5 + $0x2b0] sm:$0xff] }
 0x932   :  { %3685 = vmatprep.subr.mxu0 %v3250_v50  ;;  %3756 = vmatprep.subr.mxu1 %v3378_v10  ;;  %v3454_v21 = vld [vmem:[#allocation5 + $0x6b8] sm:$0xff]  ;;  %v3453_v50 = vld [vmem:[#allocation5 + $0x6b0] sm:$0xff] }
 0x933   :  { %3686 = vmatpush1.msra.mxu0 %v3249_v9  ;;  %3757 = vmatpush1.msra.mxu1 %v3377_v13  ;;  %v3322_v10 = vld [vmem:[#allocation5 + $0x298] sm:$0xff]  ;;  %v3321_v13 = vld [vmem:[#allocation5 + $0x290] sm:$0xff] }
 0x934   :  { %3687 = vmatprep.subr.mxu0 %v3246_v2  ;;  %3758 = vmatprep.subr.mxu1 %v3374_v19  ;;  %v3450_v9 = vld [vmem:[#allocation5 + $0x698] sm:$0xff]  ;;  %v3449_v2 = vld [vmem:[#allocation5 + $0x690] sm:$0xff] }
 0x935   :  { %3688 = vmatpush1.msra.mxu0 %v3245_v12  ;;  %3759 = vmatpush1.msra.mxu1 %v3373_v15  ;;  %v3318_v19 = vld [vmem:[#allocation5 + $0x278] sm:$0xff]  ;;  %v3317_v15 = vld [vmem:[#allocation5 + $0x270] sm:$0xff] }
 0x936   :  { %3689 = vmatprep.subr.mxu0 %v3242_v44  ;;  %3760 = vmatprep.subr.mxu1 %v3370_v1  ;;  %v3446_v12 = vld [vmem:[#allocation5 + $0x678] sm:$0xff]  ;;  %v3445_v44 = vld [vmem:[#allocation5 + $0x670] sm:$0xff] }
 0x937   :  { %3690 = vmatpush1.msra.mxu0 %v3241_v41  ;;  %3761 = vmatpush1.msra.mxu1 %v3369_v0  ;;  %v3314_v1 = vld [vmem:[#allocation5 + $0x258] sm:$0xff]  ;;  %v3313_v0 = vld [vmem:[#allocation5 + $0x250] sm:$0xff] }
 0x938   :  { %3691 = vmatprep.subr.mxu0 %v3366_v36  ;;  %3762 = vmatprep.subr.mxu1 %v3494_v23  ;;  %v3442_v41 = vld [vmem:[#allocation5 + $0x658] sm:$0xff]  ;;  %v3441_v36 = vld [vmem:[#allocation5 + $0x650] sm:$0xff] }
 0x939   :  { %3692 = vmatpush2.msra.mxu0 %v3365_v33  ;;  %3763 = vmatpush2.msra.mxu1 %v3493_v29  ;;  %v3310_v23 = vld [vmem:[#allocation5 + $0x238] sm:$0xff]  ;;  %v3309_v29 = vld [vmem:[#allocation5 + $0x230] sm:$0xff] }
 0x93a   :  { %3693 = vmatprep.subr.mxu0 %v3362_v31  ;;  %3764 = vmatprep.subr.mxu1 %v3490_v35  ;;  %v3438_v33 = vld [vmem:[#allocation5 + $0x638] sm:$0xff]  ;;  %v3437_v31 = vld [vmem:[#allocation5 + $0x630] sm:$0xff] }
 0x93b   :  { %3694 = vmatpush2.msra.mxu0 %v3361_v40  ;;  %3765 = vmatpush2.msra.mxu1 %v3489_v39  ;;  %v3306_v35 = vld [vmem:[#allocation5 + $0x218] sm:$0xff]  ;;  %v3305_v39 = vld [vmem:[#allocation5 + $0x210] sm:$0xff] }
 0x93c   :  { %3695 = vmatprep.subr.mxu0 %v3358_v43  ;;  %3766 = vmatprep.subr.mxu1 %v3486_v6  ;;  %v3434_v40 = vld [vmem:[#allocation5 + $0x618] sm:$0xff]  ;;  %v3433_v43 = vld [vmem:[#allocation5 + $0x610] sm:$0xff] }
 0x93d   :  { %3696 = vmatpush2.msra.mxu0 %v3357_v54  ;;  %3767 = vmatpush2.msra.mxu1 %v3485_v37  ;;  %v3836_v6 = vld [vmem:[%s5744_s9 + $0xf8] sm:$0xff]  ;;  %v3835_v37 = vld [vmem:[%s5744_s9 + $0xf0] sm:$0xff] }
 0x93e   :  { %3697 = vmatprep.subr.mxu0 %v3354_v8  ;;  %3768 = vmatprep.subr.mxu1 %v3482_v61  ;;  %v3820_v54 = vld [vmem:[%s5744_s9 + $0x78] sm:$0xff]  ;;  %v3819_v8 = vld [vmem:[%s5744_s9 + $0x70] sm:$0xff]  ;;  %v3834_v61 = vld [vmem:[%s5744_s9 + $0xe8] sm:$0xff] }
 0x93f   :  { %3698 = vmatpush2.msra.mxu0 %v3353_v59  ;;  %3769 = vmatpush2.msra.mxu1 %v3481_v28  ;;  %v3816_v59 = vld [vmem:[%s5744_s9 + $0x58] sm:$0xff]  ;;  %v3831_v28 = vld [vmem:[%s5744_s9 + $0xd0] sm:$0xff] }
 0x940   :  { %3699 = vmatprep.subr.mxu0 %v3350_v63  ;;  %3770 = vmatprep.subr.mxu1 %v3478_v34  ;;  %v3815_v63 = vld [vmem:[%s5744_s9 + $0x50] sm:$0xff]  ;;  %v3868_v34 = vld [vmem:[%s5744_s9 + $0x1f8] sm:$0xff] }
 0x941   :  { %3700 = vmatpush2.msra.mxu0 %v3349_v55  ;;  %3771 = vmatpush2.msra.mxu1 %v3477_v57  ;;  %v3852_v55 = vld [vmem:[%s5744_s9 + $0x178] sm:$0xff]  ;;  %v3867_v57 = vld [vmem:[%s5744_s9 + $0x1f0] sm:$0xff] }
 0x942   :  { %3701 = vmatprep.subr.mxu0 %v3346_v5  ;;  %3772 = vmatprep.subr.mxu1 %v3474_v32  ;;  %v3830_v5 = vld [vmem:[%s5744_s9 + $0xc8] sm:$0xff]  ;;  %v3851_v32 = vld [vmem:[%s5744_s9 + $0x170] sm:$0xff] }
 0x943   :  { %3702 = vmatpush2.msra.mxu0 %v3345_v14  ;;  %3773 = vmatpush2.msra.mxu1 %v3473_v25  ;;  %v3814_v14 = vld [vmem:[%s5744_s9 + $0x48] sm:$0xff] }
 0x944   :  { %3703 = vmatprep.subr.mxu0 %v3342_v48  ;;  %3774 = vmatprep.subr.mxu1 %v3470_v52  ;;  %v3866_v25 = vld [vmem:[%s5744_s9 + $0x1e8] sm:$0xff]  ;;  %v3829_v48 = vld [vmem:[%s5744_s9 + $0xc0] sm:$0xff] }
 0x945   :  { %3704 = vmatpush2.msra.mxu0 %v3341_v11  ;;  %3775 = vmatpush2.msra.mxu1 %v3469_v22  ;;  %v3850_v52 = vld [vmem:[%s5744_s9 + $0x168] sm:$0xff]  ;;  %v3813_v11 = vld [vmem:[%s5744_s9 + $0x40] sm:$0xff] }
 0x946   :  { %3705 = vmatprep.subr.mxu0 %v3338_v51  ;;  %3776 = vmatprep.subr.mxu1 %v3466_v4  ;;  %v3865_v22 = vld [vmem:[%s5744_s9 + $0x1e0] sm:$0xff]  ;;  %v3828_v51 = vld [vmem:[%s5744_s9 + $0xb8] sm:$0xff] }
 0x947   :  { %3706 = vmatpush2.msra.mxu0 %v3337_v7  ;;  %3777 = vmatpush2.msra.mxu1 %v3465_v58  ;;  %v3849_v4 = vld [vmem:[%s5744_s9 + $0x160] sm:$0xff]  ;;  %v3812_v7 = vld [vmem:[%s5744_s9 + $0x38] sm:$0xff] }
 0x948   :  { %3707 = vmatprep.subr.mxu0 %v3334_v45  ;;  %3778 = vmatprep.subr.mxu1 %v3462_v60  ;;  %v3864_v58 = vld [vmem:[%s5744_s9 + $0x1d8] sm:$0xff]  ;;  %v3827_v45 = vld [vmem:[%s5744_s9 + $0xb0] sm:$0xff] }
 0x949   :  { %3708 = vmatpush2.msra.mxu0 %v3333_v3  ;;  %3779 = vmatpush2.msra.mxu1 %v3461_v38  ;;  %v3848_v60 = vld [vmem:[%s5744_s9 + $0x158] sm:$0xff]  ;;  %v3811_v3 = vld [vmem:[%s5744_s9 + $0x30] sm:$0xff] }
 0x94a   :  { %3709 = vmatprep.subr.mxu0 %v3330_v26  ;;  %3780 = vmatprep.subr.mxu1 %v3458_v16  ;;  %v3863_v38 = vld [vmem:[%s5744_s9 + $0x1d0] sm:$0xff]  ;;  %v3826_v26 = vld [vmem:[%s5744_s9 + $0xa8] sm:$0xff] }
 0x94b   :  { %3710 = vmatpush2.msra.mxu0 %v3329_v62  ;;  %3781 = vmatpush2.msra.mxu1 %v3457_v47  ;;  %v3847_v16 = vld [vmem:[%s5744_s9 + $0x150] sm:$0xff]  ;;  %v3810_v62 = vld [vmem:[%s5744_s9 + $0x28] sm:$0xff] }
 0x94c   :  { %3711 = vmatprep.subr.mxu0 %v3326_v49  ;;  %3782 = vmatprep.subr.mxu1 %v3454_v21  ;;  %v3862_v47 = vld [vmem:[%s5744_s9 + $0x1c8] sm:$0xff]  ;;  %v3825_v49 = vld [vmem:[%s5744_s9 + $0xa0] sm:$0xff] }
 0x94d   :  { %3712 = vmatpush2.msra.mxu0 %v3325_v24  ;;  %3783 = vmatpush2.msra.mxu1 %v3453_v50  ;;  %v3846_v21 = vld [vmem:[%s5744_s9 + $0x148] sm:$0xff]  ;;  %v3809_v24 = vld [vmem:[%s5744_s9 + $0x20] sm:$0xff] }
 0x94e   :  { %3713 = vmatprep.subr.mxu0 %v3322_v10  ;;  %3784 = vmatprep.subr.mxu1 %v3450_v9  ;;  %v3861_v50 = vld [vmem:[%s5744_s9 + $0x1c0] sm:$0xff]  ;;  %v3824_v10 = vld [vmem:[%s5744_s9 + $0x98] sm:$0xff] }
 0x94f   :  { %3714 = vmatpush2.msra.mxu0 %v3321_v13  ;;  %3785 = vmatpush2.msra.mxu1 %v3449_v2  ;;  %v3845_v9 = vld [vmem:[%s5744_s9 + $0x140] sm:$0xff]  ;;  %v3808_v13 = vld [vmem:[%s5744_s9 + $0x18] sm:$0xff] }
 0x950   :  { %3715 = vmatprep.subr.mxu0 %v3318_v19  ;;  %3786 = vmatprep.subr.mxu1 %v3446_v12  ;;  %v3860_v2 = vld [vmem:[%s5744_s9 + $0x1b8] sm:$0xff]  ;;  %v3823_v19 = vld [vmem:[%s5744_s9 + $0x90] sm:$0xff] }
 0x951   :  { %3716 = vmatpush2.msra.mxu0 %v3317_v15  ;;  %3787 = vmatpush2.msra.mxu1 %v3445_v44  ;;  %v3844_v12 = vld [vmem:[%s5744_s9 + $0x138] sm:$0xff]  ;;  %v3807_v15 = vld [vmem:[%s5744_s9 + $0x10] sm:$0xff] }
 0x952   :  { %3717 = vmatprep.subr.mxu0 %v3314_v1  ;;  %3788 = vmatprep.subr.mxu1 %v3442_v41  ;;  %v3859_v44 = vld [vmem:[%s5744_s9 + $0x1b0] sm:$0xff]  ;;  %v3822_v1 = vld [vmem:[%s5744_s9 + $0x88] sm:$0xff] }
 0x953   :  { %3718 = vmatpush2.msra.mxu0 %v3313_v0  ;;  %3789 = vmatpush2.msra.mxu1 %v3441_v36  ;;  %v3843_v41 = vld [vmem:[%s5744_s9 + $0x130] sm:$0xff]  ;;  %v3806_v0 = vld [vmem:[%s5744_s9 + $0x8] sm:$0xff] }
 0x954   :  { %3719 = vmatprep.subr.mxu0 %v3310_v23  ;;  %3790 = vmatprep.subr.mxu1 %v3438_v33  ;;  %v3858_v36 = vld [vmem:[%s5744_s9 + $0x1a8] sm:$0xff]  ;;  %v3821_v23 = vld [vmem:[%s5744_s9 + $0x80] sm:$0xff] }
 0x955   :  { %3720 = vmatpush2.msra.mxu0 %v3309_v29  ;;  %3791 = vmatpush2.msra.mxu1 %v3437_v31  ;;  %v3842_v33 = vld [vmem:[%s5744_s9 + $0x128] sm:$0xff]  ;;  %v3805_v29 = vld [vmem:[%s5744_s9] sm:$0xff] }
 0x956   :  { %3721 = vmatprep.subr.mxu0 %v3306_v35  ;;  %3792 = vmatprep.subr.mxu1 %v3434_v40  ;;  %v3857_v31 = vld [vmem:[%s5744_s9 + $0x1a0] sm:$0xff]  ;;  %v3856_v40 = vld [vmem:[%s5744_s9 + $0x198] sm:$0xff] }
 0x957   :  { %3722 = vmatpush2.msra.mxu0 %v3305_v39  ;;  %3793 = vmatpush2.msra.mxu1 %v3433_v43  ;;  %v3841_v35 = vld [vmem:[%s5744_s9 + $0x120] sm:$0xff]  ;;  %v3840_v39 = vld [vmem:[%s5744_s9 + $0x118] sm:$0xff]  ;;  %v3855_v43 = vld [vmem:[%s5744_s9 + $0x190] sm:$0xff] }
 0x958   :  { %3724 = vmatmul.mubr.f32.vlgmr.msra.gmra.mxu0 %v3235_v20  ;;  %3795 = vmatmul.mubr.f32.vlgmr.msra.gmra.mxu1 %v3237_v18  ;;  %v3817_v20 = vld [vmem:[%s5744_s9 + $0x60] sm:$0xff]  ;;  %v3832_v18 = vld [vmem:[%s5744_s9 + $0xd8] sm:$0xff] }
 0x959   :  { %4101 = vmatprep.subr.mxu0 %v3836_v6  ;;  %4136 = vmatprep.subr.mxu1 %v3868_v34  ;;  %v3839_v6 = vld [vmem:[%s5744_s9 + $0x110] sm:$0xff] }
 0x95a   :  { %4102 = vmatpush3.msra.mxu0 %v3820_v54  ;;  %4137 = vmatpush3.msra.mxu1 %v3852_v55  ;;  %v3854_v54 = vld [vmem:[%s5744_s9 + $0x188] sm:$0xff] }
 0x95b   :  { %4103 = vmatprep.subr.mxu0 %v3835_v37  ;;  %4138 = vmatprep.subr.mxu1 %v3867_v57  ;;  %v3838_v37 = vld [vmem:[%s5744_s9 + $0x108] sm:$0xff] }
 0x95c   :  { %4104 = vmatpush3.msra.mxu0 %v3819_v8  ;;  %4139 = vmatpush3.msra.mxu1 %v3851_v32  ;;  %v3853_v8 = vld [vmem:[%s5744_s9 + $0x180] sm:$0xff] }
 0x95d   :  { %4105 = vmatprep.subr.mxu0 %v3834_v61  ;;  %4140 = vmatprep.subr.mxu1 %v3866_v25  ;;  %v3837_v61 = vld [vmem:[%s5744_s9 + $0x100] sm:$0xff] }
 0x95e   :  { %4106 = vmatpush3.msra.mxu0 %v3818_v53  ;;  %4141 = vmatpush3.msra.mxu1 %v3850_v52  ;;  %v3495_v53 = vld [vmem:[%s5743_s8] sm:$0xf] }
 0x95f   :  { %4107 = vmatprep.subr.mxu0 %v3833_v42  ;;  %4142 = vmatprep.subr.mxu1 %v3865_v22  ;;  %v3500_v42 = vrot.slane %v3495_v53, %v3075_v27  ;;  %v3508_v25 = vrot.slane %v3495_v53, %v3083_v17  ;;  %v3512_v27 = vrot.slane %v3495_v53, %v3087_v56 }
 0x960   :  { %4108 = vmatpush3.msra.mxu0 %v3817_v20  ;;  %4143 = vmatpush3.msra.mxu1 %v3849_v4  ;;  %v3504_v20 = vrot.slane %v3495_v53, %v3079_v46 }
 0x961   :  { %4109 = vmatprep.subr.mxu0 %v3832_v18  ;;  %4144 = vmatprep.subr.mxu1 %v3864_v58 }
 0x962   :  { %4110 = vmatpush3.msra.mxu0 %v3816_v59  ;;  %4145 = vmatpush3.msra.mxu1 %v3848_v60 }
 0x963   :  { %4111 = vmatprep.subr.mxu0 %v3831_v28  ;;  %4146 = vmatprep.subr.mxu1 %v3863_v38 }
 0x964   :  { %4112 = vmatpush3.msra.mxu0 %v3815_v63  ;;  %4147 = vmatpush3.msra.mxu1 %v3847_v16 }
 0x965   :  { %4113 = vmatprep.subr.mxu0 %v3830_v5  ;;  %4148 = vmatprep.subr.mxu1 %v3862_v47 }
 0x966   :  { %4114 = vmatpush3.msra.mxu0 %v3814_v14  ;;  %4149 = vmatpush3.msra.mxu1 %v3846_v21 }
 0x967   :  { %4115 = vmatprep.subr.mxu0 %v3829_v48  ;;  %4150 = vmatprep.subr.mxu1 %v3861_v50 }
 0x968   :  { %4116 = vmatpush3.msra.mxu0 %v3813_v11  ;;  %4151 = vmatpush3.msra.mxu1 %v3845_v9 }
 0x969   :  { %4117 = vmatprep.subr.mxu0 %v3828_v51  ;;  %4152 = vmatprep.subr.mxu1 %v3860_v2 }
 0x96a   :  { %4118 = vmatpush3.msra.mxu0 %v3812_v7  ;;  %4153 = vmatpush3.msra.mxu1 %v3844_v12 }
 0x96b   :  { %4119 = vmatprep.subr.mxu0 %v3827_v45  ;;  %4154 = vmatprep.subr.mxu1 %v3859_v44 }
 0x96c   :  { %4120 = vmatpush3.msra.mxu0 %v3811_v3  ;;  %4155 = vmatpush3.msra.mxu1 %v3843_v41 }
 0x96d   :  { %4121 = vmatprep.subr.mxu0 %v3826_v26  ;;  %4156 = vmatprep.subr.mxu1 %v3858_v36 }
 0x96e   :  { %4122 = vmatpush3.msra.mxu0 %v3810_v62  ;;  %4157 = vmatpush3.msra.mxu1 %v3842_v33 }
 0x96f   :  { %4123 = vmatprep.subr.mxu0 %v3825_v49  ;;  %4158 = vmatprep.subr.mxu1 %v3857_v31 }
 0x970   :  { %4124 = vmatpush3.msra.mxu0 %v3809_v24  ;;  %4159 = vmatpush3.msra.mxu1 %v3841_v35 }
 0x971   :  { %4125 = vmatprep.subr.mxu0 %v3824_v10  ;;  %4160 = vmatprep.subr.mxu1 %v3856_v40 }
 0x972   :  { %4126 = vmatpush3.msra.mxu0 %v3808_v13  ;;  %4161 = vmatpush3.msra.mxu1 %v3840_v39 }
 0x973   :  { %4127 = vmatprep.subr.mxu0 %v3823_v19  ;;  %4162 = vmatprep.subr.mxu1 %v3855_v43 }
 0x974   :  { %4128 = vmatpush3.msra.mxu0 %v3807_v15  ;;  %4163 = vmatpush3.msra.mxu1 %v3839_v6 }
 0x975   :  { %4129 = vmatprep.subr.mxu0 %v3822_v1  ;;  %4164 = vmatprep.subr.mxu1 %v3854_v54 }
 0x976   :  { %4130 = vmatpush3.msra.mxu0 %v3806_v0  ;;  %4165 = vmatpush3.msra.mxu1 %v3838_v37 }
 0x977   :  { %4131 = vmatprep.subr.mxu0 %v3821_v23  ;;  %4166 = vmatprep.subr.mxu1 %v3853_v8 }
 0x978   :  { %4132 = vmatpush3.msra.mxu0 %v3805_v29  ;;  %4167 = vmatpush3.msra.mxu1 %v3837_v61 }
 0x9d7   :  { %v3583_v18 = vpop.f32.mrf.mxu0  ;;  %v3654_v59 = vpop.f32.mrf.mxu1 }
 0x9d8   :  { %v3584_v28 = vadd.f32 %v3583_v18, %v3500_v42 }
 0x9d9   :  { %v3585_v63 = vpop.f32.mrf.mxu0  ;;  %v3656_v57 = vpop.f32.mrf.mxu1 }
 0x9da   :  { %v3586_v34 = vadd.f32 %v3585_v63, %v3504_v20  ;;  %v3655_v55 = vadd.f32 %v3654_v59, %v3584_v28 }
 0x9dc   :  { %v3657_v5 = vadd.f32 %v3656_v57, %v3586_v34  ;;  %v3801_v14 = vmax.f32 %v3655_v55, 0.0 }
 0x9de   :  { %v3802_v32 = vmax.f32 %v3657_v5, 0.0 }
 0x9e0   :  { %3940 = vmatprep.mubr.f32.mxu0 %v3802_v32 }
 0x9e1   :  { %3941 = vmatmul.mubr.f32.vlgmr.msra.gmra.mxu0 %v3801_v14 }
 0xa18   :  { %v3725_v48 = vpop.f32.mrf.mxu0  ;;  %v3796_v46 = vpop.f32.mrf.mxu1 }
 0xa19   :  { %v3726_v52 = vadd.f32 %v3725_v48, %v3508_v25 }
 0xa1a   :  { %v3727_v11 = vpop.f32.mrf.mxu0  ;;  %v3798_v4 = vpop.f32.mrf.mxu1 }
 0xa1b   :  { %v3728_v22 = vadd.f32 %v3727_v11, %v3512_v27  ;;  %v3797_v51 = vadd.f32 %v3796_v46, %v3726_v52 }
 0xa1d   :  { %v3799_v7 = vadd.f32 %v3798_v4, %v3728_v22  ;;  %v3803_v45 = vmax.f32 %v3797_v51, 0.0 }
 0xa1f   :  { %v3804_v58 = vmax.f32 %v3799_v7, 0.0 }
 0xa21   :  { %4010 = vmatprep.mubr.f32.mxu1 %v3804_v58 }
 0xa22   :  { %4011 = vmatmul.mubr.f32.vlgmr.msra.gmra.mxu1 %v3803_v45 }
 0xaa1   :  { %v4133_v60 = vpop.f32.mrf.mxu0 }
 0xaa3   :  { %v4134_v3 = vpop.f32.mrf.mxu0 }
 0xaa4   :  { %v4135_v38 = vadd.f32 %v4134_v3, %v4133_v60 }
 0xaa6   :  { %v3943_v26 = vadd.f32 %v4135_v38, %v4070_v30 }
 0xae2   :  { %v4168_v17 = vpop.f32.mrf.mxu1 }
 0xae4   :  { %v4169_v56 = vpop.f32.mrf.mxu1 }
 0xae5   :  { %v4170_v16 = vadd.f32 %v4169_v56, %v4168_v17 }
 0xae7   :  { %v4013_v62 = vadd.f32 %v4170_v16, %v3943_v26 }
 0xae9   :  { %4017 = vst.msk [vmem:[#allocation8] sm:$0x3] %vm4016_vm0, %v4013_v62 }
 0xaea   :  { %4290 = shalt.err (!%p4287_p9)
}
 0xaeb   :  { %4027 = dma.vmem_to_hbm [thread:$0]  %s4025_s28, 32, %s5746_s11, [#allocation7]  }
 0xaec   :  { %4301 = dma.done.wait [#allocation7], 32  }
 0xaed   :  { %4302 = vsyncadd [#allocation7], 4294967264 }
 0xaee   :  { %4031 = vsyncpa [#allocation6], 1 }
 0xaef   :  { %4032 = vsyncpa [#allocation7], 1 }

</bundles_post_ra>
